<compile_context>
chip_gen: v7x
topology: tpu7x:2x2x1
jax: 0.10.0
libtpu: 0.0.40
codegen_flags: <defaults>
</compile_context>

<pallas_src>
import jax
import jax.numpy as jnp
from jax import lax
from jax.experimental import pallas as pl
from jax.experimental.pallas import tpu as pltpu


def _make_kernel(*, kh, kw, stride, tile_h, w_out, c_pad, count, eps):
    inv_count = 1.0 / float(count)

    def kernel(x_ref, w_ref, gamma_ref, beta_ref, o_ref, sum_ref, sumsq_ref):
        # x_ref:     (Hp, Wp, C_in)        padded NHWC image for this batch idx (bf16)
        # w_ref:     (KH*KW, C_in, C_pad)  conv taps (bf16, channel-padded)
        # gamma_ref: (1, C_pad)  beta_ref: (1, C_pad)   f32
        # o_ref:     (tile_h, W_out, C_pad) f32
        # sum_ref / sumsq_ref: (1, C_pad) f32 VMEM accumulators (persist over grid)
        p = pl.program_id(0)   # 0 = stats pass, 1 = normalize+store pass
        b = pl.program_id(1)   # batch index
        t = pl.program_id(2)   # output-row tile index

        @pl.when((p == 0) & (b == 0) & (t == 0))
        def _init():
            sum_ref[...] = jnp.zeros_like(sum_ref)
            sumsq_ref[...] = jnp.zeros_like(sumsq_ref)

        # --- Conv for this tile: sum over KHxKW taps of shifted-window matmuls.
        h_base = t * (tile_h * stride)
        acc = jnp.zeros((tile_h * w_out, c_pad), jnp.float32)
        for i in range(kh):
            for j in range(kw):
                if stride == 1:
                    win = x_ref[pl.ds(h_base + i, tile_h), pl.ds(j, w_out), :]
                else:
                    win = x_ref[pl.ds(h_base + i, tile_h, stride=stride),
                                pl.ds(j, w_out, stride=stride), :]
                win2 = win.reshape(tile_h * w_out, win.shape[-1])   # (M_tile, C_in) bf16
                tap = w_ref[i * kw + j]                              # (C_in, C_pad) bf16
                acc = acc + jnp.dot(win2, tap,
                                    preferred_element_type=jnp.float32)

        @pl.when(p == 0)
        def _stats():
            # Single-pass stats: per-channel sum and sum of squares.
            sum_ref[...] += jnp.sum(acc, axis=0, keepdims=True)
            sumsq_ref[...] += jnp.sum(acc * acc, axis=0, keepdims=True)
            # o_ref is not written in this pass; every block is overwritten in pass 1.

        @pl.when(p == 1)
        def _normalize():
            mean = sum_ref[...] * inv_count                                  # (1, C_pad)
            var = jnp.maximum(sumsq_ref[...] * inv_count - mean * mean, 0.0)  # biased var
            rstd = lax.rsqrt(var + eps)                                       # EUP
            scale = gamma_ref[...] * rstd
            shift = beta_ref[...] - mean * scale
            y = jnp.maximum(acc * scale + shift, 0.0)                         # BN affine + ReLU
            o_ref[...] = y.reshape(tile_h, w_out, c_pad)

    return kernel


def block_conv(x, weight, gamma, beta, *, stride, padding):
    """x: (N, C_in, H, W) f32.  weight: (C_out, C_in, KH, KW).  Returns NCHW f32."""
    n, c_in, h, w = x.shape
    c_out, _, kh, kw = weight.shape
    h_out = (h + 2 * padding - kh) // stride + 1
    w_out = (w + 2 * padding - kw) // stride + 1
    hp, wp = h + 2 * padding, w + 2 * padding

    # Lane-dense output channels.
    c_pad = ((c_out + 127) // 128) * 128

    # NCHW -> NHWC, zero-pad spatially, cast image to bf16 for the MXU.
    x_nhwc = jnp.transpose(x, (0, 2, 3, 1))
    xp = jnp.pad(x_nhwc, ((0, 0), (padding, padding), (padding, padding), (0, 0)))
    xp = xp.astype(jnp.bfloat16)

    # weight (C_out, C_in, KH, KW) -> (KH*KW, C_in, C_pad), zero channel pad, bf16.
    w_taps = jnp.transpose(weight, (2, 3, 1, 0)).reshape(kh * kw, c_in, c_out)
    w_taps = jnp.pad(w_taps, ((0, 0), (0, 0), (0, c_pad - c_out))).astype(jnp.bfloat16)

    gamma_p = jnp.pad(gamma.astype(jnp.float32), (0, c_pad - c_out)).reshape(1, c_pad)
    beta_p = jnp.pad(beta.astype(jnp.float32), (0, c_pad - c_out)).reshape(1, c_pad)

    # Output-row tile: largest divisor of H_out whose f32 output tile stays
    # inside a ~2 MiB budget (safe for v7x's smaller scoped VMEM, incl. double buffering).
    budget = 2 * 1024 * 1024
    tile_h = 1
    for cand in range(h_out, 0, -1):
        if h_out % cand == 0 and cand * w_out * c_pad * 4 <= budget:
            tile_h = cand
            break
    n_tiles = h_out // tile_h

    kernel = _make_kernel(kh=kh, kw=kw, stride=stride, tile_h=tile_h,
                          w_out=w_out, c_pad=c_pad,
                          count=n * h_out * w_out, eps=1e-5)

    # Advisory cost estimate (two conv passes: stats + normalize).
    flops = 2 * 2 * n * h_out * w_out * (c_in * kh * kw) * c_pad
    bytes_accessed = (2 * xp.size * 2 + w_taps.size * 2
                      + (gamma_p.size + beta_p.size) * 4
                      + n * h_out * w_out * c_pad * 4)

    out_nhwc = pl.pallas_call(
        kernel,
        out_shape=jax.ShapeDtypeStruct((n, h_out, w_out, c_pad), jnp.float32),
        grid_spec=pltpu.PrefetchScalarGridSpec(
            num_scalar_prefetch=0,
            grid=(2, n, n_tiles),              # (pass, batch, h-tile); pass is outermost
            in_specs=[
                pl.BlockSpec((None, hp, wp, c_in), lambda p, b, t: (b, 0, 0, 0)),
                pl.BlockSpec((kh * kw, c_in, c_pad), lambda p, b, t: (0, 0, 0)),
                pl.BlockSpec((1, c_pad), lambda p, b, t: (0, 0)),
                pl.BlockSpec((1, c_pad), lambda p, b, t: (0, 0)),
            ],
            out_specs=pl.BlockSpec((None, tile_h, w_out, c_pad),
                                   lambda p, b, t: (b, t, 0, 0)),
            scratch_shapes=[pltpu.VMEM((1, c_pad), jnp.float32),   # sum
                            pltpu.VMEM((1, c_pad), jnp.float32)],  # sum of squares
        ),
        compiler_params=pltpu.CompilerParams(
            # BN stats are a cross-tile reduction into shared scratch, so all
            # axes must stay sequential ("arbitrary").
            dimension_semantics=("arbitrary", "arbitrary", "arbitrary"),
            vmem_limit_bytes=32 * 1024 * 1024,
        ),
        cost_estimate=pl.CostEstimate(flops=flops, transcendentals=2 * c_pad,
                                      bytes_accessed=bytes_accessed),
    )(xp, w_taps, gamma_p, beta_p)

    # Drop channel padding, back to NCHW.
    out = out_nhwc[..., :c_out]
    return jnp.transpose(out, (0, 3, 1, 2))


if __name__ == "__main__":
    # Module config (kwargs of BlockConv.__init__).
    in_channels, out_channels = 4, 8
    kernel_size, padding, stride = 3, 1, 1

    key = jax.random.PRNGKey(0)
    k_x, k_w, k_g, k_b = jax.random.split(key, 4)

    # Deterministic synthetic parameters (shapes from __init__):
    #   conv.weight: (out_channels, in_channels, k, k), no bias
    #   bn.weight (gamma), bn.bias (beta): (out_channels,)
    x = jax.random.normal(k_x, (2, in_channels, 16, 16), dtype=jnp.float32)
    weight = 0.1 * jax.random.normal(
        k_w, (out_channels, in_channels, kernel_size, kernel_size), dtype=jnp.float32
    )
    gamma = 1.0 + 0.1 * jax.random.normal(k_g, (out_channels,), dtype=jnp.float32)
    beta = 0.1 * jax.random.normal(k_b, (out_channels,), dtype=jnp.float32)

    y = block_conv(x, weight, gamma, beta, stride=stride, padding=padding)
    jax.block_until_ready(y)
    assert y.shape == (2, out_channels, 16, 16)
    assert bool(jnp.all(jnp.isfinite(y)))
    print("KERNEL_OK")
</pallas_src>

<mosaic_0001>
module attributes {stable_mosaic.version = 11 : i64} {
  func.func @kernel(%arg0: i32, %arg1: i32, %arg2: i32, %arg3: memref<1x18x18x4xbf16, #tpu.memory_space<vmem>>, %arg4: memref<9x4x128xbf16, #tpu.memory_space<vmem>>, %arg5: memref<1x128xf32, #tpu.memory_space<vmem>>, %arg6: memref<1x128xf32, #tpu.memory_space<vmem>>, %arg7: memref<1x16x16x128xf32, #tpu.memory_space<vmem>>, %arg8: memref<1x128xf32, #tpu.memory_space<vmem>>, %arg9: memref<1x128xf32, #tpu.memory_space<vmem>>) attributes {dimension_semantics = [#tpu.dimension_semantics<arbitrary>, #tpu.dimension_semantics<arbitrary>, #tpu.dimension_semantics<arbitrary>], iteration_bounds = array<i64: 2, 2, 1>, scalar_prefetch = 0 : i64, scratch_operands = 2 : i64, tpu.core_type = #tpu.core_type<tc>, window_params = [{transform_indices = @transform_0, window_bounds = array<i64: 1, 18, 18, 4>}, {pipeline_mode = #tpu.pipeline_mode<synchronous>, transform_indices = @transform_1, window_bounds = array<i64: 9, 4, 128>}, {pipeline_mode = #tpu.pipeline_mode<synchronous>, transform_indices = @transform_2, window_bounds = array<i64: 1, 128>}, {pipeline_mode = #tpu.pipeline_mode<synchronous>, transform_indices = @transform_3, window_bounds = array<i64: 1, 128>}, {transform_indices = @transform_4, window_bounds = array<i64: 1, 16, 16, 128>}]} {
    %c0_i32 = arith.constant 0 : i32
    %0 = arith.cmpi eq, %arg0, %c0_i32 : i32
    %c0_i32_0 = arith.constant 0 : i32
    %1 = arith.cmpi eq, %arg1, %c0_i32_0 : i32
    %2 = arith.andi %0, %1 : i1
    %c0_i32_1 = arith.constant 0 : i32
    %3 = arith.cmpi eq, %arg2, %c0_i32_1 : i32
    %4 = arith.andi %2, %3 : i1
    %5 = arith.extui %4 : i1 to i32
    %c0_i32_2 = arith.constant 0 : i32
    %6 = arith.cmpi ne, %5, %c0_i32_2 : i32
    scf.if %6 {
      %cst_68 = arith.constant 0.000000e+00 : f32
      %96 = vector.broadcast %cst_68 : f32 to vector<1x128xf32>
      %c0_69 = arith.constant 0 : index
      %c0_70 = arith.constant 0 : index
      %97 = vector.load %arg8[%c0_69, %c0_70] : memref<1x128xf32, #tpu.memory_space<vmem>>, vector<1x128xf32>
      tpu.vector_store %arg8[%c0_69, %c0_70], %96 {strides = array<i32>} : memref<1x128xf32, #tpu.memory_space<vmem>>, vector<1x128xf32>,
      %cst_71 = arith.constant 0.000000e+00 : f32
      %98 = vector.broadcast %cst_71 : f32 to vector<1x128xf32>
      %c0_72 = arith.constant 0 : index
      %c0_73 = arith.constant 0 : index
      %99 = vector.load %arg9[%c0_72, %c0_73] : memref<1x128xf32, #tpu.memory_space<vmem>>, vector<1x128xf32>
      tpu.vector_store %arg9[%c0_72, %c0_73], %98 {strides = array<i32>} : memref<1x128xf32, #tpu.memory_space<vmem>>, vector<1x128xf32>,
    } else {
    }
    %c16_i32 = arith.constant 16 : i32
    %7 = arith.muli %arg2, %c16_i32 : i32
    %cst = arith.constant 0.000000e+00 : f32
    %8 = vector.broadcast %cst : f32 to vector<256x128xf32>
    %c0_i32_3 = arith.constant 0 : i32
    %9 = arith.addi %7, %c0_i32_3 : i32
    %c0 = arith.constant 0 : index
    %10 = arith.index_cast %9 : i32 to index
    %c0_4 = arith.constant 0 : index
    %c0_5 = arith.constant 0 : index
    %11 = vector.load %arg3[%c0, %10, %c0_4, %c0_5] : memref<1x18x18x4xbf16, #tpu.memory_space<vmem>>, vector<1x16x16x4xbf16>
    %12 = vector.shape_cast %11 : vector<1x16x16x4xbf16> to vector<16x16x4xbf16>
    %13 = vector.shape_cast %12 : vector<16x16x4xbf16> to vector<256x4xbf16>
    %c0_6 = arith.constant 0 : index
    %c0_7 = arith.constant 0 : index
    %c0_8 = arith.constant 0 : index
    %14 = vector.load %arg4[%c0_6, %c0_7, %c0_8] : memref<9x4x128xbf16, #tpu.memory_space<vmem>>, vector<1x4x128xbf16>
    %15 = vector.shape_cast %14 : vector<1x4x128xbf16> to vector<4x128xbf16>
    %cst_9 = arith.constant dense<0.000000e+00> : vector<256x128xf32>
    %16 = tpu.matmul %13, %15, %cst_9 {dimension_numbers = #tpu.dot_dimension_numbers<[1], [0], [0], [1], [0, 0, 1, 1], [], []>} : vector<256x4xbf16>, vector<4x128xbf16>, vector<256x128xf32> -> vector<256x128xf32>
    %17 = arith.addf %8, %16 : vector<256x128xf32>
    %c0_i32_10 = arith.constant 0 : i32
    %18 = arith.addi %7, %c0_i32_10 : i32
    %c0_11 = arith.constant 0 : index
    %19 = arith.index_cast %18 : i32 to index
    %c1 = arith.constant 1 : index
    %c0_12 = arith.constant 0 : index
    %20 = vector.load %arg3[%c0_11, %19, %c1, %c0_12] : memref<1x18x18x4xbf16, #tpu.memory_space<vmem>>, vector<1x16x16x4xbf16>
    %21 = vector.shape_cast %20 : vector<1x16x16x4xbf16> to vector<16x16x4xbf16>
    %22 = vector.shape_cast %21 : vector<16x16x4xbf16> to vector<256x4xbf16>
    %c1_13 = arith.constant 1 : index
    %c0_14 = arith.constant 0 : index
    %c0_15 = arith.constant 0 : index
    %23 = vector.load %arg4[%c1_13, %c0_14, %c0_15] : memref<9x4x128xbf16, #tpu.memory_space<vmem>>, vector<1x4x128xbf16>
    %24 = vector.shape_cast %23 : vector<1x4x128xbf16> to vector<4x128xbf16>
    %cst_16 = arith.constant dense<0.000000e+00> : vector<256x128xf32>
    %25 = tpu.matmul %22, %24, %cst_16 {dimension_numbers = #tpu.dot_dimension_numbers<[1], [0], [0], [1], [0, 0, 1, 1], [], []>} : vector<256x4xbf16>, vector<4x128xbf16>, vector<256x128xf32> -> vector<256x128xf32>
    %26 = arith.addf %17, %25 : vector<256x128xf32>
    %c0_i32_17 = arith.constant 0 : i32
    %27 = arith.addi %7, %c0_i32_17 : i32
    %c0_18 = arith.constant 0 : index
    %28 = arith.index_cast %27 : i32 to index
    %c2 = arith.constant 2 : index
    %c0_19 = arith.constant 0 : index
    %29 = vector.load %arg3[%c0_18, %28, %c2, %c0_19] : memref<1x18x18x4xbf16, #tpu.memory_space<vmem>>, vector<1x16x16x4xbf16>
    %30 = vector.shape_cast %29 : vector<1x16x16x4xbf16> to vector<16x16x4xbf16>
    %31 = vector.shape_cast %30 : vector<16x16x4xbf16> to vector<256x4xbf16>
    %c2_20 = arith.constant 2 : index
    %c0_21 = arith.constant 0 : index
    %c0_22 = arith.constant 0 : index
    %32 = vector.load %arg4[%c2_20, %c0_21, %c0_22] : memref<9x4x128xbf16, #tpu.memory_space<vmem>>, vector<1x4x128xbf16>
    %33 = vector.shape_cast %32 : vector<1x4x128xbf16> to vector<4x128xbf16>
    %cst_23 = arith.constant dense<0.000000e+00> : vector<256x128xf32>
    %34 = tpu.matmul %31, %33, %cst_23 {dimension_numbers = #tpu.dot_dimension_numbers<[1], [0], [0], [1], [0, 0, 1, 1], [], []>} : vector<256x4xbf16>, vector<4x128xbf16>, vector<256x128xf32> -> vector<256x128xf32>
    %35 = arith.addf %26, %34 : vector<256x128xf32>
    %c1_i32 = arith.constant 1 : i32
    %36 = arith.addi %7, %c1_i32 : i32
    %c0_24 = arith.constant 0 : index
    %37 = arith.index_cast %36 : i32 to index
    %c0_25 = arith.constant 0 : index
    %c0_26 = arith.constant 0 : index
    %38 = vector.load %arg3[%c0_24, %37, %c0_25, %c0_26] : memref<1x18x18x4xbf16, #tpu.memory_space<vmem>>, vector<1x16x16x4xbf16>
    %39 = vector.shape_cast %38 : vector<1x16x16x4xbf16> to vector<16x16x4xbf16>
    %40 = vector.shape_cast %39 : vector<16x16x4xbf16> to vector<256x4xbf16>
    %c3 = arith.constant 3 : index
    %c0_27 = arith.constant 0 : index
    %c0_28 = arith.constant 0 : index
    %41 = vector.load %arg4[%c3, %c0_27, %c0_28] : memref<9x4x128xbf16, #tpu.memory_space<vmem>>, vector<1x4x128xbf16>
    %42 = vector.shape_cast %41 : vector<1x4x128xbf16> to vector<4x128xbf16>
    %cst_29 = arith.constant dense<0.000000e+00> : vector<256x128xf32>
    %43 = tpu.matmul %40, %42, %cst_29 {dimension_numbers = #tpu.dot_dimension_numbers<[1], [0], [0], [1], [0, 0, 1, 1], [], []>} : vector<256x4xbf16>, vector<4x128xbf16>, vector<256x128xf32> -> vector<256x128xf32>
    %44 = arith.addf %35, %43 : vector<256x128xf32>
    %c1_i32_30 = arith.constant 1 : i32
    %45 = arith.addi %7, %c1_i32_30 : i32
    %c0_31 = arith.constant 0 : index
    %46 = arith.index_cast %45 : i32 to index
    %c1_32 = arith.constant 1 : index
    %c0_33 = arith.constant 0 : index
    %47 = vector.load %arg3[%c0_31, %46, %c1_32, %c0_33] : memref<1x18x18x4xbf16, #tpu.memory_space<vmem>>, vector<1x16x16x4xbf16>
    %48 = vector.shape_cast %47 : vector<1x16x16x4xbf16> to vector<16x16x4xbf16>
    %49 = vector.shape_cast %48 : vector<16x16x4xbf16> to vector<256x4xbf16>
    %c4 = arith.constant 4 : index
    %c0_34 = arith.constant 0 : index
    %c0_35 = arith.constant 0 : index
    %50 = vector.load %arg4[%c4, %c0_34, %c0_35] : memref<9x4x128xbf16, #tpu.memory_space<vmem>>, vector<1x4x128xbf16>
    %51 = vector.shape_cast %50 : vector<1x4x128xbf16> to vector<4x128xbf16>
    %cst_36 = arith.constant dense<0.000000e+00> : vector<256x128xf32>
    %52 = tpu.matmul %49, %51, %cst_36 {dimension_numbers = #tpu.dot_dimension_numbers<[1], [0], [0], [1], [0, 0, 1, 1], [], []>} : vector<256x4xbf16>, vector<4x128xbf16>, vector<256x128xf32> -> vector<256x128xf32>
    %53 = arith.addf %44, %52 : vector<256x128xf32>
    %c1_i32_37 = arith.constant 1 : i32
    %54 = arith.addi %7, %c1_i32_37 : i32
    %c0_38 = arith.constant 0 : index
    %55 = arith.index_cast %54 : i32 to index
    %c2_39 = arith.constant 2 : index
    %c0_40 = arith.constant 0 : index
    %56 = vector.load %arg3[%c0_38, %55, %c2_39, %c0_40] : memref<1x18x18x4xbf16, #tpu.memory_space<vmem>>, vector<1x16x16x4xbf16>
    %57 = vector.shape_cast %56 : vector<1x16x16x4xbf16> to vector<16x16x4xbf16>
    %58 = vector.shape_cast %57 : vector<16x16x4xbf16> to vector<256x4xbf16>
    %c5 = arith.constant 5 : index
    %c0_41 = arith.constant 0 : index
    %c0_42 = arith.constant 0 : index
    %59 = vector.load %arg4[%c5, %c0_41, %c0_42] : memref<9x4x128xbf16, #tpu.memory_space<vmem>>, vector<1x4x128xbf16>
    %60 = vector.shape_cast %59 : vector<1x4x128xbf16> to vector<4x128xbf16>
    %cst_43 = arith.constant dense<0.000000e+00> : vector<256x128xf32>
    %61 = tpu.matmul %58, %60, %cst_43 {dimension_numbers = #tpu.dot_dimension_numbers<[1], [0], [0], [1], [0, 0, 1, 1], [], []>} : vector<256x4xbf16>, vector<4x128xbf16>, vector<256x128xf32> -> vector<256x128xf32>
    %62 = arith.addf %53, %61 : vector<256x128xf32>
    %c2_i32 = arith.constant 2 : i32
    %63 = arith.addi %7, %c2_i32 : i32
    %c0_44 = arith.constant 0 : index
    %64 = arith.index_cast %63 : i32 to index
    %c0_45 = arith.constant 0 : index
    %c0_46 = arith.constant 0 : index
    %65 = vector.load %arg3[%c0_44, %64, %c0_45, %c0_46] : memref<1x18x18x4xbf16, #tpu.memory_space<vmem>>, vector<1x16x16x4xbf16>
    %66 = vector.shape_cast %65 : vector<1x16x16x4xbf16> to vector<16x16x4xbf16>
    %67 = vector.shape_cast %66 : vector<16x16x4xbf16> to vector<256x4xbf16>
    %c6 = arith.constant 6 : index
    %c0_47 = arith.constant 0 : index
    %c0_48 = arith.constant 0 : index
    %68 = vector.load %arg4[%c6, %c0_47, %c0_48] : memref<9x4x128xbf16, #tpu.memory_space<vmem>>, vector<1x4x128xbf16>
    %69 = vector.shape_cast %68 : vector<1x4x128xbf16> to vector<4x128xbf16>
    %cst_49 = arith.constant dense<0.000000e+00> : vector<256x128xf32>
    %70 = tpu.matmul %67, %69, %cst_49 {dimension_numbers = #tpu.dot_dimension_numbers<[1], [0], [0], [1], [0, 0, 1, 1], [], []>} : vector<256x4xbf16>, vector<4x128xbf16>, vector<256x128xf32> -> vector<256x128xf32>
    %71 = arith.addf %62, %70 : vector<256x128xf32>
    %c2_i32_50 = arith.constant 2 : i32
    %72 = arith.addi %7, %c2_i32_50 : i32
    %c0_51 = arith.constant 0 : index
    %73 = arith.index_cast %72 : i32 to index
    %c1_52 = arith.constant 1 : index
    %c0_53 = arith.constant 0 : index
    %74 = vector.load %arg3[%c0_51, %73, %c1_52, %c0_53] : memref<1x18x18x4xbf16, #tpu.memory_space<vmem>>, vector<1x16x16x4xbf16>
    %75 = vector.shape_cast %74 : vector<1x16x16x4xbf16> to vector<16x16x4xbf16>
    %76 = vector.shape_cast %75 : vector<16x16x4xbf16> to vector<256x4xbf16>
    %c7 = arith.constant 7 : index
    %c0_54 = arith.constant 0 : index
    %c0_55 = arith.constant 0 : index
    %77 = vector.load %arg4[%c7, %c0_54, %c0_55] : memref<9x4x128xbf16, #tpu.memory_space<vmem>>, vector<1x4x128xbf16>
    %78 = vector.shape_cast %77 : vector<1x4x128xbf16> to vector<4x128xbf16>
    %cst_56 = arith.constant dense<0.000000e+00> : vector<256x128xf32>
    %79 = tpu.matmul %76, %78, %cst_56 {dimension_numbers = #tpu.dot_dimension_numbers<[1], [0], [0], [1], [0, 0, 1, 1], [], []>} : vector<256x4xbf16>, vector<4x128xbf16>, vector<256x128xf32> -> vector<256x128xf32>
    %80 = arith.addf %71, %79 : vector<256x128xf32>
    %c2_i32_57 = arith.constant 2 : i32
    %81 = arith.addi %7, %c2_i32_57 : i32
    %c0_58 = arith.constant 0 : index
    %82 = arith.index_cast %81 : i32 to index
    %c2_59 = arith.constant 2 : index
    %c0_60 = arith.constant 0 : index
    %83 = vector.load %arg3[%c0_58, %82, %c2_59, %c0_60] : memref<1x18x18x4xbf16, #tpu.memory_space<vmem>>, vector<1x16x16x4xbf16>
    %84 = vector.shape_cast %83 : vector<1x16x16x4xbf16> to vector<16x16x4xbf16>
    %85 = vector.shape_cast %84 : vector<16x16x4xbf16> to vector<256x4xbf16>
    %c8 = arith.constant 8 : index
    %c0_61 = arith.constant 0 : index
    %c0_62 = arith.constant 0 : index
    %86 = vector.load %arg4[%c8, %c0_61, %c0_62] : memref<9x4x128xbf16, #tpu.memory_space<vmem>>, vector<1x4x128xbf16>
    %87 = vector.shape_cast %86 : vector<1x4x128xbf16> to vector<4x128xbf16>
    %cst_63 = arith.constant dense<0.000000e+00> : vector<256x128xf32>
    %88 = tpu.matmul %85, %87, %cst_63 {dimension_numbers = #tpu.dot_dimension_numbers<[1], [0], [0], [1], [0, 0, 1, 1], [], []>} : vector<256x4xbf16>, vector<4x128xbf16>, vector<256x128xf32> -> vector<256x128xf32>
    %89 = arith.addf %80, %88 : vector<256x128xf32>
    %c0_i32_64 = arith.constant 0 : i32
    %90 = arith.cmpi eq, %arg0, %c0_i32_64 : i32
    %91 = arith.extui %90 : i1 to i32
    %c0_i32_65 = arith.constant 0 : i32
    %92 = arith.cmpi ne, %91, %c0_i32_65 : i32
    scf.if %92 {
      %c0_68 = arith.constant 0 : index
      %c0_69 = arith.constant 0 : index
      %96 = vector.load %arg8[%c0_68, %c0_69] : memref<1x128xf32, #tpu.memory_space<vmem>>, vector<1x128xf32>
      %cst_70 = arith.constant dense<0.000000e+00> : vector<128xf32>
      %97 = vector.multi_reduction <add>, %89, %cst_70 [0] : vector<256x128xf32> to vector<128xf32>
      %98 = vector.shape_cast %97 : vector<128xf32> to vector<1x128xf32>
      %99 = arith.addf %96, %98 : vector<1x128xf32>
      %c0_71 = arith.constant 0 : index
      %c0_72 = arith.constant 0 : index
      %100 = vector.load %arg8[%c0_71, %c0_72] : memref<1x128xf32, #tpu.memory_space<vmem>>, vector<1x128xf32>
      tpu.vector_store %arg8[%c0_71, %c0_72], %99 {strides = array<i32>} : memref<1x128xf32, #tpu.memory_space<vmem>>, vector<1x128xf32>,
      %c0_73 = arith.constant 0 : index
      %c0_74 = arith.constant 0 : index
      %101 = vector.load %arg9[%c0_73, %c0_74] : memref<1x128xf32, #tpu.memory_space<vmem>>, vector<1x128xf32>
      %102 = arith.mulf %89, %89 : vector<256x128xf32>
      %cst_75 = arith.constant dense<0.000000e+00> : vector<128xf32>
      %103 = vector.multi_reduction <add>, %102, %cst_75 [0] : vector<256x128xf32> to vector<128xf32>
      %104 = vector.shape_cast %103 : vector<128xf32> to vector<1x128xf32>
      %105 = arith.addf %101, %104 : vector<1x128xf32>
      %c0_76 = arith.constant 0 : index
      %c0_77 = arith.constant 0 : index
      %106 = vector.load %arg9[%c0_76, %c0_77] : memref<1x128xf32, #tpu.memory_space<vmem>>, vector<1x128xf32>
      tpu.vector_store %arg9[%c0_76, %c0_77], %105 {strides = array<i32>} : memref<1x128xf32, #tpu.memory_space<vmem>>, vector<1x128xf32>,
    } else {
    }
    %c1_i32_66 = arith.constant 1 : i32
    %93 = arith.cmpi eq, %arg0, %c1_i32_66 : i32
    %94 = arith.extui %93 : i1 to i32
    %c0_i32_67 = arith.constant 0 : i32
    %95 = arith.cmpi ne, %94, %c0_i32_67 : i32
    scf.if %95 {
      %c0_68 = arith.constant 0 : index
      %c0_69 = arith.constant 0 : index
      %96 = vector.load %arg8[%c0_68, %c0_69] : memref<1x128xf32, #tpu.memory_space<vmem>>, vector<1x128xf32>
      %cst_70 = arith.constant 0.001953125 : f32
      %97 = vector.broadcast %cst_70 : f32 to vector<1x128xf32>
      %98 = arith.mulf %96, %97 : vector<1x128xf32>
      %c0_71 = arith.constant 0 : index
      %c0_72 = arith.constant 0 : index
      %99 = vector.load %arg9[%c0_71, %c0_72] : memref<1x128xf32, #tpu.memory_space<vmem>>, vector<1x128xf32>
      %cst_73 = arith.constant 0.001953125 : f32
      %100 = vector.broadcast %cst_73 : f32 to vector<1x128xf32>
      %101 = arith.mulf %99, %100 : vector<1x128xf32>
      %102 = arith.mulf %98, %98 : vector<1x128xf32>
      %103 = arith.subf %101, %102 : vector<1x128xf32>
      %cst_74 = arith.constant 0.000000e+00 : f32
      %104 = vector.broadcast %cst_74 : f32 to vector<1x128xf32>
      %105 = arith.maximumf %103, %104 : vector<1x128xf32>
      %cst_75 = arith.constant 9.99999974E-6 : f32
      %106 = vector.broadcast %cst_75 : f32 to vector<1x128xf32>
      %107 = arith.addf %105, %106 : vector<1x128xf32>
      %108 = math.rsqrt %107 : vector<1x128xf32>
      %c0_76 = arith.constant 0 : index
      %c0_77 = arith.constant 0 : index
      %109 = vector.load %arg5[%c0_76, %c0_77] : memref<1x128xf32, #tpu.memory_space<vmem>>, vector<1x128xf32>
      %110 = arith.mulf %109, %108 : vector<1x128xf32>
      %c0_78 = arith.constant 0 : index
      %c0_79 = arith.constant 0 : index
      %111 = vector.load %arg6[%c0_78, %c0_79] : memref<1x128xf32, #tpu.memory_space<vmem>>, vector<1x128xf32>
      %112 = arith.mulf %98, %110 : vector<1x128xf32>
      %113 = arith.subf %111, %112 : vector<1x128xf32>
      %114 = vector.broadcast %110 : vector<1x128xf32> to vector<256x128xf32>
      %115 = arith.mulf %89, %114 : vector<256x128xf32>
      %116 = vector.broadcast %113 : vector<1x128xf32> to vector<256x128xf32>
      %117 = arith.addf %115, %116 : vector<256x128xf32>
      %cst_80 = arith.constant 0.000000e+00 : f32
      %118 = vector.broadcast %cst_80 : f32 to vector<256x128xf32>
      %119 = arith.maximumf %117, %118 : vector<256x128xf32>
      %120 = vector.shape_cast %119 : vector<256x128xf32> to vector<16x16x128xf32>
      %c0_81 = arith.constant 0 : index
      %c0_82 = arith.constant 0 : index
      %c0_83 = arith.constant 0 : index
      %c0_84 = arith.constant 0 : index
      %121 = vector.load %arg7[%c0_81, %c0_82, %c0_83, %c0_84] : memref<1x16x16x128xf32, #tpu.memory_space<vmem>>, vector<1x16x16x128xf32>
      %122 = vector.shape_cast %121 : vector<1x16x16x128xf32> to vector<16x16x128xf32>
      %123 = vector.shape_cast %120 : vector<16x16x128xf32> to vector<1x16x16x128xf32>
      tpu.vector_store %arg7[%c0_81, %c0_82, %c0_83, %c0_84], %123 {strides = array<i32>} : memref<1x16x16x128xf32, #tpu.memory_space<vmem>>, vector<1x16x16x128xf32>,
    } else {
    }
    return
  }
  func.func @transform_0(%arg0: i32, %arg1: i32, %arg2: i32) -> (i32, i32, i32, i32) {
    %c0_i32 = arith.constant 0 : i32
    %c0_i32_0 = arith.constant 0 : i32
    %c0_i32_1 = arith.constant 0 : i32
    %c0_i32_2 = arith.constant 0 : i32
    return %arg1, %c0_i32, %c0_i32_0, %c0_i32_1 : i32, i32, i32, i32
  }
  func.func @transform_1(%arg0: i32, %arg1: i32, %arg2: i32) -> (i32, i32, i32) {
    %c0_i32 = arith.constant 0 : i32
    %c0_i32_0 = arith.constant 0 : i32
    %c0_i32_1 = arith.constant 0 : i32
    %c0_i32_2 = arith.constant 0 : i32
    return %c0_i32, %c0_i32_0, %c0_i32_1 : i32, i32, i32
  }
  func.func @transform_2(%arg0: i32, %arg1: i32, %arg2: i32) -> (i32, i32) {
    %c0_i32 = arith.constant 0 : i32
    %c0_i32_0 = arith.constant 0 : i32
    %c0_i32_1 = arith.constant 0 : i32
    return %c0_i32, %c0_i32_0 : i32, i32
  }
  func.func @transform_3(%arg0: i32, %arg1: i32, %arg2: i32) -> (i32, i32) {
    %c0_i32 = arith.constant 0 : i32
    %c0_i32_0 = arith.constant 0 : i32
    %c0_i32_1 = arith.constant 0 : i32
    return %c0_i32, %c0_i32_0 : i32, i32
  }
  func.func @transform_4(%arg0: i32, %arg1: i32, %arg2: i32) -> (i32, i32, i32, i32) {
    %c0_i32 = arith.constant 0 : i32
    %c0_i32_0 = arith.constant 0 : i32
    %c0_i32_1 = arith.constant 0 : i32
    return %arg1, %arg2, %c0_i32, %c0_i32_0 : i32, i32, i32, i32
  }
}

</mosaic_0001>

<bundles_post_ra>
// kernel: tpu_custom_call.1
= control target key start
LH: loop header
LB: loop body
LE: loop exit
PB: predicated region body
PF: predicated region fallthrough
CT: control target
= control target key end

     0   :  { %9 = vsyncpa [#allocation5], 0  ;;  %s8905_s0 = inlined_call_operand.vmem [shape: bf16[2,18,18,4], index: 0, kind: input, shape index: {}]   ;;  %s8906_s1 = inlined_call_operand.vmem [shape: bf16[9,4,128], index: 1, kind: input, shape index: {}]   ;;  %s8907_s2 = inlined_call_operand.vmem [shape: f32[1,128], index: 2, kind: input, shape index: {}]   ;;  %s8908_s3 = inlined_call_operand.vmem [shape: f32[1,128], index: 3, kind: input, shape index: {}]   ;;  %s8909_s4 = inlined_call_operand.hbm [shape: f32[2,16,16,128], index: 4, kind: output, shape index: {}]  }
   0x1   :  { %11 = vsyncpa [#allocation5 + $0x1], 0  ;;  %s6763_s15 = smov 0   ;;  %s6765_s16 = smov 0  }
   0x2   :  { %s6767_s17 = smov 0   ;;  %s6769_s18 = smov 0  }
   0x3   :  { %s6771_s19 = smov 0   ;;  %s6773_s20 = smov 0  }
   0x4   :  { %s6775_s21 = smov 0   ;;  %s6777_s22 = smov 0  }
   0x5 LB: > { %s5178_s23 = sadd.s32 4294967295, %s6732_s22   ;;  %s5179_s24 = sadd.s32 4294967294, %s6732_s22   ;;  %s6732_s22 = sphi %s6777_s22, %s17_s22   ;;  %s6728_s21 = sphi %s6775_s21, %s8981_s21   ;;  %s6724_s20 = sphi %s6773_s20, %s8980_s20   ;;  %s6720_s19 = sphi %s6771_s19, %s8979_s19   ;;  %s6716_s18 = sphi %s6769_s18, %s8978_s18   ;;  %s6712_s17 = sphi %s6767_s17, %s8977_s17   ;;  %s6708_s16 = sphi %s6765_s16, %s8976_s16   ;;  %s6704_s15 = sphi %s6763_s15, %s8975_s15  }
   0x6   : > { %s32_s25 = sadd.s32 1, %s6724_s20  ;;  %s36_s26 = sadd.s32 1, %s6728_s21 }
   0x7   : > { %p34_p0 = scmp.ge.s32.totalorder %s32_s25, 2  ;;  %s134_s27 = sadd.s32 1, %s6712_s17 }
   0x8   : > { %p144_p1 = scmp.ne.s32.totalorder %s6712_s17, %s6708_s16  ;;  %p145_p2 = scmp.eq.s32.totalorder %s5178_s23, 3 }
   0x9   : > { %s8983_s25 = smov (%p34_p0, %s32_s25), 0  ;;  %s8985_s26 = smov (!%p34_p0, %s36_s26), %s6728_s21 }
   0xa   : > { %s129_s28 = ssub.s32 %s6724_s20, %s8983_s25  ;;  %p6815_p3 = por %p145_p2, %p144_p1 }
   0xb   : > { %p38_p4 = scmp.ge.s32.totalorder %s8985_s26, 2  ;;  %p132_p5 = scmp.eq.s32.totalorder %s129_s28, 0 }
   0xc   : > { %p150_p6 = scmp.ne.s32.totalorder %s6708_s16, %s6704_s15  ;;  %p151_p7 = scmp.eq.s32.totalorder %s5179_s24, 3 }
   0xd   : > { %s8987_s26 = smov (%p38_p4, %s8985_s26), 0  ;;  %p5182_p9 = scmp.ge.s32.totalorder %s6732_s22, 1 }
   0xe   : > { %s6824_s30 = scalar_select %p132_p5, %s6712_s17, %s134_s27  }
   0xf   : > { %p6826_p8 = por %p151_p7, %p150_p6  ;;  %p186_p10 = scmp.lt.s32.totalorder %s6732_s22, 5 }
  0x11   : > { %p187_p11 = pnand %p5182_p9, %p186_p10 }
  0x13   : > { %190 = sbr.rel (%p187_p11) target bundleno = 752 (0x2f0), region = 36 }
  0x1a   : > { %s209_s6 = sand.u32 1, %s6708_s16   ;;  %p212_p12 = scmp.lt.s32.totalorder %s6716_s18, 1 }
  0x1b   : > { %s5183_s7 = sshll.u32 %s209_s6, 8  ;;  %p219_p13 = scmp.eq.s32.totalorder %s6720_s19, 0 }
  0x1c   : > { %p220_p0 = scmp.eq.s32.totalorder %s6716_s18, 0  ;;  %s6844_s13 = scalar_lea.vmem [#allocation4], %s5183_s7 }
  0x1d   : > { %s213_s8 = scalar_select %p212_p12, %s6716_s18, 1 }
  0x1e   : > { %p221_p1 = pnand %p220_p0, %p219_p13 }
  0x1f   : > { %s6457_s9 = smul.u32 216, %s213_s8  ;;  %v6734_v0 = vmov (!%p221_p1), 0.0  }
  0x20   : > { %227 = sbr.rel (%p221_p1) target bundleno = 39 (0x27), region = 40  ;;  %228 = vst [vmem:[#allocation2] sm:$0x1] (!%p221_p1), %v6734_v0  ;;  %229 = vst [vmem:[#allocation3] sm:$0x1] (!%p221_p1), %v6734_v0 }
  0x21   : > { %s6842_s12 = scalar_lea.vmem %s8905_s0, %s6457_s9 }
  0x27 PF: > { %v5186_v1 = vld [vmem:[%s8906_s1 + $0x2] sm:$0x3]  ;;  %vm769_vm0 = vcmask 1041408   ;;  %v5413_v2 = vld [vmem:[%s8906_s1 + $0x8] sm:$0x3]  ;;  %vm720_vm4 = vcmask 31744  }
  0x28   : > { %6447 = vmatprep.subr.msk.bf16.mxu1 %vm769_vm0, %v5186_v1  ;;  %6451 = vmatprep.subr.msk.bf16.mxu0 %vm769_vm0, %v5413_v2  ;;  %v771_v3 = vsel %vm769_vm0, %v5186_v1, 0  ;;  %v6856_v4 = vsel %vm769_vm0, %v5413_v2, 0  ;;  %v234_v5 = vld [vmem:[%s6842_s12] sm:$0xf]  ;;  %v235_v6 = vld [vmem:[%s6842_s12 + $0x4] sm:$0xf] }
  0x29   : > { %8925 = vst [vmem:[#allocation7_spill] sm:$0xff] %v6856_v4  ;;  %5884 = vmatpush3.bf16.msra.mxu1 %v771_v3  ;;  %6020 = vmatpush3.bf16.msra.mxu0 %v6856_v4  ;;  %v267_v7 = vld [vmem:[%s6842_s12 + $0x8] sm:$0x1]  ;;  %vm283_vm1 = vsmask.f32 3328  ;;  %v287_v8 = vshrl.u32 %v234_v5, 16 }
  0x2a   : > { %vm284_vm2 = vsmask.f32 7440  ;;  %v290_v9 = vshll.u32 %v234_v5, 16  ;;  %v296_v10 = vshll.u32 %v235_v6, 16  ;;  %v300_v11 = vshrl.u32 %v235_v6, 16  ;;  %p5722_p2 = scmp.ne.s32.totalorder %s6720_s19, 0 }
  0x2b   : > { %v266_v12 = vld [vmem:[%s8906_s1] sm:$0x3]  ;;  %v306_v13 = vshll.u32 %v267_v7, 16  ;;  %v5365_v14 = vld [vmem:[%s6842_s12 + $0xc] sm:$0xf]  ;;  %v289_v16 = vrot.slane %v287_v8, 4  ;;  %vm6886_vm3 = vmor %vm283_vm1, %vm284_vm2 }
  0x2c   : > { %6448 = vmatprep.subr.msk.bf16.mxu1 %vm769_vm0, %v266_v12  ;;  %v6868_v15 = vld [vmem:[%s6842_s12 + $0x10] sm:$0xf]  ;;  %v292_v17 = vrot.slane %v290_v9, 5  ;;  %v298_v18 = vrot.slane %v296_v10, 5  ;;  %v302_v19 = vrot.slane %v300_v11, 4  ;;  %v2094_v22 = vshrl.u32 %v5365_v14, 16 }
  0x2d   : > { %v6871_v20 = vld [vmem:[%s6842_s12 + $0x14] sm:$0x1]  ;;  %v308_v21 = vrot.slane %v306_v13, 5  ;;  %v2097_v23 = vshll.u32 %v5365_v14, 16  ;;  %v2103_v24 = vshll.u32 %v6868_v15, 16  ;;  %v2107_v28 = vshrl.u32 %v6868_v15, 16 }
  0x2e   : > { %v6877_v25 = vld [vmem:[%s8906_s1 + $0xa] sm:$0x3]  ;;  %v293_v26 = vor.u32 %v292_v17, %v289_v16  ;;  %v303_v27 = vor.u32 %v302_v19, %v298_v18  ;;  %v2113_v29 = vshll.u32 %v6871_v20, 16  ;;  %v236_v30 = vld [vmem:[%s6842_s12 + $0xc] sm:$0xf]  ;;  %v2096_v32 = vrot.slane %v2094_v22, 4 }
  0x2f   : > { %6453 = vmatprep.subr.msk.bf16.mxu0 %vm769_vm0, %v6877_v25  ;;  %v2099_v33 = vrot.slane %v2097_v23, 5  ;;  %v2105_v34 = vrot.slane %v2103_v24, 5  ;;  %v237_v35 = vld [vmem:[%s6842_s12 + $0x10] sm:$0xf]  ;;  %v2109_v38 = vrot.slane %v2107_v28, 4  ;;  %v311_v42 = vshrl.u32 %v236_v30, 16 }
  0x30   : > { %v294_v36 = vrot.slane %v293_v26, 4  ;;  %v304_v37 = vrot.slane %v303_v27, 4  ;;  %v2115_v40 = vrot.slane %v2113_v29, 5  ;;  %v268_v41 = vld [vmem:[%s6842_s12 + $0x14] sm:$0x1]  ;;  %v314_v43 = vshll.u32 %v236_v30, 16 }
  0x31   : > { %v2100_v39 = vor.u32 %v2099_v33, %v2096_v32  ;;  %v2110_v46 = vor.u32 %v2109_v38, %v2105_v34  ;;  %v320_v47 = vshll.u32 %v237_v35, 16  ;;  %v313_v50 = vrot.slane %v311_v42, 4  ;;  %v5368_v56 = vld [vmem:[%s6842_s12 + $0x18] sm:$0xf]  ;;  %v6903_v61 = vld [vmem:[%s6842_s12 + $0x1c] sm:$0xf] }
  0x32   : > { %v299_v44 = vsel %vm6886_vm3, %v294_v36, %v298_v18  ;;  %v309_v45 = vsel %vm6886_vm3, %v304_v37, %v308_v21  ;;  %v316_v51 = vrot.slane %v314_v43, 5  ;;  %v324_v54 = vshrl.u32 %v237_v35, 16  ;;  %v6906_v62 = vld [vmem:[%s6842_s12 + $0x20] sm:$0x1]  ;;  %v238_v17 = vld [vmem:[%s6842_s12 + $0x18] sm:$0xf] }
  0x33   : > { %v5187_v48 = vcombine.low %v299_v44, %v309_v45  ;;  %v2101_v49 = vrot.slane %v2100_v39, 4  ;;  %v2111_v52 = vrot.slane %v2110_v46, 4  ;;  %v322_v53 = vrot.slane %v320_v47, 5  ;;  %v239_v23 = vld [vmem:[%s6842_s12 + $0x1c] sm:$0xf] }
  0x34   : > { %v330_v55 = vshll.u32 %v268_v41, 16  ;;  %v2837_v58 = vrot.slane %v6868_v15, 5  ;;  %v2840_v59 = vrot.slane %v6871_v20, 5  ;;  %v317_v60 = vor.u32 %v316_v51, %v313_v50  ;;  %v269_v29 = vld [vmem:[%s6842_s12 + $0x20] sm:$0x1] }
  0x35   : > { %5885 = vmatprep.mubr.msk.bf16.mxu1 %vm720_vm4, %v5187_v48  ;;  %v2106_v57 = vsel %vm6886_vm3, %v2101_v49, %v2105_v34  ;;  %v2116_v63 = vsel %vm6886_vm3, %v2111_v52, %v2115_v40  ;;  %v326_v0 = vrot.slane %v324_v54, 4  ;;  %v1063_v2 = vsel %vm769_vm0, %v266_v12, 0  ;;  %v5371_v35 = vld [vmem:[%s6842_s12 + $0x24] sm:$0xf]  ;;  %v6932_v44 = vld [vmem:[%s6842_s12 + $0x28] sm:$0xf] }
  0x36   : > { %v332_v1 = vrot.slane %v330_v55, 5  ;;  %v5414_v3 = vcombine.low %v2106_v57, %v2116_v63  ;;  %v318_v5 = vrot.slane %v317_v60, 4  ;;  %v2118_v6 = vshrl.u32 %v5368_v56, 16  ;;  %v6938_v47 = vld [vmem:[%s6842_s12 + $0x2c] sm:$0x1] }
  0x37   : > { %v2121_v7 = vshll.u32 %v5368_v56, 16  ;;  %v327_v8 = vor.u32 %v326_v0, %v322_v53  ;;  %v2127_v9 = vshll.u32 %v6903_v61, 16  ;;  %v2131_v10 = vshrl.u32 %v6903_v61, 16 }
  0x38   : > { %v2137_v11 = vshll.u32 %v6906_v62, 16  ;;  %6021 = vmatprep.mubr.msk.bf16.mxu0 %vm720_vm4, %v5414_v3  ;;  %v323_v13 = vsel %vm6886_vm3, %v318_v5, %v322_v53  ;;  %v2120_v14 = vrot.slane %v2118_v6, 4  ;;  %v2844_v16 = vrot.slane %v6903_v61, 5  ;;  %v240_v53 = vld [vmem:[%s6842_s12 + $0x24] sm:$0xf] }
  0x39   : > { %v2123_v12 = vrot.slane %v2121_v7, 5  ;;  %v328_v18 = vrot.slane %v327_v8, 4  ;;  %v2129_v19 = vrot.slane %v2127_v9, 5  ;;  %v2133_v21 = vrot.slane %v2131_v10, 4 }
  0x3a   : > { %v2139_v22 = vrot.slane %v2137_v11, 5  ;;  %v6922_v26 = vrot.slane %v2844_v16, 4  ;;  %v2847_v27 = vrot.slane %v6906_v62, 5  ;;  %v3046_v28 = vsel %vm769_vm0, %v6877_v25, 0 }
  0x3b   : > { %v2124_v24 = vor.u32 %v2123_v12, %v2120_v14  ;;  %v333_v30 = vsel %vm6886_vm3, %v328_v18, %v332_v1  ;;  %v2134_v32 = vor.u32 %v2133_v21, %v2129_v19  ;;  %v335_v33 = vshrl.u32 %v238_v17, 16  ;;  %v5374_v14 = vld [vmem:[%s6842_s12 + $0x30] sm:$0xf] }
  0x3c   : > { %v338_v34 = vshll.u32 %v238_v17, 16  ;;  %v5188_v36 = vcombine.low %v323_v13, %v333_v30  ;;  %v344_v38 = vshll.u32 %v239_v23, 16  ;;  %v348_v39 = vshrl.u32 %v239_v23, 16  ;;  %v270_v13 = vld [vmem:[%s6842_s12 + $0x2c] sm:$0x1] }
  0x3d   : > { %v2125_v37 = vrot.slane %v2124_v24, 4  ;;  %v2135_v40 = vrot.slane %v2134_v32, 4  ;;  %v337_v41 = vrot.slane %v335_v33, 4  ;;  %v354_v43 = vshll.u32 %v269_v29, 16 }
  0x3e   : > { %v340_v42 = vrot.slane %v338_v34, 5  ;;  %5886 = vmatmul.mubr.msk.bf16.vlgmr.msra.gmra.mrb[0].mxu1 %vm720_vm4, %v5188_v36  ;;  %v346_v45 = vrot.slane %v344_v38, 5  ;;  %v350_v46 = vrot.slane %v348_v39, 4  ;;  %v2142_v48 = vshrl.u32 %v5371_v35, 16 }
  0x3f   : > { %v2130_v25 = vsel %vm6886_vm3, %v2125_v37, %v2129_v19  ;;  %5918 = vmatpush3.bf16.msra.mxu1 %v1063_v2  ;;  %v2140_v49 = vsel %vm6886_vm3, %v2135_v40, %v2139_v22  ;;  %v356_v51 = vrot.slane %v354_v43, 5  ;;  %v2145_v52 = vshll.u32 %v5371_v35, 16  ;;  %v241_v2 = vld [vmem:[%s6842_s12 + $0x28] sm:$0xf]  ;;  %v6961_v37 = vld [vmem:[%s6842_s12 + $0x38] sm:$0x1] }
  0x40   : > { %v341_v50 = vor.u32 %v340_v42, %v337_v41  ;;  %v5415_v54 = vcombine.low %v2130_v25, %v2140_v49  ;;  %v351_v55 = vor.u32 %v350_v46, %v346_v45  ;;  %v2144_v56 = vrot.slane %v2142_v48, 4  ;;  %v242_v43 = vld [vmem:[%s6842_s12 + $0x30] sm:$0xf]  ;;  %v243_v49 = vld [vmem:[%s6842_s12 + $0x34] sm:$0xf] }
  0x41   : > { %v2151_v57 = vshll.u32 %v6932_v44, 16  ;;  %v2147_v63 = vrot.slane %v2145_v52, 5  ;;  %v2155_v0 = vshrl.u32 %v6932_v44, 16  ;;  %v2161_v1 = vshll.u32 %v6938_v47, 16 }
  0x42   : > { %v342_v60 = vrot.slane %v341_v50, 4  ;;  %6022 = vmatmul.mubr.msk.bf16.vlgmr.msra.gmra.mrb[0].mxu0 %vm720_vm4, %v5415_v54  ;;  %v352_v3 = vrot.slane %v351_v55, 4  ;;  %v359_v6 = vshrl.u32 %v240_v53, 16  ;;  %v362_v7 = vshll.u32 %v240_v53, 16 }
  0x43   : > { %v2153_v5 = vrot.slane %v2151_v57, 5  ;;  %6054 = vmatpush3.bf16.msra.mxu0 %v3046_v28  ;;  %v2148_v9 = vor.u32 %v2147_v63, %v2144_v56  ;;  %v2157_v10 = vrot.slane %v2155_v0, 4  ;;  %v2163_v11 = vrot.slane %v2161_v1, 5  ;;  %v6955_v28 = vld [vmem:[%s6842_s12 + $0x34] sm:$0xf] }
  0x44   : > { %v347_v8 = vsel %vm6886_vm3, %v342_v60, %v346_v45  ;;  %v357_v12 = vsel %vm6886_vm3, %v352_v3, %v356_v51  ;;  %v361_v17 = vrot.slane %v359_v6, 4  ;;  %v364_v18 = vrot.slane %v362_v7, 5  ;;  %v271_v57 = vld [vmem:[%s6842_s12 + $0x38] sm:$0x1]  ;;  %v5377_v3 = vld [vmem:[%s6842_s12 + $0x3c] sm:$0xf] }
  0x45   : > { %v368_v19 = vshll.u32 %v241_v2, 16  ;;  %v5189_v21 = vcombine.low %v347_v8, %v357_v12  ;;  %v2149_v22 = vrot.slane %v2148_v9, 4  ;;  %v2158_v23 = vor.u32 %v2157_v10, %v2153_v5  ;;  %v6978_v9 = vld [vmem:[%s6842_s12 + $0x40] sm:$0xf] }
  0x46   : > { %v372_v24 = vshrl.u32 %v241_v2, 16  ;;  %v365_v29 = vor.u32 %v364_v18, %v361_v17  ;;  %v378_v32 = vshll.u32 %v270_v13, 16  ;;  %v2166_v33 = vshrl.u32 %v5374_v14, 16 }
  0x47   : > { %v370_v30 = vrot.slane %v368_v19, 5  ;;  %5889 = vmatprep.mubr.msk.bf16.mxu1 %vm720_vm4, %v5189_v21  ;;  %v2154_v34 = vsel %vm6886_vm3, %v2149_v22, %v2153_v5  ;;  %v2159_v35 = vrot.slane %v2158_v23, 4  ;;  %v2169_v38 = vshll.u32 %v5374_v14, 16  ;;  %v6983_v19 = vld [vmem:[%s6842_s12 + $0x44] sm:$0x1] }
  0x48   : > { %v374_v36 = vrot.slane %v372_v24, 4  ;;  %v366_v39 = vrot.slane %v365_v29, 4  ;;  %v380_v40 = vrot.slane %v378_v32, 5  ;;  %v2168_v41 = vrot.slane %v2166_v33, 4  ;;  %v6991_v32 = vld [vmem:[%s8906_s1 + $0xc] sm:$0x3] }
  0x49   : > { %v2175_v42 = vshll.u32 %v6955_v28, 16  ;;  %v2164_v25 = vsel %vm6886_vm3, %v2159_v35, %v2163_v11  ;;  %v2171_v46 = vrot.slane %v2169_v38, 5  ;;  %v2179_v48 = vshrl.u32 %v6955_v28, 16  ;;  %6454 = vmatprep.subr.msk.bf16.mxu0 %vm769_vm0, %v6991_v32 }
  0x4a   : > { %v375_v45 = vor.u32 %v374_v36, %v370_v30  ;;  %v5416_v50 = vcombine.low %v2154_v34, %v2164_v25  ;;  %v371_v51 = vsel %vm6886_vm3, %v366_v39, %v370_v30  ;;  %v2185_v53 = vshll.u32 %v6961_v37, 16  ;;  %v244_v30 = vld [vmem:[%s6842_s12 + $0x3c] sm:$0xf] }
  0x4b   : > { %v2177_v52 = vrot.slane %v2175_v42, 5  ;;  %v2172_v55 = vor.u32 %v2171_v46, %v2168_v41  ;;  %v2181_v56 = vrot.slane %v2179_v48, 4  ;;  %v383_v60 = vshrl.u32 %v242_v43, 16 }
  0x4c   : > { %v376_v54 = vrot.slane %v375_v45, 4  ;;  %6025 = vmatprep.mubr.msk.bf16.mxu0 %vm720_vm4, %v5416_v50  ;;  %v2187_v63 = vrot.slane %v2185_v53, 5  ;;  %v386_v0 = vshll.u32 %v242_v43, 16  ;;  %v392_v1 = vshll.u32 %v243_v49, 16  ;;  %v245_v45 = vld [vmem:[%s6842_s12 + $0x40] sm:$0xf] }
  0x4d   : > { %v396_v2 = vshrl.u32 %v243_v49, 16  ;;  %v2173_v6 = vrot.slane %v2172_v55, 4  ;;  %v2182_v7 = vor.u32 %v2181_v56, %v2177_v52  ;;  %v385_v8 = vrot.slane %v383_v60, 4  ;;  %v5380_v53 = vld [vmem:[%s6842_s12 + $0x48] sm:$0xf] }
  0x4e   : > { %v381_v5 = vsel %vm6886_vm3, %v376_v54, %v380_v40  ;;  %v388_v11 = vrot.slane %v386_v0, 5  ;;  %v394_v13 = vrot.slane %v392_v1, 5  ;;  %v402_v18 = vshll.u32 %v271_v57, 16 }
  0x4f   : > { %v5190_v10 = vcombine.low %v371_v51, %v381_v5  ;;  %v398_v14 = vrot.slane %v396_v2, 4  ;;  %v2178_v12 = vsel %vm6886_vm3, %v2173_v6, %v2177_v52  ;;  %v2183_v17 = vrot.slane %v2182_v7, 4  ;;  %v272_v51 = vld [vmem:[%s6842_s12 + $0x44] sm:$0x1]  ;;  %v7009_v5 = vld [vmem:[%s6842_s12 + $0x4c] sm:$0xf] }
  0x50   : > { %v2190_v21 = vshrl.u32 %v5377_v3, 16  ;;  %v389_v22 = vor.u32 %v388_v11, %v385_v8  ;;  %v2193_v24 = vshll.u32 %v5377_v3, 16  ;;  %v2199_v29 = vshll.u32 %v6978_v9, 16 }
  0x51   : > { %5890 = vmatmul.mubr.msk.bf16.gmra.mrb[4].mxu1 %vm720_vm4, %v5190_v10  ;;  %v399_v23 = vor.u32 %v398_v14, %v394_v13  ;;  %v2188_v33 = vsel %vm6886_vm3, %v2183_v17, %v2187_v63  ;;  %v404_v34 = vrot.slane %v402_v18, 5  ;;  %v2203_v36 = vshrl.u32 %v6978_v9, 16  ;;  %v7014_v14 = vld [vmem:[%s6842_s12 + $0x50] sm:$0x1] }
  0x52   : > { %v2192_v35 = vrot.slane %v2190_v21, 4  ;;  %v5417_v38 = vcombine.low %v2178_v12, %v2188_v33  ;;  %v390_v39 = vrot.slane %v389_v22, 4  ;;  %v2195_v41 = vrot.slane %v2193_v24, 5  ;;  %v7017_v12 = vld [vmem:[%s6842_s12 + $0x48] sm:$0xf] }
  0x53   : > { %v400_v40 = vrot.slane %v399_v23, 4  ;;  %v2201_v42 = vrot.slane %v2199_v29, 5  ;;  %v2205_v43 = vrot.slane %v2203_v36, 4  ;;  %v2209_v25 = vshll.u32 %v6983_v19, 16  ;;  %v7025_v36 = vld [vmem:[%s6842_s12 + $0x4c] sm:$0xf] }
  0x54   : > { %v407_v46 = vshrl.u32 %v244_v30, 16  ;;  %6026 = vmatmul.mubr.msk.bf16.gmra.mrb[4].mxu0 %vm720_vm4, %v5417_v38  ;;  %v395_v48 = vsel %vm6886_vm3, %v390_v39, %v394_v13  ;;  %v2196_v50 = vor.u32 %v2195_v41, %v2192_v35  ;;  %v410_v52 = vshll.u32 %v244_v30, 16 }
  0x55   : > { %v405_v49 = vsel %vm6886_vm3, %v400_v40, %v404_v34  ;;  %v2206_v55 = vor.u32 %v2205_v43, %v2201_v42  ;;  %v2211_v56 = vrot.slane %v2209_v25, 5  ;;  %v416_v0 = vshll.u32 %v245_v45, 16 }
  0x56   : > { %v5191_v54 = vcombine.low %v395_v48, %v405_v49  ;;  %v409_v57 = vrot.slane %v407_v46, 4  ;;  %v2197_v60 = vrot.slane %v2196_v50, 4  ;;  %v412_v63 = vrot.slane %v410_v52, 5  ;;  %v5383_v49 = vld [vmem:[%s6842_s12 + $0x54] sm:$0xf] }
  0x57   : > { %v420_v1 = vshrl.u32 %v245_v45, 16  ;;  %v2207_v2 = vrot.slane %v2206_v55, 4  ;;  %v426_v3 = vshll.u32 %v272_v51, 16  ;;  %v2214_v6 = vshrl.u32 %v5380_v53, 16 }
  0x58   : > { %5893 = vmatprep.mubr.msk.bf16.mxu1 %vm720_vm4, %v5191_v54  ;;  %v2217_v7 = vshll.u32 %v5380_v53, 16  ;;  %v2202_v8 = vsel %vm6886_vm3, %v2197_v60, %v2201_v42  ;;  %v413_v10 = vor.u32 %v412_v63, %v409_v57  ;;  %v418_v11 = vrot.slane %v416_v0, 5  ;;  %v273_v42 = vld [vmem:[%s6842_s12 + $0x50] sm:$0x1]  ;;  %v7039_v54 = vld [vmem:[%s6842_s12 + $0x58] sm:$0xf] }
  0x59   : > { %v422_v13 = vrot.slane %v420_v1, 4  ;;  %v2212_v17 = vsel %vm6886_vm3, %v2207_v2, %v2211_v56  ;;  %v428_v18 = vrot.slane %v426_v3, 5  ;;  %v2216_v21 = vrot.slane %v2214_v6, 4  ;;  %v7044_v2 = vld [vmem:[%s6842_s12 + $0x5c] sm:$0x1] }
  0x5a   : > { %v2219_v22 = vrot.slane %v2217_v7, 5  ;;  %v5418_v23 = vcombine.low %v2202_v8, %v2212_v17  ;;  %v414_v24 = vrot.slane %v413_v10, 4  ;;  %v2223_v30 = vshll.u32 %v7009_v5, 16 }
  0x5b   : > { %v423_v29 = vor.u32 %v422_v13, %v418_v11  ;;  %v2227_v34 = vshrl.u32 %v7009_v5, 16  ;;  %v2233_v35 = vshll.u32 %v7014_v14, 16  ;;  %v431_v38 = vshrl.u32 %v7017_v12, 16 }
  0x5c   : > { %v2220_v33 = vor.u32 %v2219_v22, %v2216_v21  ;;  %6029 = vmatprep.mubr.msk.bf16.mxu0 %vm720_vm4, %v5418_v23  ;;  %v419_v39 = vsel %vm6886_vm3, %v414_v24, %v418_v11  ;;  %v2225_v41 = vrot.slane %v2223_v30, 5  ;;  %v434_v43 = vshll.u32 %v7017_v12, 16  ;;  %v7050_v21 = vld [vmem:[%s6842_s12 + $0x54] sm:$0xf]  ;;  %v7056_v30 = vld [vmem:[%s6842_s12 + $0x58] sm:$0xf] }
  0x5d   : > { %v424_v40 = vrot.slane %v423_v29, 4  ;;  %v2229_v45 = vrot.slane %v2227_v34, 4  ;;  %v2235_v46 = vrot.slane %v2233_v35, 5  ;;  %v433_v48 = vrot.slane %v431_v38, 4 }
  0x5e   : > { %v2221_v25 = vrot.slane %v2220_v33, 4  ;;  %v436_v51 = vrot.slane %v434_v43, 5  ;;  %v440_v52 = vshll.u32 %v7025_v36, 16  ;;  %v444_v53 = vshrl.u32 %v7025_v36, 16 }
  0x5f   : > { %v429_v50 = vsel %vm6886_vm3, %v424_v40, %v428_v18  ;;  %v2230_v57 = vor.u32 %v2229_v45, %v2225_v41  ;;  %v450_v60 = vshll.u32 %v273_v42, 16  ;;  %v2238_v3 = vshrl.u32 %v5383_v49, 16 }
  0x60   : > { %v5192_v55 = vcombine.low %v419_v39, %v429_v50  ;;  %v2226_v56 = vsel %vm6886_vm3, %v2221_v25, %v2225_v41  ;;  %v437_v63 = vor.u32 %v436_v51, %v433_v48  ;;  %v442_v0 = vrot.slane %v440_v52, 5  ;;  %v274_v41 = vld [vmem:[%s6842_s12 + $0x5c] sm:$0x1]  ;;  %v7072_v50 = vld [vmem:[%s8906_s1 + $0x4] sm:$0x3] }
  0x61   : > { %v446_v1 = vrot.slane %v444_v53, 4  ;;  %v2231_v6 = vrot.slane %v2230_v57, 4  ;;  %v452_v7 = vrot.slane %v450_v60, 5  ;;  %v2241_v8 = vshll.u32 %v5383_v49, 16  ;;  %v5386_v49 = vld [vmem:[%s6842_s12 + $0x60] sm:$0xf]  ;;  %6449 = vmatprep.subr.msk.bf16.mxu1 %vm769_vm0, %v7072_v50 }
  0x62   : > { %5894 = vmatmul.mubr.msk.bf16.gmra.mrb[8].mxu1 %vm720_vm4, %v5192_v55  ;;  %v2247_v10 = vshll.u32 %v7039_v54, 16  ;;  %v438_v11 = vrot.slane %v437_v63, 4  ;;  %v2240_v17 = vrot.slane %v2238_v3, 4  ;;  %v2251_v18 = vshrl.u32 %v7039_v54, 16 }
  0x63   : > { %v447_v13 = vor.u32 %v446_v1, %v442_v0  ;;  %v2236_v22 = vsel %vm6886_vm3, %v2231_v6, %v2235_v46  ;;  %v2243_v23 = vrot.slane %v2241_v8, 5  ;;  %v2257_v29 = vshll.u32 %v7044_v2, 16  ;;  %v7083_v6 = vld [vmem:[%s6842_s12 + $0x68] sm:$0x1] }
  0x64   : > { %v2249_v24 = vrot.slane %v2247_v10, 5  ;;  %v5419_v33 = vcombine.low %v2226_v56, %v2236_v22  ;;  %v443_v34 = vsel %vm6886_vm3, %v438_v11, %v442_v0  ;;  %v2253_v38 = vrot.slane %v2251_v18, 4  ;;  %v7075_v56 = vld [vmem:[%s6842_s12 + $0x64] sm:$0xf]  ;;  %v7089_v18 = vld [vmem:[%s6842_s12 + $0x60] sm:$0xf] }
  0x65   : > { %v448_v35 = vrot.slane %v447_v13, 4  ;;  %v2244_v39 = vor.u32 %v2243_v23, %v2240_v17  ;;  %v2259_v40 = vrot.slane %v2257_v29, 5  ;;  %v455_v42 = vshrl.u32 %v7050_v21, 16 }
  0x66   : > { %v458_v43 = vshll.u32 %v7050_v21, 16  ;;  %6030 = vmatmul.mubr.msk.bf16.gmra.mrb[8].mxu0 %vm720_vm4, %v5419_v33  ;;  %v2254_v45 = vor.u32 %v2253_v38, %v2249_v24  ;;  %v464_v46 = vshll.u32 %v7056_v30, 16  ;;  %v468_v48 = vshrl.u32 %v7056_v30, 16 }
  0x67   : > { %v453_v25 = vsel %vm6886_vm3, %v448_v35, %v452_v7  ;;  %v2245_v52 = vrot.slane %v2244_v39, 4  ;;  %v457_v53 = vrot.slane %v455_v42, 4  ;;  %v474_v0 = vshll.u32 %v274_v41, 16  ;;  %v275_v42 = vld [vmem:[%s6842_s12 + $0x68] sm:$0x1] }
  0x68   : > { %v5193_v51 = vcombine.low %v443_v34, %v453_v25  ;;  %v460_v55 = vrot.slane %v458_v43, 5  ;;  %v2255_v57 = vrot.slane %v2254_v45, 4  ;;  %v466_v60 = vrot.slane %v464_v46, 5 }
  0x69   : > { %v470_v63 = vrot.slane %v468_v48, 4  ;;  %v2250_v1 = vsel %vm6886_vm3, %v2245_v52, %v2249_v24  ;;  %v2262_v7 = vshrl.u32 %v5386_v49, 16  ;;  %v2265_v8 = vshll.u32 %v5386_v49, 16  ;;  %v7092_v24 = vld [vmem:[%s6842_s12 + $0x64] sm:$0xf] }
  0x6a   : > { %5897 = vmatprep.mubr.msk.bf16.mxu1 %vm720_vm4, %v5193_v51  ;;  %v461_v3 = vor.u32 %v460_v55, %v457_v53  ;;  %v2260_v10 = vsel %vm6886_vm3, %v2255_v57, %v2259_v40  ;;  %v476_v13 = vrot.slane %v474_v0, 5  ;;  %v2271_v17 = vshll.u32 %v7075_v56, 16  ;;  %v5446_v57 = vld [vmem:[%s6842_s12 + $0xc] sm:$0xe] }
  0x6b   : > { %v471_v11 = vor.u32 %v470_v63, %v466_v60  ;;  %v5420_v22 = vcombine.low %v2250_v1, %v2260_v10  ;;  %v2264_v29 = vrot.slane %v2262_v7, 4  ;;  %v2267_v33 = vrot.slane %v2265_v8, 5  ;;  %v7114_v10 = vld [vmem:[%s6842_s12 + $0x70] sm:$0xf] }
  0x6c   : > { %v462_v23 = vrot.slane %v461_v3, 4  ;;  %v2273_v35 = vrot.slane %v2271_v17, 5  ;;  %v2275_v38 = vshrl.u32 %v7075_v56, 16  ;;  %v2281_v39 = vshll.u32 %v7083_v6, 16  ;;  %v7108_v3 = vld [vmem:[%s6842_s12 + $0x6c] sm:$0xf] }
  0x6d   : > { %v472_v34 = vrot.slane %v471_v11, 4  ;;  %6033 = vmatprep.mubr.msk.bf16.mxu0 %vm720_vm4, %v5420_v22  ;;  %v2268_v41 = vor.u32 %v2267_v33, %v2264_v29  ;;  %v479_v43 = vshrl.u32 %v7089_v18, 16  ;;  %v482_v25 = vshll.u32 %v7089_v18, 16 }
  0x6e   : > { %v467_v40 = vsel %vm6886_vm3, %v462_v23, %v466_v60  ;;  %v2277_v46 = vrot.slane %v2275_v38, 4  ;;  %v2283_v48 = vrot.slane %v2281_v39, 5  ;;  %v488_v49 = vshll.u32 %v7092_v24, 16 }
  0x6f   : > { %v477_v45 = vsel %vm6886_vm3, %v472_v34, %v476_v13  ;;  %v2269_v52 = vrot.slane %v2268_v41, 4  ;;  %v481_v53 = vrot.slane %v479_v43, 4  ;;  %v484_v55 = vrot.slane %v482_v25, 5  ;;  %v276_v41 = vld [vmem:[%s6842_s12 + $0x74] sm:$0x1] }
  0x70   : > { %v5194_v51 = vcombine.low %v467_v40, %v477_v45  ;;  %v2278_v60 = vor.u32 %v2277_v46, %v2273_v35  ;;  %v490_v63 = vrot.slane %v488_v49, 5  ;;  %v492_v0 = vshrl.u32 %v7092_v24, 16  ;;  %v5447_v43 = vld [vmem:[%s6842_s12 + $0x18] sm:$0xe] }
  0x71   : > { %v498_v1 = vshll.u32 %v275_v42, 16  ;;  %v2274_v7 = vsel %vm6886_vm3, %v2269_v52, %v2273_v35  ;;  %v485_v8 = vor.u32 %v484_v55, %v481_v53  ;;  %vm1274_vm5 = vcmask 1042432   ;;  %v7140_v49 = vld [vmem:[%s6842_s12 + $0x78] sm:$0xf]  ;;  %v7143_v53 = vld [vmem:[%s6842_s12 + $0x7c] sm:$0xf] }
  0x72   : > { %5898 = vmatmul.mubr.msk.bf16.gmra.mrb[12].mxu1 %vm720_vm4, %v5194_v51  ;;  %vm1275_vm6 = vcmask 1046532   ;;  %v2279_v11 = vrot.slane %v2278_v60, 4  ;;  %v494_v13 = vrot.slane %v492_v0, 4  ;;  %v5462_v23 = vrot.slane %v5446_v57, 9 }
  0x73   : > { %v500_v17 = vrot.slane %v498_v1, 5  ;;  %vm7116_vm7 = vmor %vm1274_vm5, %vm1275_vm6  ;;  %v486_v29 = vrot.slane %v485_v8, 4  ;;  %v2839_v33 = vrot.slane %v2837_v58, 4  ;;  %v503_v34 = vshrl.u32 %v7108_v3, 16 }
  0x74   : > { %v506_v35 = vshll.u32 %v7108_v3, 16  ;;  %v2284_v38 = vsel %vm6886_vm3, %v2279_v11, %v2283_v48  ;;  %v495_v39 = vor.u32 %v494_v13, %v490_v63  ;;  %v2838_v40 = vsel %vm7116_vm7, %v5462_v23, %v2837_v58 }
  0x75   : > { %v512_v42 = vshll.u32 %v7114_v10, 16  ;;  %v5421_v25 = vcombine.low %v2274_v7, %v2284_v38  ;;  %v491_v45 = vsel %vm6886_vm3, %v486_v29, %v490_v63  ;;  %v2841_v46 = vsel %vm7116_vm7, %v2839_v33, %v2840_v59  ;;  %v277_v59 = vld [vmem:[%s6842_s12 + $0x80] sm:$0x1]  ;;  %v7166_v33 = vld [vmem:[%s6842_s12 + $0x84] sm:$0xf] }
  0x76   : > { %v505_v48 = vrot.slane %v503_v34, 4  ;;  %v496_v15 = vrot.slane %v495_v39, 4  ;;  %v5479_v51 = vcombine.low %v2838_v40, %v2841_v46  ;;  %v508_v58 = vrot.slane %v506_v35, 5  ;;  %v7172_v38 = vld [vmem:[%s6842_s12 + $0x88] sm:$0xf] }
  0x77   : > { %v514_v52 = vrot.slane %v512_v42, 5  ;;  %6034 = vmatmul.mubr.msk.bf16.gmra.mrb[12].mxu0 %vm720_vm4, %v5421_v25  ;;  %v516_v55 = vshrl.u32 %v7114_v10, 16  ;;  %v522_v57 = vshll.u32 %v276_v41, 16  ;;  %v5463_v60 = vrot.slane %v5447_v43, 9  ;;  %v7180_v42 = vld [vmem:[%s8906_s1 + $0xe] sm:$0x3] }
  0x78   : > { %v2848_v20 = vsel %vm7116_vm7, %v6922_v26, %v2847_v27  ;;  %v501_v63 = vsel %vm6886_vm3, %v496_v15, %v500_v17  ;;  %6055 = vmatprep.mubr.msk.bf16.mxu0 %vm720_vm4, %v5479_v51  ;;  %v509_v0 = vor.u32 %v508_v58, %v505_v48  ;;  %v3408_v1 = vsel %vm769_vm0, %v6991_v32, 0  ;;  %v5448_v27 = vld [vmem:[%s6842_s12 + $0x24] sm:$0xe]  ;;  %v278_v48 = vld [vmem:[%s6842_s12 + $0x8c] sm:$0x1] }
  0x79   : > { %v527_v7 = vshrl.u32 %v7140_v49, 16  ;;  %v5195_v8 = vcombine.low %v491_v45, %v501_v63  ;;  %v518_v62 = vrot.slane %v516_v55, 4  ;;  %v524_v11 = vrot.slane %v522_v57, 5  ;;  %v5449_v55 = vld [vmem:[%s6842_s12 + $0x30] sm:$0xe] }
  0x7a   : > { %v2845_v26 = vsel %vm7116_vm7, %v5463_v60, %v2844_v16  ;;  %v510_v13 = vrot.slane %v509_v0, 4  ;;  %v530_v29 = vshll.u32 %v7140_v49, 16  ;;  %v536_v34 = vshll.u32 %v7143_v53, 16 }
  0x7b   : > { %v5480_v17 = vcombine.low %v2845_v26, %v2848_v20  ;;  %v529_v23 = vrot.slane %v527_v7, 4  ;;  %5901 = vmatprep.mubr.msk.bf16.mxu1 %vm720_vm4, %v5195_v8  ;;  %v519_v32 = vor.u32 %v518_v62, %v514_v52  ;;  %v540_v35 = vshrl.u32 %v7143_v53, 16  ;;  %v7196_v7 = vld [vmem:[%s6842_s12 + $0x90] sm:$0xf] }
  0x7c   : > { %v546_v61 = vshll.u32 %v277_v59, 16  ;;  %v515_v16 = vsel %vm6886_vm3, %v510_v13, %v514_v52  ;;  %v532_v39 = vrot.slane %v530_v29, 5  ;;  %v5464_v40 = vrot.slane %v5448_v27, 9  ;;  %v7199_v27 = vld [vmem:[%s6842_s12 + $0x94] sm:$0xf] }
  0x7d   : > { %v2851_v41 = vrot.slane %v6932_v44, 5  ;;  %v520_v43 = vrot.slane %v519_v32, 4  ;;  %v538_v25 = vrot.slane %v536_v34, 5  ;;  %v542_v45 = vrot.slane %v540_v35, 4 }
  0x7e   : > { %v548_v46 = vrot.slane %v546_v61, 5  ;;  %v533_v15 = vor.u32 %v532_v39, %v529_v23  ;;  %v2854_v52 = vrot.slane %v6938_v47, 5  ;;  %v551_v60 = vshrl.u32 %v7166_v33, 16  ;;  %v279_v61 = vld [vmem:[%s6842_s12 + $0x98] sm:$0x1] }
  0x7f   : > { %v2852_v51 = vsel %vm7116_vm7, %v5464_v40, %v2851_v41  ;;  %v2853_v58 = vrot.slane %v2851_v41, 4  ;;  %v525_v44 = vsel %vm6886_vm3, %v520_v43, %v524_v11  ;;  %6056 = vmatmul.mubr.msk.bf16.vlgmr.msra.gmra.mrb[0].mxu0 %vm720_vm4, %v5480_v17  ;;  %v543_v57 = vor.u32 %v542_v45, %v538_v25  ;;  %v5450_v43 = vld [vmem:[%s6842_s12 + $0x3c] sm:$0xe] }
  0x80   : > { %v554_v20 = vshll.u32 %v7166_v33, 16  ;;  %v5196_v59 = vcombine.low %v515_v16, %v525_v44  ;;  %6088 = vmatpush3.bf16.msra.mxu0 %v3408_v1  ;;  %v534_v63 = vrot.slane %v533_v15, 4  ;;  %v560_v47 = vshll.u32 %v7172_v38, 16  ;;  %v7218_v15 = vld [vmem:[%s6842_s12 + $0x9c] sm:$0xf] }
  0x81   : > { %v2855_v0 = vsel %vm7116_vm7, %v2853_v58, %v2854_v52  ;;  %v544_v8 = vrot.slane %v543_v57, 4  ;;  %v553_v11 = vrot.slane %v551_v60, 4  ;;  %6455 = vmatprep.subr.msk.bf16.mxu0 %vm769_vm0, %v7180_v42  ;;  %v564_v17 = vshrl.u32 %v7172_v38, 16  ;;  %v7229_v60 = vld [vmem:[%s6842_s12 + $0xa0] sm:$0xf] }
  0x82   : > { %v5481_v62 = vcombine.low %v2852_v51, %v2855_v0  ;;  %v556_v26 = vrot.slane %v554_v20, 5  ;;  %5902 = vmatmul.mubr.msk.bf16.gmra.mrb[16].mxu1 %vm720_vm4, %v5196_v59  ;;  %v539_v1 = vsel %vm6886_vm3, %v534_v63, %v538_v25  ;;  %v562_v13 = vrot.slane %v560_v47, 5 }
  0x83   : > { %v570_v23 = vshll.u32 %v278_v48, 16  ;;  %v549_v29 = vsel %vm6886_vm3, %v544_v8, %v548_v46  ;;  %v5465_v34 = vrot.slane %v5449_v55, 9  ;;  %v2858_v35 = vrot.slane %v6955_v28, 5 }
  0x84   : > { %6059 = vmatprep.mubr.msk.bf16.mxu0 %vm720_vm4, %v5481_v62  ;;  %v557_v32 = vor.u32 %v556_v26, %v553_v11  ;;  %v5197_v16 = vcombine.low %v539_v1, %v549_v29  ;;  %v566_v39 = vrot.slane %v564_v17, 4  ;;  %v2861_v41 = vrot.slane %v6961_v37, 5  ;;  %v280_v26 = vld [vmem:[%s6842_s12 + $0xa4] sm:$0x1] }
  0x85   : > { %v572_v40 = vrot.slane %v570_v23, 5  ;;  %v2859_v45 = vsel %vm7116_vm7, %v5465_v34, %v2858_v35  ;;  %v2860_v48 = vrot.slane %v2858_v35, 4  ;;  %v575_v46 = vshrl.u32 %v7196_v7, 16 }
  0x86   : > { %v558_v25 = vrot.slane %v557_v32, 4  ;;  %5905 = vmatprep.mubr.msk.bf16.mxu1 %vm720_vm4, %v5197_v16  ;;  %v567_v28 = vor.u32 %v566_v39, %v562_v13  ;;  %v578_v51 = vshll.u32 %v7196_v7, 16  ;;  %v584_v58 = vshll.u32 %v7199_v27, 16 }
  0x87   : > { %v588_v37 = vshrl.u32 %v7199_v27, 16  ;;  %v2862_v55 = vsel %vm7116_vm7, %v2860_v48, %v2861_v41  ;;  %v577_v44 = vrot.slane %v575_v46, 4  ;;  %v594_v57 = vshll.u32 %v279_v61, 16  ;;  %v7244_v41 = vld [vmem:[%s6842_s12 + $0xa8] sm:$0xf] }
  0x88   : > { %v563_v52 = vsel %vm6886_vm3, %v558_v25, %v562_v13  ;;  %v568_v20 = vrot.slane %v567_v28, 4  ;;  %v5482_v59 = vcombine.low %v2859_v45, %v2862_v55  ;;  %v580_v63 = vrot.slane %v578_v51, 5  ;;  %v7251_v48 = vld [vmem:[%s6842_s12 + $0xac] sm:$0xf] }
  0x89   : > { %v586_v0 = vrot.slane %v584_v58, 5  ;;  %v590_v47 = vrot.slane %v588_v37, 4  ;;  %v596_v8 = vrot.slane %v594_v57, 5  ;;  %v5466_v62 = vrot.slane %v5450_v43, 9  ;;  %v281_v57 = vld [vmem:[%s6842_s12 + $0xb0] sm:$0x1] }
  0x8a   : > { %v2865_v11 = vrot.slane %v6978_v9, 5  ;;  %v573_v1 = vsel %vm6886_vm3, %v568_v20, %v572_v40  ;;  %6060 = vmatmul.mubr.msk.bf16.gmra.mrb[4].mxu0 %vm720_vm4, %v5482_v59  ;;  %v581_v13 = vor.u32 %v580_v63, %v577_v44  ;;  %v2868_v17 = vrot.slane %v6983_v19, 5  ;;  %v5451_v9 = vld [vmem:[%s6842_s12 + $0x48] sm:$0xe] }
  0x8b   : > { %v599_v23 = vshrl.u32 %v7218_v15, 16  ;;  %v5198_v29 = vcombine.low %v563_v52, %v573_v1  ;;  %v591_v32 = vor.u32 %v590_v47, %v586_v0  ;;  %v602_v39 = vshll.u32 %v7218_v15, 16 }
  0x8c   : > { %v2866_v34 = vsel %vm7116_vm7, %v5466_v62, %v2865_v11  ;;  %v2867_v35 = vrot.slane %v2865_v11, 4  ;;  %v582_v61 = vrot.slane %v581_v13, 4  ;;  %v608_v40 = vshll.u32 %v7229_v60, 16 }
  0x8d   : > { %v601_v16 = vrot.slane %v599_v23, 4  ;;  %5906 = vmatmul.mubr.msk.bf16.gmra.mrb[20].mxu1 %vm720_vm4, %v5198_v29  ;;  %v592_v19 = vrot.slane %v591_v32, 4  ;;  %v612_v25 = vshrl.u32 %v7229_v60, 16  ;;  %v618_v45 = vshll.u32 %v280_v26, 16  ;;  %v5452_v26 = vld [vmem:[%s6842_s12 + $0x54] sm:$0xe] }
  0x8e   : > { %v2869_v43 = vsel %vm7116_vm7, %v2867_v35, %v2868_v17  ;;  %v587_v46 = vsel %vm6886_vm3, %v582_v61, %v586_v0  ;;  %v604_v51 = vrot.slane %v602_v39, 5  ;;  %v610_v58 = vrot.slane %v608_v40, 5 }
  0x8f   : > { %v5483_v28 = vcombine.low %v2866_v34, %v2869_v43  ;;  %v597_v37 = vsel %vm6886_vm3, %v592_v19, %v596_v8  ;;  %v614_v52 = vrot.slane %v612_v25, 4  ;;  %v620_v55 = vrot.slane %v618_v45, 5  ;;  %v7279_v25 = vld [vmem:[%s6842_s12 + $0xb8] sm:$0xf] }
  0x90   : > { %v5467_v44 = vrot.slane %v5451_v9, 9  ;;  %v5199_v20 = vcombine.low %v587_v46, %v597_v37  ;;  %v605_v59 = vor.u32 %v604_v51, %v601_v16  ;;  %v2872_v63 = vrot.slane %v7009_v5, 5  ;;  %v7274_v16 = vld [vmem:[%s6842_s12 + $0xb4] sm:$0xf] }
  0x91   : > { %6063 = vmatprep.mubr.msk.bf16.mxu0 %vm720_vm4, %v5483_v28  ;;  %v2875_v47 = vrot.slane %v7014_v14, 5  ;;  %v615_v0 = vor.u32 %v614_v52, %v610_v58  ;;  %v623_v62 = vshrl.u32 %v7244_v41, 16  ;;  %v626_v11 = vshll.u32 %v7244_v41, 16  ;;  %v7285_v52 = vld [vmem:[%s6842_s12 + $0xbc] sm:$0x1] }
  0x92   : > { %v632_v8 = vshll.u32 %v7251_v48, 16  ;;  %5909 = vmatprep.mubr.msk.bf16.mxu1 %vm720_vm4, %v5199_v20  ;;  %v606_v1 = vrot.slane %v605_v59, 4  ;;  %v2873_v13 = vsel %vm7116_vm7, %v5467_v44, %v2872_v63  ;;  %v2874_v17 = vrot.slane %v2872_v63, 4 }
  0x93   : > { %v636_v5 = vshrl.u32 %v7251_v48, 16  ;;  %v616_v14 = vrot.slane %v615_v0, 4  ;;  %v625_v23 = vrot.slane %v623_v62, 4  ;;  %v628_v29 = vrot.slane %v626_v11, 5  ;;  %v5453_v62 = vld [vmem:[%s6842_s12 + $0x60] sm:$0xe] }
  0x94   : > { %v634_v32 = vrot.slane %v632_v8, 5  ;;  %v611_v34 = vsel %vm6886_vm3, %v606_v1, %v610_v58  ;;  %v2876_v35 = vsel %vm7116_vm7, %v2874_v17, %v2875_v47  ;;  %v642_v61 = vshll.u32 %v281_v57, 16  ;;  %v5454_v17 = vld [vmem:[%s6842_s12 + $0x6c] sm:$0xe] }
  0x95   : > { %v638_v9 = vrot.slane %v636_v5, 4  ;;  %v621_v39 = vsel %vm6886_vm3, %v616_v14, %v620_v55  ;;  %v5484_v40 = vcombine.low %v2873_v13, %v2876_v35  ;;  %v629_v19 = vor.u32 %v628_v29, %v625_v23  ;;  %v5390_v13 = vld [vmem:[%s6842_s12 + $0x70] sm:$0xf] }
  0x96   : > { %v5468_v43 = vrot.slane %v5452_v26, 9  ;;  %v5200_v45 = vcombine.low %v611_v34, %v621_v39  ;;  %v644_v28 = vrot.slane %v642_v61, 5  ;;  %v2879_v51 = vrot.slane %v7039_v54, 5 }
  0x97   : > { %v639_v46 = vor.u32 %v638_v9, %v634_v32  ;;  %6064 = vmatmul.mubr.msk.bf16.gmra.mrb[8].mxu0 %vm720_vm4, %v5484_v40  ;;  %v630_v58 = vrot.slane %v629_v19, 4  ;;  %v2882_v37 = vrot.slane %v7044_v2, 5  ;;  %v647_v55 = vshrl.u32 %v7274_v16, 16 }
  0x98   : > { %v650_v44 = vshll.u32 %v7274_v16, 16  ;;  %5910 = vmatmul.mubr.msk.bf16.gmra.mrb[24].mxu1 %vm720_vm4, %v5200_v45  ;;  %v2880_v54 = vsel %vm7116_vm7, %v5468_v43, %v2879_v51  ;;  %v2881_v20 = vrot.slane %v2879_v51, 4  ;;  %v656_v59 = vshll.u32 %v7279_v25, 16 }
  0x99   : > { %v640_v57 = vrot.slane %v639_v46, 4  ;;  %v635_v2 = vsel %vm6886_vm3, %v630_v58, %v634_v32  ;;  %v649_v63 = vrot.slane %v647_v55, 4  ;;  %v660_v0 = vshrl.u32 %v7279_v25, 16  ;;  %v5391_v32 = vld [vmem:[%s6842_s12 + $0x74] sm:$0x1] }
  0x9a   : > { %v652_v47 = vrot.slane %v650_v44, 5  ;;  %v2883_v8 = vsel %vm7116_vm7, %v2881_v20, %v2882_v37  ;;  %v658_v26 = vrot.slane %v656_v59, 5  ;;  %v666_v1 = vshll.u32 %v7285_v52, 16  ;;  %v7318_v55 = vld [vmem:[%s6842_s12 + $0x7c] sm:$0xf] }
  0x9b   : > { %v645_v11 = vsel %vm6886_vm3, %v640_v57, %v644_v28  ;;  %v5485_v14 = vcombine.low %v2880_v54, %v2883_v8  ;;  %v662_v29 = vrot.slane %v660_v0, 4  ;;  %v5469_v35 = vrot.slane %v5453_v62, 9  ;;  %v7321_v44 = vld [vmem:[%s6842_s12 + $0x80] sm:$0x1]  ;;  %v5455_v57 = vld [vmem:[%s6842_s12 + $0x78] sm:$0xe] }
  0x9c   : > { %v5201_v5 = vcombine.low %v635_v2, %v645_v11  ;;  %v653_v23 = vor.u32 %v652_v47, %v649_v63  ;;  %v668_v34 = vrot.slane %v666_v1, 5  ;;  %v2886_v9 = vrot.slane %v7075_v56, 5  ;;  %v6580_v59 = vld [vmem:[%s6842_s12] sm:$0xf]  ;;  %v7328_v2 = vld [vmem:[%s6842_s12 + $0x4] sm:$0xf] }
  0x9d   : > { %v2889_v61 = vrot.slane %v7083_v6, 5  ;;  %6067 = vmatprep.mubr.msk.bf16.mxu0 %vm720_vm4, %v5485_v14  ;;  %v663_v40 = vor.u32 %v662_v29, %v658_v26  ;;  %v5470_v19 = vrot.slane %v5454_v17, 9  ;;  %v2893_v43 = vrot.slane %v5390_v13, 5  ;;  %v5396_v0 = vld [vmem:[%s6842_s12 + $0x88] sm:$0xf] }
  0x9e   : > { %5913 = vmatprep.mubr.msk.bf16.mxu1 %vm720_vm4, %v5201_v5  ;;  %v654_v39 = vrot.slane %v653_v23, 4  ;;  %v2887_v45 = vsel %vm7116_vm7, %v5469_v35, %v2886_v9  ;;  %v2888_v46 = vrot.slane %v2886_v9, 4  ;;  %v2896_v56 = vrot.slane %v5391_v32, 5  ;;  %v5456_v62 = vld [vmem:[%s6842_s12 + $0x84] sm:$0xe] }
  0x9f   : > { %v664_v28 = vrot.slane %v663_v40, 4  ;;  %v2894_v51 = vsel %vm7116_vm7, %v5470_v19, %v2893_v43  ;;  %v2895_v58 = vrot.slane %v2893_v43, 4  ;;  %v5219_v63 = vcombine.low %v6580_v59, %v7328_v2  ;;  %v5399_v23 = vld [vmem:[%s6842_s12 + $0x94] sm:$0xf]  ;;  %v5457_v29 = vld [vmem:[%s6842_s12 + $0x90] sm:$0xe] }
  0xa0   : > { %v659_v6 = vsel %vm6886_vm3, %v654_v39, %v658_v26  ;;  %v2890_v37 = vsel %vm7116_vm7, %v2888_v46, %v2889_v61  ;;  %v5397_v26 = vld [vmem:[%s6842_s12 + $0x8c] sm:$0x1]  ;;  %v5471_v1 = vrot.slane %v5455_v57, 9  ;;  %v2900_v13 = vrot.slane %v7318_v55, 5  ;;  %v5400_v9 = vld [vmem:[%s6842_s12 + $0x98] sm:$0x1] }
  0xa1   : > { %v669_v54 = vsel %vm6886_vm3, %v664_v28, %v668_v34  ;;  %v5486_v20 = vcombine.low %v2887_v45, %v2890_v37  ;;  %v2897_v47 = vsel %vm7116_vm7, %v2895_v58, %v2896_v56  ;;  %v2903_v17 = vrot.slane %v7321_v44, 5  ;;  %v5402_v61 = vld [vmem:[%s6842_s12 + $0xa0] sm:$0xf]  ;;  %v6582_v39 = vld [vmem:[%s6842_s12 + $0xc] sm:$0xf] }
  0xa2   : > { %v5202_v11 = vcombine.low %v659_v6, %v669_v54  ;;  %v5487_v8 = vcombine.low %v2894_v51, %v2897_v47  ;;  %v5472_v5 = vrot.slane %v5456_v62, 9  ;;  %v2907_v14 = vrot.slane %v5396_v0, 5  ;;  %v7350_v40 = vld [vmem:[%s6842_s12 + $0x10] sm:$0xf]  ;;  %v5403_v46 = vld [vmem:[%s6842_s12 + $0xa4] sm:$0x1] }
  0xa3   : > { %6068 = vmatmul.mubr.msk.bf16.gmra.mrb[12].mxu0 %vm720_vm4, %v5486_v20  ;;  %v2901_v32 = vsel %vm7116_vm7, %v5471_v1, %v2900_v13  ;;  %v2902_v34 = vrot.slane %v2900_v13, 4  ;;  %v2910_v35 = vrot.slane %v5397_v26, 5  ;;  %v5220_v19 = vcombine.low %v6582_v39, %v7350_v40  ;;  %v5458_v56 = vld [vmem:[%s6842_s12 + $0x9c] sm:$0xe]  ;;  %v6584_v28 = vld [vmem:[%s6842_s12 + $0x18] sm:$0xf] }
  0xa4   : > { %5914 = vmatmul.mubr.msk.bf16.gmra.mrb[28].mxu1 %vm720_vm4, %v5202_v11  ;;  %6071 = vmatprep.mubr.msk.bf16.mxu0 %vm720_vm4, %v5487_v8  ;;  %v2908_v43 = vsel %vm7116_vm7, %v5472_v5, %v2907_v14  ;;  %v2909_v45 = vrot.slane %v2907_v14, 4  ;;  %v7361_v51 = vld [vmem:[%s6842_s12 + $0x1c] sm:$0xf]  ;;  %v5473_v37 = vrot.slane %v5457_v29, 9  ;;  %v2914_v57 = vrot.slane %v5399_v23, 5 }
  0xa5   : > { %5919 = vmatprep.mubr.msk.bf16.mxu1 %vm720_vm4, %v5219_v63  ;;  %v2904_v6 = vsel %vm7116_vm7, %v2902_v34, %v2903_v17  ;;  %v5221_v58 = vcombine.low %v6584_v28, %v7361_v51  ;;  %v2917_v59 = vrot.slane %v5400_v9, 5  ;;  %v2921_v63 = vrot.slane %v5402_v61, 5  ;;  %v5405_v47 = vld [vmem:[%s6842_s12 + $0xac] sm:$0xf]  ;;  %v5408_v26 = vld [vmem:[%s6842_s12 + $0xb8] sm:$0xf] }
  0xa6   : > { %v5488_v54 = vcombine.low %v2901_v32, %v2904_v6  ;;  %v2911_v20 = vsel %vm7116_vm7, %v2909_v45, %v2910_v35  ;;  %v2916_v62 = vrot.slane %v2914_v57, 4  ;;  %v5474_v11 = vrot.slane %v5458_v56, 9  ;;  %v7374_v17 = vld [vmem:[%s8906_s1 + $0x6] sm:$0x3]  ;;  %v5406_v14 = vld [vmem:[%s6842_s12 + $0xb0] sm:$0x1] }
  0xa7   : > { %v5489_v0 = vcombine.low %v2908_v43, %v2911_v20  ;;  %v2924_v8 = vrot.slane %v5403_v46, 5  ;;  %v1488_v1 = vsel %vm769_vm0, %v7072_v50, 0  ;;  %v2923_v13 = vrot.slane %v2921_v63, 4  ;;  %v5459_v34 = vld [vmem:[%s6842_s12 + $0xa8] sm:$0xe] }
  0xa8   : > { %v2915_v5 = vsel %vm7116_vm7, %v5473_v37, %v2914_v57  ;;  %v2918_v50 = vsel %vm7116_vm7, %v2916_v62, %v2917_v59  ;;  %v2928_v23 = vrot.slane %v5405_v47, 5  ;;  %v2922_v29 = vsel %vm7116_vm7, %v5474_v11, %v2921_v63  ;;  %v5409_v9 = vld [vmem:[%s6842_s12 + $0xbc] sm:$0x1]  ;;  %v5460_v61 = vld [vmem:[%s6842_s12 + $0xb4] sm:$0xe] }
  0xa9   : > { %v2925_v32 = vsel %vm7116_vm7, %v2923_v13, %v2924_v8  ;;  %v2935_v35 = vrot.slane %v5408_v26, 5  ;;  %v6586_v39 = vld [vmem:[%s6842_s12 + $0x24] sm:$0xf]  ;;  %v5490_v45 = vcombine.low %v2915_v5, %v2918_v50  ;;  %v5475_v56 = vrot.slane %v5459_v34, 9  ;;  %v7400_v37 = vld [vmem:[%s6842_s12 + $0x34] sm:$0xf] }
  0xaa   : > { %v5491_v46 = vcombine.low %v2922_v29, %v2925_v32  ;;  %v2930_v6 = vrot.slane %v2928_v23, 4  ;;  %v2931_v28 = vrot.slane %v5406_v14, 5  ;;  %v2938_v59 = vrot.slane %v5409_v9, 5  ;;  %v5411_v63 = vld [vmem:[%s6842_s12 + $0xc4] sm:$0xf] }
  0xab   : > { %6072 = vmatmul.mubr.msk.bf16.gmra.mrb[16].mxu0 %vm720_vm4, %v5488_v54  ;;  %v5476_v54 = vrot.slane %v5460_v61, 9  ;;  %v2937_v20 = vrot.slane %v2935_v35, 4  ;;  %v2929_v47 = vsel %vm7116_vm7, %v5475_v56, %v2928_v23  ;;  %v2942_v62 = vrot.slane %v5411_v63, 5  ;;  %v5412_v26 = vld [vmem:[%s6842_s12 + $0xc8] sm:$0x1] }
  0xac   : > { %5920 = vmatmul.mubr.msk.bf16.vlgmr.msra.gmra.mrb[0].mxu1 %vm720_vm4, %v5220_v19  ;;  %6075 = vmatprep.mubr.msk.bf16.mxu0 %vm720_vm4, %v5489_v0  ;;  %v7395_v19 = vld [vmem:[%s6842_s12 + $0x28] sm:$0xf]  ;;  %v2932_v0 = vsel %vm7116_vm7, %v2930_v6, %v2931_v28  ;;  %v6590_v13 = vld [vmem:[%s6842_s12 + $0x3c] sm:$0xf]  ;;  %v7420_v5 = vld [vmem:[%s6842_s12 + $0x40] sm:$0xf]  ;;  %v5225_v9 = vcombine.low %v7017_v12, %v7025_v36  ;;  %v5227_v6 = vcombine.low %v7089_v18, %v7092_v24 }
  0xad   : > { %5952 = vmatpush3.bf16.msra.mxu1 %v1488_v1  ;;  %5923 = vmatprep.mubr.msk.bf16.mxu1 %vm720_vm4, %v5221_v58  ;;  %v5222_v43 = vcombine.low %v6586_v39, %v7395_v19  ;;  %v6588_v58 = vld [vmem:[%s6842_s12 + $0x30] sm:$0xf]  ;;  %v2936_v11 = vsel %vm7116_vm7, %v5476_v54, %v2935_v35  ;;  %v2939_v8 = vsel %vm7116_vm7, %v2937_v20, %v2938_v59  ;;  %v5461_v1 = vld [vmem:[%s6842_s12 + $0xc0] sm:$0xe]  ;;  %v2944_v32 = vrot.slane %v2942_v62, 4 }
  0xae   : > { %6450 = vmatprep.subr.msk.bf16.mxu1 %vm769_vm0, %v7374_v17  ;;  %v5223_v57 = vcombine.low %v6588_v58, %v7400_v37  ;;  %v5224_v50 = vcombine.low %v6590_v13, %v7420_v5  ;;  %v5492_v14 = vcombine.low %v2929_v47, %v2932_v0  ;;  %v5493_v23 = vcombine.low %v2936_v11, %v2939_v8  ;;  %v1226_v58 = vld [vmem:[%s6842_s12] sm:$0xe]  ;;  %v1227_v20 = vld [vmem:[%s6842_s12 + $0xc] sm:$0xe]  ;;  %v6592_v18 = vld [vmem:[%s6842_s12 + $0x8] sm:$0x1] }
  0xaf   : > { %v5477_v29 = vrot.slane %v5461_v1, 9  ;;  %v2945_v34 = vrot.slane %v5412_v26, 5  ;;  %v2319_v35 = vshll.u32 %v7318_v55, 16  ;;  %v2323_v61 = vshrl.u32 %v7318_v55, 16  ;;  %v6543_v47 = vld [vmem:[%s6842_s12 + $0x24] sm:$0xff]  }
  0xb0   : > { %v2329_v56 = vshll.u32 %v7321_v44, 16  ;;  %v1279_v54 = vrot.slane %v7328_v2, 5  ;;  %v1282_v24 = vrot.slane %v6592_v18, 5  ;;  %v6593_v44 = vld [vmem:[%s6842_s12 + $0x14] sm:$0x1]  ;;  %v5228_v63 = vcombine.low %v7108_v3, %v7114_v10 }
  0xb1   : > { %v2943_v39 = vsel %vm7116_vm7, %v5477_v29, %v2942_v62  ;;  %v7435_v12 = vrot.slane %v2319_v35, 5  ;;  %v2325_v36 = vrot.slane %v2323_v61, 4  ;;  %v1289_v59 = vrot.slane %v6593_v44, 5  ;;  %v1229_v62 = vld [vmem:[%s6842_s12 + $0x24] sm:$0xe] }
  0xb2   : > { %v5251_v0 = vrot.slane %v1226_v58, 9  ;;  %v4134_v11 = vsel %vm769_vm0, %v7180_v42, 0  ;;  %v1281_v8 = vrot.slane %v1279_v54, 4  ;;  %v1230_v13 = vld [vmem:[%s6842_s12 + $0x30] sm:$0xe]  ;;  %v1300_v3 = vrot.slane %v7395_v19, 5 }
  0xb3   : > { %6076 = vmatmul.mubr.msk.bf16.gmra.mrb[20].mxu0 %vm720_vm4, %v5490_v45  ;;  %8930 = vst [vmem:[#allocation8_spill] sm:$0xff] %v7435_v12  ;;  %v5226_v45 = vcombine.low %v7050_v21, %v7056_v30  ;;  %v2326_v28 = vor.u32 %v2325_v36, %v7435_v12  ;;  %v1228_v21 = vld [vmem:[%s6842_s12 + $0x18] sm:$0xe]  ;;  %v1293_v30 = vrot.slane %v7361_v51, 5  ;;  %v5252_v51 = vrot.slane %v1227_v20, 9  ;;  %v6547_v58 = vld [vmem:[%s6842_s12 + $0x3c] sm:$0xff]  }
  0xb4   : > { %5924 = vmatmul.mubr.msk.bf16.gmra.mrb[4].mxu1 %vm720_vm4, %v5222_v43  ;;  %6079 = vmatprep.mubr.msk.bf16.mxu0 %vm720_vm4, %v5491_v46  ;;  %v2946_v43 = vsel %vm7116_vm7, %v2944_v32, %v2945_v34  ;;  %v6541_v46 = vld [vmem:[%s6842_s12 + $0x18] sm:$0xff]   ;;  %v5253_v1 = vrot.slane %v1228_v21, 9  ;;  %v6545_v32 = vld [vmem:[%s6842_s12 + $0x30] sm:$0xff]   ;;  %v5230_v34 = vcombine.low %v7166_v33, %v7172_v38  ;;  %v5231_v42 = vcombine.low %v7196_v7, %v7199_v27  ;;  %v7601_v27 = vld [vmem:[%s6842_s12 + $0x64] sm:$0xf] }
  0xb5   : > { %5927 = vmatprep.mubr.msk.bf16.mxu1 %vm720_vm4, %v5223_v57  ;;  %v5494_v55 = vcombine.low %v2943_v39, %v2946_v43  ;;  %v1286_v57 = vrot.slane %v7350_v40, 5  ;;  %v7455_v40 = vrot.slane %v2329_v56, 5  ;;  %v7458_v2 = vrot.slane %v2326_v28, 4  ;;  %v1231_v10 = vld [vmem:[%s6842_s12 + $0x3c] sm:$0xe]  ;;  %v6551_v33 = vld [vmem:[%s6842_s12 + $0x54] sm:$0xff]  }
  0xb6   : > { %v1307_v35 = vrot.slane %v7400_v37, 5  ;;  %v7489_v19 = vsel %vm7116_vm7, %v5251_v0, %v1279_v54  ;;  %v1314_v39 = vrot.slane %v7420_v5, 5  ;;  %v7499_v37 = vsel %vm7116_vm7, %v1281_v8, %v1282_v24  ;;  %v6595_v56 = vld [vmem:[%s6842_s12 + $0x2c] sm:$0x1]  ;;  %v6596_v20 = vld [vmem:[%s6842_s12 + $0x38] sm:$0x1] }
  0xb7   : > { %8931 = vst [vmem:[#allocation9_spill] sm:$0xff] %v7455_v40  ;;  %8932 = vst [vmem:[#allocation10_spill] sm:$0xff] %v7458_v2  ;;  %v1288_v26 = vrot.slane %v1286_v57, 4  ;;  %v7493_v61 = vsel %vm7116_vm7, %v5252_v51, %v1286_v57  ;;  %v7507_v36 = vsel %vm7116_vm7, %v5253_v1, %v1293_v30  ;;  %v5255_v28 = vrot.slane %v1230_v13, 9  ;;  %v5576_v18 = vld [vmem:[%s6842_s12 + $0x18] sm:$0xf] }
  0xb8   : > { %v1309_v54 = vrot.slane %v1307_v35, 4  ;;  %v1310_v21 = vrot.slane %v6596_v20, 5  ;;  %v6549_v24 = vld [vmem:[%s6842_s12 + $0x48] sm:$0xff]   ;;  %v7528_v44 = vsel %vm769_vm0, %v7374_v17, 0  ;;  %v1233_v1 = vld [vmem:[%s6842_s12 + $0x54] sm:$0xe] }
  0xb9   : > { %v7503_v43 = vsel %vm7116_vm7, %v1288_v26, %v1289_v59  ;;  %v1316_v59 = vrot.slane %v1314_v39, 4  ;;  %v6598_v0 = vld [vmem:[%s6842_s12 + $0x4c] sm:$0xf]  ;;  %v5579_v13 = vld [vmem:[%s6842_s12 + $0x24] sm:$0xf] }
  0xba   : > { %v1321_v51 = vrot.slane %v6598_v0, 5  ;;  %v3679_v20 = vshll.u32 %v5579_v13, 16  ;;  %v5581_v17 = vld [vmem:[%s6842_s12 + $0x2c] sm:$0x1]  ;;  %v6604_v8 = vld [vmem:[%s6842_s12 + $0x70] sm:$0xf] }
  0xbb   : > { %6080 = vmatmul.mubr.msk.bf16.gmra.mrb[24].mxu0 %vm720_vm4, %v5492_v14  ;;  %v1295_v14 = vrot.slane %v1293_v30, 4  ;;  %v5256_v30 = vrot.slane %v1231_v10, 9  ;;  %v6599_v10 = vld [vmem:[%s6842_s12 + $0x50] sm:$0x1]  ;;  %v6614_v2 = vld [vmem:[%s6842_s12 + $0xa4] sm:$0x1] }
  0xbc   : > { %5928 = vmatmul.mubr.msk.bf16.gmra.mrb[8].mxu1 %vm720_vm4, %v5224_v50  ;;  %6083 = vmatprep.mubr.msk.bf16.mxu0 %vm720_vm4, %v5493_v23  ;;  %v5229_v50 = vcombine.low %v7140_v49, %v7143_v53  ;;  %v6594_v23 = vld [vmem:[%s6842_s12 + $0x20] sm:$0x1]  ;;  %v7483_v49 = vld [vmem:[%s8906_s1 + $0x10] sm:$0x3]  ;;  %v5233_v53 = vcombine.low %v7244_v41, %v7251_v48 }
  0xbd   : > { %5931 = vmatprep.mubr.msk.bf16.mxu1 %vm720_vm4, %v5225_v9  ;;  %v1296_v29 = vrot.slane %v6594_v23, 5  ;;  %v5232_v9 = vcombine.low %v7218_v15, %v7229_v60  ;;  %v7554_v23 = vsel %vm7116_vm7, %v5255_v28, %v1307_v35  ;;  %v1323_v35 = vrot.slane %v1321_v51, 4 }
  0xbf   : > { %v7515_v5 = vsel %vm7116_vm7, %v1295_v14, %v1296_v29 }
  0xc3   : > { %6084 = vmatmul.mubr.msk.bf16.gmra.mrb[28].mxu0 %vm720_vm4, %v5494_v55  ;;  %v5254_v55 = vrot.slane %v1229_v62, 9  ;;  %v5577_v62 = vld [vmem:[%s6842_s12 + $0x1c] sm:$0xf] }
  0xc4   : > { %5932 = vmatmul.mubr.msk.bf16.gmra.mrb[12].mxu1 %vm720_vm4, %v5226_v45  ;;  %6089 = vmatprep.mubr.msk.bf16.mxu0 %vm720_vm4, %v6541_v46  ;;  %v7510_v45 = vld [vmem:[%s6842_s12 + $0x48] sm:$0xe]  ;;  %v1302_v46 = vrot.slane %v1300_v3, 4  ;;  %v3665_v28 = vshrl.u32 %v5577_v62, 16 }
  0xc5   : > { %5935 = vmatprep.mubr.msk.bf16.mxu1 %vm720_vm4, %v5227_v6  ;;  %v1303_v6 = vrot.slane %v6595_v56, 5  ;;  %v7543_v26 = vsel %vm7116_vm7, %v5254_v55, %v1300_v3  ;;  %v5257_v29 = vrot.slane %v7510_v45, 9  ;;  %v7560_v56 = vsel %vm7116_vm7, %v1309_v54, %v1310_v21 }
  0xc6   : > { %v7564_v3 = vsel %vm7116_vm7, %v5256_v30, %v1314_v39  ;;  %v3652_v55 = vshrl.u32 %v5576_v18, 16  ;;  %v3661_v45 = vshll.u32 %v5577_v62, 16  ;;  %v3676_v54 = vshrl.u32 %v5579_v13, 16  ;;  %v6553_v62 = vld [vmem:[%s6842_s12 + $0x60] sm:$0xff]  }
  0xc7   : > { %v7550_v14 = vsel %vm7116_vm7, %v1302_v46, %v1303_v6  ;;  %v3655_v46 = vshll.u32 %v5576_v18, 16  ;;  %v5258_v18 = vrot.slane %v1233_v1, 9  ;;  %v5578_v1 = vld [vmem:[%s6842_s12 + $0x20] sm:$0x1] }
  0xc8   : > { %v7605_v13 = vrot.slane %v3661_v45, 5 }
  0xc9   : > { %v3657_v0 = vrot.slane %v3655_v46, 5  ;;  %v5582_v46 = vld [vmem:[%s6842_s12 + $0x30] sm:$0xf] }
  0xcb   : > { %6090 = vmatmul.mubr.msk.bf16.vlgmr.msra.gmra.mrb[0].mxu0 %vm720_vm4, %v6543_v47 }
  0xcc   : > { %5936 = vmatmul.mubr.msk.bf16.gmra.mrb[16].mxu1 %vm720_vm4, %v5228_v63  ;;  %6122 = vmatpush3.bf16.msra.mxu0 %v4134_v11  ;;  %v6597_v63 = vld [vmem:[%s6842_s12 + $0x44] sm:$0x1]  ;;  %v3700_v11 = vshrl.u32 %v5582_v46, 16 }
  0xcd   : > { %5939 = vmatprep.mubr.msk.bf16.mxu1 %vm720_vm4, %v5229_v50  ;;  %6093 = vmatprep.mubr.msk.bf16.mxu0 %vm720_vm4, %v6545_v32  ;;  %v1317_v47 = vrot.slane %v6597_v63, 5  ;;  %v5580_v50 = vld [vmem:[%s6842_s12 + $0x28] sm:$0xf]  ;;  %v1324_v32 = vrot.slane %v6599_v10, 5 }
  0xce   : > { %6456 = vmatprep.subr.msk.bf16.mxu0 %vm769_vm0, %v7483_v49  ;;  %v3685_v21 = vshll.u32 %v5580_v50, 16  ;;  %v3689_v39 = vshrl.u32 %v5580_v50, 16  ;;  %v3678_v50 = vrot.slane %v3676_v54, 4 }
  0xcf   : > { %v7568_v6 = vsel %vm7116_vm7, %v1316_v59, %v1317_v47  ;;  %v6600_v59 = vld [vmem:[%s6842_s12 + $0x58] sm:$0xf]  ;;  %v3654_v47 = vrot.slane %v3652_v55, 4  ;;  %v7598_v7 = vsel %vm7116_vm7, %v1323_v35, %v1324_v32  ;;  %v6602_v35 = vld [vmem:[%s6842_s12 + $0x5c] sm:$0x1] }
  0xd0   : > { %v1328_v63 = vrot.slane %v6600_v59, 5  ;;  %v7607_v10 = vrot.slane %v3685_v21, 5  ;;  %v3691_v55 = vrot.slane %v3689_v39, 4  ;;  %v1331_v59 = vrot.slane %v6602_v35, 5  ;;  %v5583_v21 = vld [vmem:[%s6842_s12 + $0x34] sm:$0xf] }
  0xd1   : > { %v3658_v54 = vor.u32 %v3657_v0, %v3654_v47  ;;  %v1235_v35 = vld [vmem:[%s6842_s12 + $0x6c] sm:$0xe]  ;;  %v3695_v47 = vshll.u32 %v5581_v17, 16  ;;  %v6605_v0 = vld [vmem:[%s6842_s12 + $0x7c] sm:$0xf] }
  0xd2   : > { %v1330_v32 = vrot.slane %v1328_v63, 4  ;;  %v6606_v17 = vld [vmem:[%s6842_s12 + $0x74] sm:$0x1] }
  0xd3   : > { %6094 = vmatmul.mubr.msk.bf16.gmra.mrb[4].mxu0 %vm720_vm4, %v6547_v58  ;;  %v6603_v58 = vld [vmem:[%s6842_s12 + $0x68] sm:$0x1]  ;;  %v3659_v15 = vrot.slane %v3658_v54, 4 }
  0xd4   : > { %5940 = vmatmul.mubr.msk.bf16.gmra.mrb[20].mxu1 %vm720_vm4, %v5230_v34  ;;  %6097 = vmatprep.mubr.msk.bf16.mxu0 %vm720_vm4, %v6549_v24  ;;  %v7590_v34 = vsel %vm7116_vm7, %v5257_v29, %v1321_v51  ;;  %v7593_v24 = vld [vmem:[%s6842_s12 + $0x60] sm:$0xe]  ;;  %v3667_v51 = vrot.slane %v3665_v28, 4  ;;  %v3681_v29 = vrot.slane %v3679_v20, 5  ;;  %v1338_v30 = vrot.slane %v6603_v58, 5 }
  0xd5   : > { %5943 = vmatprep.mubr.msk.bf16.mxu1 %vm720_vm4, %v5231_v42  ;;  %v8910_v42 = vrot.slane %v7601_v27, 5  ;;  %v5259_v38 = vrot.slane %v7593_v24, 9  ;;  %v7618_v28 = vsel %vm7116_vm7, %v5258_v18, %v1328_v63  ;;  %v3671_v20 = vshll.u32 %v5578_v1, 16 }
  0xd6   : > { %v3668_v39 = vor.u32 %v3667_v51, %v7605_v13  ;;  %v1342_v24 = vrot.slane %v6604_v8, 5  ;;  %v3703_v58 = vshll.u32 %v5582_v46, 16  ;;  %v3682_v18 = vor.u32 %v3681_v29, %v3678_v50 }
  0xd7   : > { %v1337_v45 = vrot.slane %v8910_v42, 4  ;;  %v3692_v63 = vor.u32 %v3691_v55, %v7607_v10  ;;  %v7635_v8 = vsel %vm7116_vm7, %v1330_v32, %v1331_v59  ;;  %v1349_v1 = vrot.slane %v6605_v0, 5  ;;  %v6555_v59 = vld [vmem:[%s6842_s12 + $0x6c] sm:$0xff]   ;;  %v6556_v0 = vld [vmem:[%s6842_s12 + $0x78] sm:$0xff]  }
  0xd8   : > { %v3709_v51 = vshll.u32 %v5583_v21, 16  ;;  %v3713_v50 = vshrl.u32 %v5583_v21, 16  ;;  %v3673_v60 = vrot.slane %v3671_v20, 5  ;;  %v3669_v29 = vrot.slane %v3668_v39, 4  ;;  %v7648_v20 = vld [vmem:[%s6842_s12 + $0x38] sm:$0x1] }
  0xd9   : > { %v1344_v55 = vrot.slane %v1342_v24, 4  ;;  %v3702_v46 = vrot.slane %v3700_v11, 4  ;;  %v3705_v32 = vrot.slane %v3703_v58, 5  ;;  %v3683_v21 = vrot.slane %v3682_v18, 4  ;;  %8933 = vst [vmem:[#allocation11_spill] sm:$0xff] %v7648_v20 }
  0xda   : > { %v3693_v57 = vrot.slane %v3692_v63, 4  ;;  %v3697_v42 = vrot.slane %v3695_v47, 5  ;;  %v1351_v48 = vrot.slane %v1349_v1, 4  ;;  %v8934_v39 = vrot.slane %v7601_v27, 5  ;;  %v1237_v47 = vld [vmem:[%s6842_s12 + $0x84] sm:$0xe] }
  0xdb   : > { %6098 = vmatmul.mubr.msk.bf16.gmra.mrb[8].mxu0 %vm720_vm4, %v6551_v33  ;;  %v1236_v33 = vld [vmem:[%s6842_s12 + $0x78] sm:$0xe]  ;;  %v7662_v18 = vsel %vm7116_vm7, %v1337_v45, %v1338_v30  ;;  %v3674_v30 = vsel %vm6886_vm3, %v3669_v29, %v3673_v60  ;;  %v3688_v45 = vsel %vm6886_vm3, %v3683_v21, %v7607_v10  ;;  %v8936_v29 = vcombine.low %v7489_v19, %v7499_v37 }
  0xdc   : > { %5944 = vmatmul.mubr.msk.bf16.gmra.mrb[24].mxu1 %vm720_vm4, %v5232_v9  ;;  %6101 = vmatprep.mubr.msk.bf16.mxu0 %vm720_vm4, %v6553_v62  ;;  %v5260_v9 = vrot.slane %v1235_v35, 9  ;;  %v1345_v62 = vrot.slane %v6606_v17, 5  ;;  %v5261_v41 = vrot.slane %v1236_v33, 9  ;;  %v7650_v35 = vrot.slane %v3709_v51, 5 }
  0xdd   : > { %5947 = vmatprep.mubr.msk.bf16.mxu1 %vm720_vm4, %v5233_v53  ;;  %v6607_v53 = vld [vmem:[%s6842_s12 + $0x80] sm:$0x1]  ;;  %v3715_v17 = vrot.slane %v3713_v50, 4  ;;  %v7658_v58 = vsel %vm7116_vm7, %v5259_v38, %v8934_v39  ;;  %v3664_v33 = vsel %vm6886_vm3, %v3659_v15, %v7605_v13  ;;  %v3706_v51 = vor.u32 %v3705_v32, %v3702_v46  ;;  %v6608_v38 = vld [vmem:[%s6842_s12 + $0x88] sm:$0xf] }
  0xde   : > { %v1352_v54 = vrot.slane %v6607_v53, 5  ;;  %v7666_v63 = vsel %vm7116_vm7, %v5260_v9, %v1342_v24  ;;  %v7674_v27 = vsel %vm7116_vm7, %v1344_v55, %v1345_v62  ;;  %v1356_v50 = vrot.slane %v6608_v38, 5  ;;  %v5585_v15 = vld [vmem:[%s6842_s12 + $0x3c] sm:$0xf]  ;;  %v6609_v55 = vld [vmem:[%s6842_s12 + $0x8c] sm:$0x1] }
  0xdf   : > { %v7685_v13 = vsel %vm7116_vm7, %v5261_v41, %v1349_v1  ;;  %v3719_v24 = vshll.u32 %v7648_v20, 16  ;;  %v8935_v9 = vcombine.low %v7274_v16, %v7279_v25  ;;  %v3698_v60 = vsel %vm6886_vm3, %v3693_v57, %v3697_v42  ;;  %v7715_v32 = vld [vmem:[%s6842_s12 + $0x40] sm:$0xf]  ;;  %v7719_v41 = vld [vmem:[%s6842_s12 + $0x4c] sm:$0xf] }
  0xe0   : > { %v7698_v10 = vsel %vm7116_vm7, %v1351_v48, %v1352_v54  ;;  %v3716_v1 = vor.u32 %v3715_v17, %v7650_v35  ;;  %v5262_v62 = vrot.slane %v1237_v47, 9  ;;  %v7711_v42 = vsel %vm769_vm0, %v7483_v49, 0  ;;  %8937 = vst [vmem:[#allocation12_spill] sm:$0xff] %v7715_v32  ;;  %v6557_v48 = vld [vmem:[%s6842_s12 + $0x84] sm:$0xff]   ;;  %v5591_v39 = vld [vmem:[%s6842_s12 + $0x54] sm:$0xf] }
  0xe1   : > { %v1359_v46 = vrot.slane %v6609_v55, 5  ;;  %v3707_v19 = vrot.slane %v3706_v51, 4  ;;  %v1358_v37 = vrot.slane %v1356_v50, 4  ;;  %v3727_v21 = vshll.u32 %v5585_v15, 16  ;;  %v6558_v47 = vld [vmem:[%s6842_s12 + $0x90] sm:$0xff]  }
  0xe2   : > { %v7722_v53 = vcombine.low %v3664_v33, %v3674_v30  ;;  %v7724_v54 = vcombine.low %v3688_v45, %v3698_v60  ;;  %v3721_v17 = vrot.slane %v3719_v24, 5  ;;  %v3717_v51 = vrot.slane %v3716_v1, 4  ;;  %v7737_v33 = vld [vmem:[%s6842_s12 + $0x58] sm:$0xf]  ;;  %v7740_v30 = vld [vmem:[%s6842_s12 + $0x44] sm:$0x1] }
  0xe3   : > { %6102 = vmatmul.mubr.msk.bf16.gmra.mrb[12].mxu0 %vm720_vm4, %v6555_v59  ;;  %v5588_v59 = vld [vmem:[%s6842_s12 + $0x48] sm:$0xf]  ;;  %v7732_v38 = vsel %vm7116_vm7, %v5262_v62, %v1356_v50  ;;  %8938 = vst [vmem:[#allocation13_spill] sm:$0xff] %v7740_v30  ;;  %v3757_v24 = vshll.u32 %v7719_v41, 16  ;;  %v3712_v1 = vsel %vm6886_vm3, %v3707_v19, %v7650_v35  ;;  %v7749_v50 = vsel %vm7116_vm7, %v1358_v37, %v1359_v46  ;;  %v7753_v49 = vld [vmem:[%s6842_s12 + $0x90] sm:$0xe] }
  0xe4   : > { %5948 = vmatmul.mubr.msk.bf16.gmra.mrb[28].mxu1 %vm720_vm4, %v8935_v9  ;;  %6105 = vmatprep.mubr.msk.bf16.mxu0 %vm720_vm4, %v6556_v0  ;;  %v3724_v0 = vshrl.u32 %v5585_v15, 16  ;;  %v3733_v15 = vshll.u32 %v7715_v32, 16  ;;  %v3737_v9 = vshrl.u32 %v7715_v32, 16  ;;  %v3748_v45 = vshrl.u32 %v5588_v59, 16  ;;  %v6613_v20 = vld [vmem:[%s6842_s12 + $0xa0] sm:$0xf] }
  0xe5   : > { %5953 = vmatprep.mubr.msk.bf16.mxu1 %vm720_vm4, %v8936_v29  ;;  %v3751_v60 = vshll.u32 %v5588_v59, 16  ;;  %v3761_v29 = vshrl.u32 %v7719_v41, 16  ;;  %v3729_v55 = vrot.slane %v3727_v21, 5  ;;  %v3772_v59 = vshrl.u32 %v5591_v39, 16 }
  0xe6   : > { %v3726_v62 = vrot.slane %v3724_v0, 4  ;;  %v3775_v57 = vshll.u32 %v5591_v39, 16  ;;  %v3781_v16 = vshll.u32 %v7737_v33, 16  ;;  %v3785_v11 = vshrl.u32 %v7737_v33, 16 }
  0xe7   : > { %v8939_v35 = vcombine.low %v7493_v61, %v7503_v43  ;;  %v3722_v46 = vsel %vm6886_vm3, %v3717_v51, %v3721_v17  ;;  %v7764_v19 = vrot.slane %v3733_v15, 5  ;;  %v3739_v37 = vrot.slane %v3737_v9, 4  ;;  %v7773_v61 = vld [vmem:[%s6842_s12 + $0x50] sm:$0x1]  ;;  %v7783_v9 = vld [vmem:[%s6842_s12 + $0x5c] sm:$0x1] }
  0xe8   : > { %v3743_v0 = vshll.u32 %v7740_v30, 16  ;;  %v8940_v21 = vcombine.low %v7507_v36, %v7515_v5  ;;  %v3750_v43 = vrot.slane %v3748_v45, 4  ;;  %v7775_v39 = vrot.slane %v3757_v24, 5  ;;  %v6610_v36 = vld [vmem:[%s6842_s12 + $0x94] sm:$0xf] }
  0xe9   : > { %v3763_v17 = vrot.slane %v3761_v29, 4  ;;  %v3730_v15 = vor.u32 %v3729_v55, %v3726_v62  ;;  %v1363_v5 = vrot.slane %v6610_v36, 5  ;;  %v6611_v45 = vld [vmem:[%s8906_s1 + $0x8] sm:$0x3]  ;;  %v3777_v24 = vrot.slane %v3775_v57, 5 }
  0xea   : > { %v7789_v29 = vrot.slane %v3781_v16, 5  ;;  %v3787_v62 = vrot.slane %v3785_v11, 4  ;;  %v6560_v55 = vld [vmem:[%s6842_s12 + $0xa8] sm:$0xff]   ;;  %v7796_v36 = vrot.slane %v3743_v0, 5  ;;  %v3767_v51 = vshll.u32 %v7773_v61, 16 }
  0xeb   : > { %6106 = vmatmul.mubr.msk.bf16.gmra.mrb[16].mxu0 %vm720_vm4, %v6557_v48  ;;  %v3753_v48 = vrot.slane %v3751_v60, 5  ;;  %v3774_v60 = vrot.slane %v3772_v59, 4  ;;  %v7800_v30 = vld [vmem:[%s6842_s12 + $0x64] sm:$0xf]  ;;  %v3764_v57 = vor.u32 %v3763_v17, %v7775_v39  ;;  %v1239_v16 = vld [vmem:[%s6842_s12 + $0x9c] sm:$0xe] }
  0xec   : > { %5954 = vmatmul.mubr.msk.bf16.vlgmr.msra.gmra.mrb[0].mxu1 %vm720_vm4, %v8939_v35  ;;  %6109 = vmatprep.mubr.msk.bf16.mxu0 %vm720_vm4, %v6558_v47  ;;  %v6559_v47 = vld [vmem:[%s6842_s12 + $0x9c] sm:$0xff]   ;;  %v7793_v35 = vcombine.low %v3712_v1, %v3722_v46  ;;  %8941 = vst [vmem:[#allocation14_spill] sm:$0xff] %v7800_v30  ;;  %v1370_v11 = vrot.slane %v6613_v20, 5  ;;  %v7806_v12 = vrot.slane %v3730_v15, 4  ;;  %v3791_v1 = vshll.u32 %v7783_v9, 16 }
  0xed   : > { %5986 = vmatpush3.bf16.msra.mxu1 %v7528_v44  ;;  %5957 = vmatprep.mubr.msk.bf16.mxu1 %vm720_vm4, %v8940_v21  ;;  %v5263_v44 = vrot.slane %v7753_v49, 9  ;;  %v5594_v49 = vld [vmem:[%s6842_s12 + $0x60] sm:$0xf]  ;;  %v3740_v21 = vor.u32 %v3739_v37, %v7764_v19  ;;  %v3754_v59 = vor.u32 %v3753_v48, %v3750_v43  ;;  %v3778_v0 = vor.u32 %v3777_v24, %v3774_v60 }
  0xee   : > { %6452 = vmatprep.subr.msk.bf16.mxu1 %vm769_vm0, %v6611_v45  ;;  %v6612_v45 = vld [vmem:[%s6842_s12 + $0x98] sm:$0x1]  ;;  %v3796_v46 = vshrl.u32 %v5594_v49, 16  ;;  %v3799_v37 = vshll.u32 %v5594_v49, 16  ;;  %v3788_v4 = vor.u32 %v3787_v62, %v7789_v29  ;;  %v3805_v43 = vshll.u32 %v7800_v30, 16 }
  0xef   : > { %v1366_v32 = vrot.slane %v6612_v45, 5  ;;  %v3809_v48 = vshrl.u32 %v7800_v30, 16  ;;  %v8942_v20 = vcombine.low %v7543_v26, %v7550_v14  ;;  %v3741_v17 = vrot.slane %v3740_v21, 4 }
  0xf0   : > { %v1365_v15 = vrot.slane %v1363_v5, 4  ;;  %v5264_v60 = vrot.slane %v1239_v16, 9  ;;  %v8943_v24 = vcombine.low %v7554_v23, %v7560_v56  ;;  %v3755_v62 = vrot.slane %v3754_v59, 4 }
  0xf1   : > { %v3765_v49 = vrot.slane %v3764_v57, 4  ;;  %v1372_v45 = vrot.slane %v1370_v11, 4  ;;  %v1373_v26 = vrot.slane %v6614_v2, 5  ;;  %v3793_v14 = vrot.slane %v3791_v1, 5  ;;  %v6562_v57 = vld [vmem:[%s6842_s12 + $0xc0] sm:$0xff]  }
  0xf2   : > { %v3798_v40 = vrot.slane %v3796_v46, 4  ;;  %v3801_v30 = vrot.slane %v3799_v37, 5  ;;  %v3779_v16 = vrot.slane %v3778_v0, 4  ;;  %v3789_v23 = vrot.slane %v3788_v4, 4  ;;  %v7845_v37 = vld [vmem:[%s6842_s12 + $0x68] sm:$0x1] }
  0xf3   : > { %6110 = vmatmul.mubr.msk.bf16.gmra.mrb[20].mxu0 %vm720_vm4, %v6559_v47  ;;  %v3769_v47 = vrot.slane %v3767_v51, 5  ;;  %v6561_v51 = vld [vmem:[%s6842_s12 + $0xb4] sm:$0xff]   ;;  %v7826_v56 = vrot.slane %v3805_v43, 5  ;;  %v3811_v59 = vrot.slane %v3809_v48, 4  ;;  %v3736_v2 = vsel %vm6886_vm3, %v7806_v12, %v7764_v19  ;;  %8944 = vst [vmem:[#allocation15_spill] sm:$0xff] %v7845_v37 }
  0xf4   : > { %5958 = vmatmul.mubr.msk.bf16.gmra.mrb[4].mxu1 %vm720_vm4, %v8942_v20  ;;  %6113 = vmatprep.mubr.msk.bf16.mxu0 %vm720_vm4, %v6560_v55  ;;  %v1240_v20 = vld [vmem:[%s6842_s12 + $0xa8] sm:$0xe]  ;;  %v6615_v55 = vld [vmem:[%s6842_s12 + $0xac] sm:$0xf]  ;;  %v3746_v1 = vsel %vm6886_vm3, %v3741_v17, %v7796_v36  ;;  %v7838_v46 = vsel %vm7116_vm7, %v5263_v44, %v1363_v5  ;;  %v7842_v4 = vsel %vm7116_vm7, %v1365_v15, %v1366_v32  ;;  %v1241_v5 = vld [vmem:[%s6842_s12 + $0xb4] sm:$0xe] }
  0xf5   : > { %5961 = vmatprep.mubr.msk.bf16.mxu1 %vm720_vm4, %v8943_v24  ;;  %v1377_v21 = vrot.slane %v6615_v55, 5  ;;  %v3760_v0 = vsel %vm6886_vm3, %v3755_v62, %v7775_v39  ;;  %v7852_v12 = vsel %vm7116_vm7, %v5264_v60, %v1370_v11  ;;  %v7856_v19 = vsel %vm7116_vm7, %v1372_v45, %v1373_v26  ;;  %v5597_v36 = vld [vmem:[%s6842_s12 + $0x6c] sm:$0xf]  ;;  %v6616_v48 = vld [vmem:[%s6842_s12 + $0xb0] sm:$0x1] }
  0xf6   : > { %8945 = vst [vmem:[#allocation16_spill] sm:$0xff] %v7856_v19  ;;  %v5265_v44 = vrot.slane %v1240_v20, 9  ;;  %v3770_v32 = vsel %vm6886_vm3, %v3765_v49, %v3769_v47  ;;  %v1380_v17 = vrot.slane %v6616_v48, 5  ;;  %v3802_v39 = vor.u32 %v3801_v30, %v3798_v40  ;;  %v7880_v62 = vld [vmem:[%s6842_s12 + $0x70] sm:$0xf] }
  0xf7   : > { %v1379_v43 = vrot.slane %v1377_v21, 4  ;;  %v3784_v11 = vsel %vm6886_vm3, %v3779_v16, %v7789_v29  ;;  %v3794_v15 = vsel %vm6886_vm3, %v3789_v23, %v3793_v14  ;;  %v3812_v60 = vor.u32 %v3811_v59, %v7826_v56  ;;  %8947 = vst [vmem:[#allocation17_spill] sm:$0xff] %v7880_v62  ;;  %v5600_v20 = vld [vmem:[%s6842_s12 + $0x78] sm:$0xf]  ;;  %v7899_v55 = vld [vmem:[%s6842_s12 + $0x7c] sm:$0xf] }
  0xf8   : > { %v3815_v47 = vshll.u32 %v7845_v37, 16  ;;  %v8946_v24 = vcombine.low %v7564_v3, %v7568_v6  ;;  %v5266_v30 = vrot.slane %v1241_v5, 9  ;;  %v1384_v29 = vrot.slane %v7279_v25, 5  ;;  %v6563_v3 = vld [vmem:[%s6842_s12 + $0xcc] sm:$0xff]   ;;  %8949 = vst [vmem:[#allocation18_spill] sm:$0xff] %v7899_v55 }
  0xf9   : > { %v3820_v49 = vshrl.u32 %v5597_v36, 16  ;;  %v8948_v45 = vcombine.low %v7590_v34, %v7598_v7  ;;  %v7887_v6 = vcombine.low %v3736_v2, %v3746_v1  ;;  %v7889_v26 = vcombine.low %v3760_v0, %v3770_v32  ;;  %v5603_v23 = vld [vmem:[%s6842_s12 + $0x84] sm:$0xf]  ;;  %v7912_v59 = vld [vmem:[%s6842_s12 + $0x88] sm:$0xf] }
  0xfa   : > { %v7895_v25 = vsel %vm7116_vm7, %v5265_v44, %v1377_v21  ;;  %v7901_v34 = vcombine.low %v3784_v11, %v3794_v15  ;;  %v7905_v7 = vsel %vm7116_vm7, %v1379_v43, %v1380_v17  ;;  %8950 = vst [vmem:[#allocation19_spill] sm:$0xff] %v7912_v59  ;;  %v7916_v21 = vrot.slane %v3815_v47, 5  ;;  %v5606_v0 = vld [vmem:[%s6842_s12 + $0x90] sm:$0xf]  ;;  %v7928_v48 = vld [vmem:[%s6842_s12 + $0x94] sm:$0xf] }
  0xfb   : > { %6114 = vmatmul.mubr.msk.bf16.gmra.mrb[24].mxu0 %vm720_vm4, %v6561_v51  ;;  %v7907_v51 = vrot.slane %v3802_v39, 4  ;;  %v3823_v2 = vshll.u32 %v5597_v36, 16  ;;  %v3829_v1 = vshll.u32 %v7880_v62, 16  ;;  %v7922_v44 = vsel %vm7116_vm7, %v5266_v30, %v1384_v29  ;;  %8951 = vst [vmem:[#allocation20_spill] sm:$0xff] %v7928_v48  ;;  %v7936_v30 = vld [vmem:[%s6842_s12 + $0x74] sm:$0x1] }
  0xfc   : > { %5962 = vmatmul.mubr.msk.bf16.gmra.mrb[8].mxu1 %vm720_vm4, %v8946_v24  ;;  %6117 = vmatprep.mubr.msk.bf16.mxu0 %vm720_vm4, %v6562_v57  ;;  %v7914_v57 = vrot.slane %v3812_v60, 4  ;;  %v7924_v5 = vrot.slane %v1384_v29, 4  ;;  %v3822_v32 = vrot.slane %v3820_v49, 4  ;;  %v3833_v43 = vshrl.u32 %v7880_v62, 16  ;;  %v7953_v16 = vld [vmem:[%s6842_s12 + $0x80] sm:$0x1] }
  0xfd   : > { %5965 = vmatprep.mubr.msk.bf16.mxu1 %vm720_vm4, %v8948_v45  ;;  %v3844_v17 = vshrl.u32 %v5600_v20, 16  ;;  %v3847_v39 = vshll.u32 %v5600_v20, 16  ;;  %v3853_v11 = vshll.u32 %v7899_v55, 16  ;;  %v3857_v36 = vshrl.u32 %v7899_v55, 16 }
  0xfe   : > { %v3868_v15 = vshrl.u32 %v5603_v23, 16  ;;  %v3871_v60 = vshll.u32 %v5603_v23, 16  ;;  %v3877_v47 = vshll.u32 %v7912_v59, 16  ;;  %v3881_v24 = vshrl.u32 %v7912_v59, 16  ;;  %v5609_v59 = vld [vmem:[%s6842_s12 + $0x9c] sm:$0xf] }
  0xff   : > { %v3892_v29 = vshrl.u32 %v5606_v0, 16  ;;  %v3895_v49 = vshll.u32 %v5606_v0, 16  ;;  %v3901_v45 = vshll.u32 %v7928_v48, 16  ;;  %v3905_v20 = vshrl.u32 %v7928_v48, 16 }
 0x100   : > { %v8952_v14 = vcombine.low %v7618_v28, %v7635_v8  ;;  %v3825_v23 = vrot.slane %v3823_v2, 5  ;;  %v7950_v0 = vrot.slane %v3829_v1, 5  ;;  %v3835_v40 = vrot.slane %v3833_v43, 4 }
 0x101   : > { %v8953_v48 = vcombine.low %v7658_v58, %v7662_v18  ;;  %v3846_v28 = vrot.slane %v3844_v17, 4  ;;  %v3849_v8 = vrot.slane %v3847_v39, 5  ;;  %v3870_v2 = vrot.slane %v3868_v15, 4 }
 0x102   : > { %v3873_v1 = vrot.slane %v3871_v60, 5  ;;  %v7965_v43 = vrot.slane %v3877_v47, 5  ;;  %v3883_v55 = vrot.slane %v3881_v24, 4  ;;  %v3894_v62 = vrot.slane %v3892_v29, 4 }
 0x103   : > { %6118 = vmatmul.mubr.msk.bf16.gmra.mrb[28].mxu0 %vm720_vm4, %v6563_v3  ;;  %v7963_v3 = vld [vmem:[%s6842_s12 + $0x8c] sm:$0x1]  ;;  %v3897_v37 = vrot.slane %v3895_v49, 5  ;;  %v7967_v58 = vrot.slane %v3901_v45, 5  ;;  %v3907_v18 = vrot.slane %v3905_v20, 4  ;;  %v3826_v17 = vor.u32 %v3825_v23, %v3822_v32 }
 0x104   : > { %5966 = vmatmul.mubr.msk.bf16.gmra.mrb[12].mxu1 %vm720_vm4, %v8952_v14  ;;  %6123 = vmatprep.mubr.msk.bf16.mxu0 %vm720_vm4, %v7722_v53  ;;  %v7959_v53 = vrot.slane %v3853_v11, 5  ;;  %v3859_v14 = vrot.slane %v3857_v36, 4  ;;  %v3839_v39 = vshll.u32 %v7936_v30, 16  ;;  %v7974_v11 = vld [vmem:[%s6842_s12 + $0x98] sm:$0x1]  ;;  %v3916_v36 = vshrl.u32 %v5609_v59, 16 }
 0x105   : > { %5969 = vmatprep.mubr.msk.bf16.mxu1 %vm720_vm4, %v8953_v48  ;;  %v7970_v48 = vld [vmem:[%s6842_s12 + $0xa0] sm:$0xf]  ;;  %v3919_v19 = vshll.u32 %v5609_v59, 16  ;;  %v3836_v15 = vor.u32 %v3835_v40, %v7950_v0  ;;  %v3850_v60 = vor.u32 %v3849_v8, %v3846_v28  ;;  %v3863_v24 = vshll.u32 %v7953_v16, 16 }
 0x106   : > { %v3860_v47 = vor.u32 %v3859_v14, %v7959_v53  ;;  %v3874_v29 = vor.u32 %v3873_v1, %v3870_v2  ;;  %v3887_v49 = vshll.u32 %v7963_v3, 16  ;;  %v3925_v45 = vshll.u32 %v7970_v48, 16 }
 0x107   : > { %v3929_v32 = vshrl.u32 %v7970_v48, 16  ;;  %v3884_v20 = vor.u32 %v3883_v55, %v7965_v43  ;;  %v3898_v59 = vor.u32 %v3897_v37, %v3894_v62  ;;  %v3908_v40 = vor.u32 %v3907_v18, %v7967_v58  ;;  %v5612_v55 = vld [vmem:[%s6842_s12 + $0xa8] sm:$0xf] }
 0x108   : > { %v3911_v23 = vshll.u32 %v7974_v11, 16  ;;  %v8954_v28 = vcombine.low %v7666_v63, %v7674_v27  ;;  %v3827_v8 = vrot.slane %v3826_v17, 4  ;;  %v3841_v14 = vrot.slane %v3839_v39, 5 }
 0x109   : > { %v3918_v2 = vrot.slane %v3916_v36, 4  ;;  %v3921_v1 = vrot.slane %v3919_v19, 5  ;;  %v3837_v37 = vrot.slane %v3836_v15, 4  ;;  %v3851_v63 = vrot.slane %v3850_v60, 4  ;;  %v8009_v60 = vld [vmem:[%s6842_s12 + $0xac] sm:$0xf] }
 0x10a   : > { %v3861_v27 = vrot.slane %v3860_v47, 4  ;;  %v3865_v62 = vrot.slane %v3863_v24, 5  ;;  %v3889_v18 = vrot.slane %v3887_v49, 5  ;;  %v7999_v17 = vrot.slane %v3925_v45, 5 }
 0x10b   : > { %6124 = vmatmul.mubr.msk.bf16.vlgmr.msra.gmra.mrb[0].mxu0 %vm720_vm4, %v7724_v54  ;;  %v8955_v54 = vcombine.low %v7685_v13, %v7698_v10  ;;  %v3931_v19 = vrot.slane %v3929_v32, 4  ;;  %v3885_v39 = vrot.slane %v3884_v20, 4  ;;  %v3899_v36 = vrot.slane %v3898_v59, 4 }
 0x10c   : > { %5970 = vmatmul.mubr.msk.bf16.gmra.mrb[16].mxu1 %vm720_vm4, %v8954_v28  ;;  %6156 = vmatpush3.bf16.msra.mxu0 %v7711_v42  ;;  %v3875_v42 = vrot.slane %v3874_v29, 4  ;;  %v3909_v13 = vrot.slane %v3908_v40, 4  ;;  %v3913_v10 = vrot.slane %v3911_v23, 5  ;;  %v8002_v28 = vld [vmem:[%s6842_s12 + $0xa4] sm:$0x1]  ;;  %v3922_v15 = vor.u32 %v3921_v1, %v3918_v2 }
 0x10d   : > { %5973 = vmatprep.mubr.msk.bf16.mxu1 %vm720_vm4, %v8955_v54  ;;  %6127 = vmatprep.mubr.msk.bf16.mxu0 %vm720_vm4, %v7793_v35  ;;  %v3818_v35 = vsel %vm6886_vm3, %v7914_v57, %v7916_v21  ;;  %v3940_v47 = vshrl.u32 %v5612_v55, 16  ;;  %v3943_v24 = vshll.u32 %v5612_v55, 16  ;;  %v8956_v29 = vrot.slane %v7285_v52, 5  ;;  %v8043_v40 = vld [vmem:[%s6842_s12 + $0xb0] sm:$0x1] }
 0x10e   : > { %v3832_v45 = vsel %vm6886_vm3, %v3827_v8, %v7950_v0  ;;  %v3842_v57 = vsel %vm6886_vm3, %v3837_v37, %v3841_v14  ;;  %v3856_v21 = vsel %vm6886_vm3, %v3851_v63, %v7959_v53  ;;  %v3866_v32 = vsel %vm6886_vm3, %v3861_v27, %v3865_v62  ;;  %v8054_v2 = vld [vmem:[%s6842_s12 + $0xb4] sm:$0xf]  ;;  %v5661_v63 = vld [vmem:[%s6842_s12 + $0x48] sm:$0xe] }
 0x10f   : > { %v8016_v49 = vsel %vm7116_vm7, %v7924_v5, %v8956_v29  ;;  %v3880_v52 = vsel %vm6886_vm3, %v3875_v42, %v7965_v43  ;;  %v3932_v5 = vor.u32 %v3931_v19, %v7999_v17  ;;  %v3935_v20 = vshll.u32 %v8002_v28, 16 }
 0x110   : > { %v3890_v0 = vsel %vm6886_vm3, %v3885_v39, %v3889_v18  ;;  %v3904_v53 = vsel %vm6886_vm3, %v3899_v36, %v7967_v58  ;;  %v3914_v59 = vsel %vm6886_vm3, %v3909_v13, %v3913_v10  ;;  %v3949_v43 = vshll.u32 %v8009_v60, 16 }
 0x111   : > { %v8957_v23 = vcombine.low %v7732_v38, %v7749_v50  ;;  %v3942_v8 = vrot.slane %v3940_v47, 4  ;;  %v3945_v58 = vrot.slane %v3943_v24, 5  ;;  %v3953_v14 = vshrl.u32 %v8009_v60, 16  ;;  %v5663_v47 = vld [vmem:[%s6842_s12 + $0x60] sm:$0xe] }
 0x112   : > { %v8958_v1 = vcombine.low %v7838_v46, %v7842_v4  ;;  %v5282_v38 = vcombine.low %v7895_v25, %v7905_v7  ;;  %v8959_v50 = vsel %vm6886_vm3, %v7907_v51, %v7826_v56  ;;  %v5283_v54 = vcombine.low %v7922_v44, %v8016_v49  ;;  %v5662_v25 = vld [vmem:[%s6842_s12 + $0x54] sm:$0xe]  ;;  %v8083_v51 = vld [vmem:[%s6842_s12 + $0xb8] sm:$0xf]  ;;  %v8966_v49 = vld [vmem:[#allocation9_spill] sm:$0xff] }
 0x113   : > { %6128 = vmatmul.mubr.msk.bf16.gmra.mrb[4].mxu0 %vm720_vm4, %v7887_v6  ;;  %v3923_v6 = vrot.slane %v3922_v15, 4  ;;  %v8069_v37 = vcombine.low %v3832_v45, %v3842_v57  ;;  %v8072_v27 = vcombine.low %v3856_v21, %v3866_v32  ;;  %v3933_v46 = vrot.slane %v3932_v5, 4  ;;  %v5664_v32 = vld [vmem:[%s6842_s12 + $0x6c] sm:$0xe] }
 0x114   : > { %5974 = vmatmul.mubr.msk.bf16.gmra.mrb[20].mxu1 %vm720_vm4, %v8957_v23  ;;  %6131 = vmatprep.mubr.msk.bf16.mxu0 %vm720_vm4, %v7889_v26  ;;  %v5631_v26 = vcombine.low %v8959_v50, %v3818_v35  ;;  %v3937_v4 = vrot.slane %v3935_v20, 5  ;;  %v3959_v62 = vshll.u32 %v8043_v40, 16  ;;  %v8076_v7 = vcombine.low %v3880_v52, %v3890_v0  ;;  %v8960_v52 = vld [vmem:[#allocation16_spill] sm:$0xff] }
 0x115   : > { %5977 = vmatprep.mubr.msk.bf16.mxu1 %vm720_vm4, %v8958_v1  ;;  %v8078_v55 = vcombine.low %v3904_v53, %v3914_v59  ;;  %v8080_v56 = vrot.slane %v3949_v43, 5  ;;  %v3964_v42 = vshrl.u32 %v8054_v2, 16  ;;  %v3928_v18 = vsel %vm6886_vm3, %v3923_v6, %v7999_v17  ;;  %v8962_v53 = vld [vmem:[#allocation14_spill] sm:$0xff]  ;;  %v8963_v43 = vld [vmem:[#allocation15_spill] sm:$0xff]  ;;  %v8129_v6 = vld [vmem:[%s6842_s12 + $0xbc] sm:$0x1] }
 0x116   : > { %v3946_v19 = vor.u32 %v3945_v58, %v3942_v8  ;;  %v3955_v39 = vrot.slane %v3953_v14, 4  ;;  %v3967_v36 = vshll.u32 %v8054_v2, 16  ;;  %v5677_v13 = vrot.slane %v5661_v63, 9  ;;  %v8964_v2 = vld [vmem:[#allocation17_spill] sm:$0xff] }
 0x117   : > { %v4423_v10 = vrot.slane %v7719_v41, 5  ;;  %v4426_v35 = vrot.slane %v7773_v61, 5  ;;  %v5678_v15 = vrot.slane %v5662_v25, 9  ;;  %v3938_v24 = vsel %vm6886_vm3, %v3933_v46, %v3937_v4  ;;  %v8150_v25 = vld [vmem:[%s6842_s12 + $0xc4] sm:$0xf] }
 0x118   : > { %v8095_v29 = vrot.slane %v3959_v62, 5  ;;  %v3973_v45 = vshll.u32 %v8083_v51, 16  ;;  %v4430_v17 = vrot.slane %v7737_v33, 5  ;;  %v8101_v57 = vrot.slane %v3964_v42, 4 }
 0x119   : > { %v8105_v41 = vsel %vm7116_vm7, %v5677_v13, %v4423_v10  ;;  %v4425_v61 = vrot.slane %v4423_v10, 4  ;;  %v4433_v21 = vrot.slane %v7783_v9, 5  ;;  %v8961_v5 = vcombine.low %v7852_v12, %v8960_v52  ;;  %v5666_v52 = vld [vmem:[%s6842_s12 + $0x84] sm:$0xe] }
 0x11a   : > { %v8114_v33 = vrot.slane %v3946_v19, 4  ;;  %v4432_v20 = vrot.slane %v4430_v17, 4  ;;  %v5679_v0 = vrot.slane %v5663_v47, 9  ;;  %v3956_v9 = vor.u32 %v3955_v39, %v8080_v56  ;;  %v6564_v39 = vld [vmem:[%s6842_s12 + $0xc] sm:$0xff]  }
 0x11b   : > { %6132 = vmatmul.mubr.msk.bf16.gmra.mrb[8].mxu0 %vm720_vm4, %v7901_v34  ;;  %v8118_v34 = vsel %vm7116_vm7, %v5678_v15, %v4430_v17  ;;  %v8124_v12 = vsel %vm7116_vm7, %v4425_v61, %v4426_v35  ;;  %v4437_v59 = vrot.slane %v8962_v53, 5  ;;  %v4440_v23 = vrot.slane %v8963_v43, 5  ;;  %v5665_v35 = vld [vmem:[%s6842_s12 + $0x78] sm:$0xe] }
 0x11c   : > { %5978 = vmatmul.mubr.msk.bf16.gmra.mrb[24].mxu1 %vm720_vm4, %v8961_v5  ;;  %6135 = vmatprep.mubr.msk.bf16.mxu0 %vm720_vm4, %v5631_v26  ;;  %v5694_v8 = vcombine.low %v8105_v41, %v8124_v12  ;;  %v8135_v58 = vsel %vm7116_vm7, %v4432_v20, %v4433_v21  ;;  %v5680_v14 = vrot.slane %v5664_v32, 9  ;;  %v4444_v1 = vrot.slane %v8964_v2, 5 }
 0x11d   : > { %5981 = vmatprep.mubr.msk.bf16.mxu1 %vm720_vm4, %v5282_v38  ;;  %v5618_v38 = vld [vmem:[%s6842_s12 + $0xc0] sm:$0xf]  ;;  %v5695_v50 = vcombine.low %v8118_v34, %v8135_v58  ;;  %v8143_v26 = vsel %vm7116_vm7, %v5679_v0, %v4437_v59  ;;  %v4439_v63 = vrot.slane %v4437_v59, 4  ;;  %v4447_v46 = vrot.slane %v7936_v30, 5  ;;  %v6627_v58 = vld [vmem:[%s6842_s12 + $0x8c] sm:$0x1] }
 0x11e   : > { %v8146_v4 = vcombine.low %v3928_v18, %v3938_v24  ;;  %v3977_v62 = vshrl.u32 %v8083_v51, 16  ;;  %v8154_v42 = vsel %vm7116_vm7, %v5680_v14, %v4444_v1  ;;  %v4446_v19 = vrot.slane %v4444_v1, 4  ;;  %v5621_v1 = vld [vmem:[%s6842_s12 + $0xcc] sm:$0xf] }
 0x11f   : > { %v8157_v13 = vrot.slane %v3967_v36, 5  ;;  %v8159_v10 = vrot.slane %v3973_v45, 5  ;;  %v3983_v30 = vshll.u32 %v8129_v6, 16  ;;  %v8164_v18 = vsel %vm7116_vm7, %v4439_v63, %v4440_v23  ;;  %v5392_v45 = vld [vmem:[%s6842_s12 + $0x78] sm:$0xf] }
 0x120   : > { %v3952_v15 = vsel %vm6886_vm3, %v8114_v33, %v8080_v56  ;;  %v3988_v47 = vshrl.u32 %v5618_v38, 16  ;;  %v5696_v24 = vcombine.low %v8143_v26, %v8164_v18  ;;  %v8175_v36 = vsel %vm7116_vm7, %v4446_v19, %v4447_v46  ;;  %v8968_v46 = vld [vmem:[#allocation19_spill] sm:$0xff] }
 0x121   : > { %v3957_v17 = vrot.slane %v3956_v9, 4  ;;  %v3991_v61 = vshll.u32 %v5618_v38, 16  ;;  %v3997_v21 = vshll.u32 %v8150_v25, 16  ;;  %v5697_v32 = vcombine.low %v8154_v42, %v8175_v36  ;;  %v6565_v19 = vld [vmem:[%s6842_s12 + $0x18] sm:$0xff]   ;;  %v6630_v36 = vld [vmem:[%s6842_s12 + $0xac] sm:$0xf] }
 0x122   : > { %v3979_v5 = vrot.slane %v3977_v62, 4  ;;  %v5681_v20 = vrot.slane %v5665_v35, 9  ;;  %v4454_v9 = vrot.slane %v7953_v16, 5  ;;  %v4001_v53 = vshrl.u32 %v8150_v25, 16 }
 0x123   : > { %6136 = vmatmul.mubr.msk.bf16.gmra.mrb[12].mxu0 %vm720_vm4, %v8069_v37  ;;  %v8965_v37 = vld [vmem:[#allocation18_spill] sm:$0xff]  ;;  %v2310_v59 = vshrl.u32 %v5392_v45, 16  ;;  %v2313_v44 = vshll.u32 %v5392_v45, 16  ;;  %v5682_v16 = vrot.slane %v5666_v52, 9  ;;  %v3993_v2 = vrot.slane %v3991_v61, 5 }
 0x124   : > { %5982 = vmatmul.mubr.msk.bf16.gmra.mrb[28].mxu1 %vm720_vm4, %v5283_v54  ;;  %6139 = vmatprep.mubr.msk.bf16.mxu0 %vm720_vm4, %v8072_v27  ;;  %v4451_v0 = vrot.slane %v8965_v37, 5  ;;  %v8967_v54 = vld [vmem:[#allocation10_spill] sm:$0xff]  ;;  %v3990_v27 = vrot.slane %v3988_v47, 4  ;;  %v4458_v62 = vrot.slane %v8968_v46, 5  ;;  %v8207_v35 = vrot.slane %v3997_v21, 5 }
 0x125   : > { %5987 = vmatprep.mubr.msk.bf16.mxu1 %vm720_vm4, %v6564_v39  ;;  %v2332_v43 = vsel %vm6886_vm3, %v8967_v54, %v8966_v49  ;;  %v2312_v38 = vrot.slane %v2310_v59, 4  ;;  %v2315_v63 = vrot.slane %v2313_v44, 5  ;;  %v3970_v39 = vor.u32 %v8157_v13, %v8101_v57  ;;  %v8210_v47 = vld [vmem:[%s6842_s12 + $0xd0] sm:$0xf]  ;;  %v6566_v52 = vld [vmem:[%s6842_s12 + $0x24] sm:$0xff]  }
 0x126   : > { %v8200_v23 = vsel %vm7116_vm7, %v5681_v20, %v4451_v0  ;;  %v4453_v14 = vrot.slane %v4451_v0, 4  ;;  %v4461_v61 = vrot.slane %v7963_v3, 5  ;;  %v3962_v20 = vsel %vm6886_vm3, %v3957_v17, %v8095_v29  ;;  %v5667_v13 = vld [vmem:[%s6842_s12 + $0x90] sm:$0xe]  ;;  %v8226_v59 = vld [vmem:[%s6842_s12 + $0xc8] sm:$0x1] }
 0x127   : > { %v4003_v37 = vrot.slane %v4001_v53, 4  ;;  %v2316_v57 = vor.u32 %v2315_v63, %v2312_v38  ;;  %v3980_v21 = vor.u32 %v3979_v5, %v8159_v10  ;;  %v4012_v44 = vshrl.u32 %v5621_v1, 16  ;;  %v8971_v38 = vld [vmem:[#allocation8_spill] sm:$0xff] }
 0x128   : > { %v8214_v45 = vsel %vm7116_vm7, %v4453_v14, %v4454_v9  ;;  %v8230_v9 = vsel %vm7116_vm7, %v5682_v16, %v4458_v62  ;;  %v4460_v3 = vrot.slane %v4458_v62, 4  ;;  %v3994_v29 = vor.u32 %v3993_v2, %v3990_v27  ;;  %v8970_v16 = vld [vmem:[#allocation7_spill] sm:$0xff] }
 0x129   : > { %v5698_v0 = vcombine.low %v8200_v23, %v8214_v45  ;;  %v4015_v17 = vshll.u32 %v5621_v1, 16  ;;  %v4021_v53 = vshll.u32 %v8210_v47, 16  ;;  %v2317_v49 = vrot.slane %v2316_v57, 4  ;;  %v8264_v57 = vld [vmem:[%s6842_s12 + $0xd4] sm:$0x1] }
 0x12a   : > { %v4025_v5 = vshrl.u32 %v8210_v47, 16  ;;  %v8241_v54 = vsel %vm7116_vm7, %v4460_v3, %v4461_v61  ;;  %v5683_v14 = vrot.slane %v5667_v13, 9  ;;  %v4004_v2 = vor.u32 %v4003_v37, %v8207_v35  ;;  %v6631_v45 = vld [vmem:[%s6842_s12 + $0xb8] sm:$0xf] }
 0x12b   : > { %6140 = vmatmul.mubr.msk.bf16.gmra.mrb[16].mxu0 %vm720_vm4, %v8076_v7  ;;  %v8969_v7 = vld [vmem:[#allocation20_spill] sm:$0xff]  ;;  %v4007_v1 = vshll.u32 %v8226_v59, 16  ;;  %v5699_v63 = vcombine.low %v8230_v9, %v8241_v54  ;;  %v5637_v46 = vcombine.low %v3952_v15, %v3962_v20  ;;  %v3971_v62 = vrot.slane %v3970_v39, 4 }
 0x12c   : > { %5988 = vmatmul.mubr.msk.bf16.vlgmr.msra.gmra.mrb[0].mxu1 %vm720_vm4, %v6565_v19  ;;  %6143 = vmatprep.mubr.msk.bf16.mxu0 %vm720_vm4, %v8078_v55  ;;  %v4465_v27 = vrot.slane %v8969_v7, 5  ;;  %v2322_v55 = vsel %vm6886_vm3, %v2317_v49, %v8971_v38  ;;  %v3985_v19 = vrot.slane %v3983_v30, 5  ;;  %v3981_v37 = vrot.slane %v3980_v21, 4  ;;  %v5668_v20 = vld [vmem:[%s6842_s12 + $0x9c] sm:$0xe] }
 0x12d   : > { %6190 = vmatpush3.bf16.msra.mxu1 %v8970_v16  ;;  %5991 = vmatprep.mubr.msk.bf16.mxu1 %vm720_vm4, %v6566_v52  ;;  %v8260_v61 = vcombine.low %v2322_v55, %v2332_v43  ;;  %v6567_v52 = vld [vmem:[%s6842_s12 + $0x30] sm:$0xff]   ;;  %v4468_v49 = vrot.slane %v7974_v11, 5  ;;  %v4014_v56 = vrot.slane %v4012_v44, 4  ;;  %v4017_v33 = vrot.slane %v4015_v17, 5  ;;  %v6568_v30 = vld [vmem:[%s6842_s12 + $0x3c] sm:$0xff]  }
 0x12e   : > { %v8268_v13 = vsel %vm7116_vm7, %v5683_v14, %v4465_v27  ;;  %v4467_v3 = vrot.slane %v4465_v27, 4  ;;  %v8271_v15 = vrot.slane %v4021_v53, 5  ;;  %v4027_v39 = vrot.slane %v4025_v5, 4  ;;  %v6617_v38 = vld [vmem:[%s6842_s12 + $0x1c] sm:$0xf] }
 0x12f   : > { %v3995_v43 = vrot.slane %v3994_v29, 4  ;;  %v4005_v7 = vrot.slane %v4004_v2, 4  ;;  %v4009_v21 = vrot.slane %v4007_v1, 5  ;;  %v3976_v11 = vsel %vm6886_vm3, %v3971_v62, %v8159_v10  ;;  %v5669_v62 = vld [vmem:[%s6842_s12 + $0xa8] sm:$0xe] }
 0x130   : > { %v8277_v16 = vsel %vm7116_vm7, %v4467_v3, %v4468_v49  ;;  %v3986_v44 = vsel %vm6886_vm3, %v3981_v37, %v3985_v19  ;;  %v4031_v29 = vshll.u32 %v8264_v57, 16  ;;  %v5684_v17 = vrot.slane %v5668_v20, 9  ;;  %v6569_v37 = vld [vmem:[%s6842_s12 + $0x48] sm:$0xff]   ;;  %v6618_v20 = vld [vmem:[%s6842_s12 + $0x20] sm:$0x1] }
 0x131   : > { %v5700_v14 = vcombine.low %v8268_v13, %v8277_v16  ;;  %v4018_v53 = vor.u32 %v4017_v33, %v4014_v56  ;;  %v4028_v5 = vor.u32 %v4027_v39, %v8271_v15  ;;  %v4472_v27 = vrot.slane %v7970_v48, 5  ;;  %v6570_v33 = vld [vmem:[%s6842_s12 + $0x54] sm:$0xff]  }
 0x132   : > { %v4475_v10 = vrot.slane %v8002_v28, 5  ;;  %v4000_v2 = vsel %vm6886_vm3, %v3995_v43, %v8207_v35  ;;  %v4010_v1 = vsel %vm6886_vm3, %v4005_v7, %v4009_v21  ;;  %v4395_v55 = vrot.slane %v6617_v38, 5  ;;  %v5659_v38 = vld [vmem:[%s6842_s12 + $0x30] sm:$0xe] }
 0x133   : > { %6144 = vmatmul.mubr.msk.bf16.gmra.mrb[20].mxu0 %vm720_vm4, %v8146_v4  ;;  %v5657_v4 = vld [vmem:[%s6842_s12 + $0x18] sm:$0xe]  ;;  %v4474_v48 = vrot.slane %v4472_v27, 4  ;;  %v5638_v28 = vcombine.low %v3976_v11, %v3986_v44  ;;  %v4033_v19 = vrot.slane %v4031_v29, 5  ;;  %v5639_v3 = vcombine.low %v4000_v2, %v4010_v1  ;;  %v5658_v11 = vld [vmem:[%s6842_s12 + $0x24] sm:$0xe] }
 0x134   : > { %5992 = vmatmul.mubr.msk.bf16.gmra.mrb[4].mxu1 %vm720_vm4, %v6567_v52  ;;  %6147 = vmatprep.mubr.msk.bf16.mxu0 %vm720_vm4, %v5637_v46  ;;  %v8304_v46 = vsel %vm7116_vm7, %v5684_v17, %v4472_v27  ;;  %v5673_v52 = vrot.slane %v5657_v4, 9  ;;  %v4019_v35 = vrot.slane %v4018_v53, 4  ;;  %v4029_v49 = vrot.slane %v4028_v5, 4  ;;  %v6619_v44 = vld [vmem:[%s6842_s12 + $0x28] sm:$0xf] }
 0x135   : > { %5995 = vmatprep.mubr.msk.bf16.mxu1 %vm720_vm4, %v6568_v30  ;;  %v8310_v56 = vsel %vm7116_vm7, %v4474_v48, %v4475_v10  ;;  %v4397_v39 = vrot.slane %v4395_v55, 4  ;;  %v4398_v30 = vrot.slane %v6618_v20, 5  ;;  %v5685_v7 = vrot.slane %v5669_v62, 9  ;;  %v6620_v10 = vld [vmem:[%s6842_s12 + $0x34] sm:$0xf] }
 0x136   : > { %v5701_v43 = vcombine.low %v8304_v46, %v8310_v56  ;;  %v4479_v21 = vrot.slane %v8009_v60, 5  ;;  %v4402_v29 = vrot.slane %v6619_v44, 5  ;;  %v4482_v17 = vrot.slane %v8043_v40, 5  ;;  %v5670_v2 = vld [vmem:[%s6842_s12 + $0xb4] sm:$0xe] }
 0x137   : > { %v4024_v53 = vsel %vm6886_vm3, %v4019_v35, %v8271_v15  ;;  %v4034_v60 = vsel %vm6886_vm3, %v4029_v49, %v4033_v19  ;;  %v4396_v40 = vsel %vm7116_vm7, %v5673_v52, %v4395_v55  ;;  %v4399_v27 = vsel %vm7116_vm7, %v4397_v39, %v4398_v30  ;;  %v6621_v19 = vld [vmem:[%s6842_s12 + $0x2c] sm:$0x1]  ;;  %v6571_v52 = vld [vmem:[%s6842_s12 + $0x60] sm:$0xff]   ;;  %v6635_v46 = vld [vmem:[%s6842_s12 + $0xc8] sm:$0x1] }
 0x138   : > { %v8330_v5 = vsel %vm7116_vm7, %v5685_v7, %v4479_v21  ;;  %v4481_v4 = vrot.slane %v4479_v21, 4  ;;  %v4409_v15 = vrot.slane %v6620_v10, 5  ;;  %v5674_v1 = vrot.slane %v5658_v11, 9  ;;  %v6572_v39 = vld [vmem:[%s6842_s12 + $0x6c] sm:$0xff]   ;;  %v8973_v11 = vld [vmem:[#allocation12_spill] sm:$0xff] }
 0x139   : > { %v5640_v62 = vcombine.low %v4024_v53, %v4034_v60  ;;  %v5686_v35 = vrot.slane %v5670_v2, 9  ;;  %v4486_v49 = vrot.slane %v8083_v51, 5  ;;  %v5675_v20 = vrot.slane %v5659_v38, 9  ;;  %v8972_v7 = vld [vmem:[#allocation11_spill] sm:$0xff]  ;;  %v5671_v60 = vld [vmem:[%s6842_s12 + $0xc0] sm:$0xe] }
 0x13a   : > { %v8342_v48 = vsel %vm7116_vm7, %v4481_v4, %v4482_v17  ;;  %v4411_v30 = vrot.slane %v4409_v15, 4  ;;  %v4412_v21 = vrot.slane %v8972_v7, 5  ;;  %v4416_v44 = vrot.slane %v8973_v11, 5  ;;  %v5660_v4 = vld [vmem:[%s6842_s12 + $0x3c] sm:$0xe] }
 0x13b   : > { %6148 = vmatmul.mubr.msk.bf16.gmra.mrb[24].mxu0 %vm720_vm4, %v5638_v28  ;;  %v4404_v28 = vrot.slane %v4402_v29, 4  ;;  %v5702_v55 = vcombine.low %v8330_v5, %v8342_v48  ;;  %v8355_v17 = vsel %vm7116_vm7, %v5686_v35, %v4486_v49  ;;  %v4488_v53 = vrot.slane %v4486_v49, 4  ;;  %v5389_v35 = vld [vmem:[%s6842_s12 + $0x6c] sm:$0xf]  ;;  %v6622_v11 = vld [vmem:[%s6842_s12 + $0x70] sm:$0xf] }
 0x13c   : > { %5996 = vmatmul.mubr.msk.bf16.gmra.mrb[8].mxu1 %vm720_vm4, %v6569_v37  ;;  %6151 = vmatprep.mubr.msk.bf16.mxu0 %vm720_vm4, %v5639_v3  ;;  %v4405_v37 = vrot.slane %v6621_v19, 5  ;;  %v5690_v3 = vcombine.low %v4396_v40, %v4399_v27  ;;  %v4403_v51 = vsel %vm7116_vm7, %v5674_v1, %v4402_v29  ;;  %v4410_v27 = vsel %vm7116_vm7, %v5675_v20, %v4409_v15  ;;  %v5672_v20 = vld [vmem:[%s6842_s12 + $0xcc] sm:$0xe] }
 0x13d   : > { %5999 = vmatprep.mubr.msk.bf16.mxu1 %vm720_vm4, %v6570_v33  ;;  %v4489_v33 = vrot.slane %v8129_v6, 5  ;;  %v4413_v10 = vsel %vm7116_vm7, %v4411_v30, %v4412_v21  ;;  %v5687_v2 = vrot.slane %v5671_v60, 9  ;;  %v5676_v1 = vrot.slane %v5660_v4, 9 }
 0x13e   : > { %v4406_v6 = vsel %vm7116_vm7, %v4404_v28, %v4405_v37  ;;  %v4418_v38 = vrot.slane %v4416_v44, 4  ;;  %v4493_v19 = vrot.slane %v8150_v25, 5  ;;  %v5692_v15 = vcombine.low %v4410_v27, %v4413_v10 }
 0x13f   : > { %v8368_v40 = vsel %vm7116_vm7, %v4488_v53, %v4489_v33  ;;  %v5691_v37 = vcombine.low %v4403_v51, %v4406_v6  ;;  %v4417_v30 = vsel %vm7116_vm7, %v5676_v1, %v4416_v44  ;;  %v2289_v21 = vshll.u32 %v5389_v35, 16 }
 0x140   : > { %v5703_v29 = vcombine.low %v8355_v17, %v8368_v40  ;;  %v8384_v49 = vsel %vm7116_vm7, %v5687_v2, %v4493_v19  ;;  %v4495_v33 = vrot.slane %v4493_v19, 4  ;;  %v2295_v53 = vshll.u32 %v6622_v11, 16 }
 0x141   : > { %v2299_v44 = vshrl.u32 %v6622_v11, 16  ;;  %v5688_v4 = vrot.slane %v5672_v20, 9  ;;  %v4500_v51 = vrot.slane %v8210_v47, 5  ;;  %v4503_v6 = vrot.slane %v8264_v57, 5  ;;  %v5395_v57 = vld [vmem:[%s6842_s12 + $0x84] sm:$0xf] }
 0x142   : > { %v6624_v20 = vld [vmem:[%s6842_s12 + $0x88] sm:$0xf]  ;;  %v2473_v56 = vshll.u32 %v6635_v46, 16 }
 0x143   : > { %6152 = vmatmul.mubr.msk.bf16.gmra.mrb[28].mxu0 %vm720_vm4, %v5640_v62  ;;  %v8974_v62 = vld [vmem:[#allocation13_spill] sm:$0xff]  ;;  %v8407_v27 = vsel %vm7116_vm7, %v5688_v4, %v4500_v51  ;;  %v4502_v10 = vrot.slane %v4500_v51, 4  ;;  %v2301_v19 = vrot.slane %v2299_v44, 4  ;;  %v5401_v44 = vld [vmem:[%s6842_s12 + $0x9c] sm:$0xf]  ;;  %v6578_v4 = vld [vmem:[%s6842_s12 + $0xb4] sm:$0xff]  }
 0x144   : > { %6000 = vmatmul.mubr.msk.bf16.gmra.mrb[12].mxu1 %vm720_vm4, %v6571_v52  ;;  %6157 = vmatprep.mubr.msk.bf16.mxu0 %vm720_vm4, %v5690_v3  ;;  %v4419_v28 = vrot.slane %v8974_v62, 5  ;;  %v4496_v52 = vrot.slane %v8226_v59, 5  ;;  %v6573_v3 = vld [vmem:[%s6842_s12 + $0x78] sm:$0xff]   ;;  %v2286_v59 = vshrl.u32 %v5389_v35, 16  ;;  %v2291_v62 = vrot.slane %v2289_v21, 5  ;;  %v6577_v21 = vld [vmem:[%s6842_s12 + $0xa8] sm:$0xff]  }
 0x145   : > { %6003 = vmatprep.mubr.msk.bf16.mxu1 %vm720_vm4, %v6572_v39  ;;  %v6574_v39 = vld [vmem:[%s6842_s12 + $0x84] sm:$0xff]   ;;  %v8412_v47 = vsel %vm7116_vm7, %v4502_v10, %v4503_v6 }
 0x146   : > { %v4420_v25 = vsel %vm7116_vm7, %v4418_v38, %v4419_v28  ;;  %v8394_v7 = vsel %vm7116_vm7, %v4495_v33, %v4496_v52  ;;  %v2288_v1 = vrot.slane %v2286_v59, 4  ;;  %v6575_v38 = vld [vmem:[%s6842_s12 + $0x90] sm:$0xff]   ;;  %v2297_v28 = vrot.slane %v2295_v53, 5 }
 0x147   : > { %v5704_v60 = vcombine.low %v8384_v49, %v8394_v7  ;;  %v5693_v2 = vcombine.low %v4417_v30, %v4420_v25  ;;  %v5705_v52 = vcombine.low %v8407_v27, %v8412_v47  ;;  %v2334_v33 = vshrl.u32 %v5395_v57, 16  ;;  %v5398_v59 = vld [vmem:[%s6842_s12 + $0x90] sm:$0xf] }
 0x148   : > { %v2292_v22 = vor.u32 %v2291_v62, %v2288_v1  ;;  %v2302_v35 = vor.u32 %v2301_v19, %v2297_v28  ;;  %v2343_v30 = vshll.u32 %v6624_v20, 16  ;;  %v2347_v25 = vshrl.u32 %v6624_v20, 16  ;;  %v6625_v1 = vld [vmem:[%s6842_s12 + $0x94] sm:$0xf] }
 0x149   : > { %v2336_v12 = vrot.slane %v2334_v33, 4  ;;  %v2358_v10 = vshrl.u32 %v5398_v59, 16  ;;  %v2371_v62 = vshrl.u32 %v6625_v1, 16  ;;  %v2382_v19 = vshrl.u32 %v5401_v44, 16 }
 0x14a   : > { %v2293_v53 = vrot.slane %v2292_v22, 4  ;;  %v2303_v41 = vrot.slane %v2302_v35, 4  ;;  %v8431_v51 = vrot.slane %v2343_v30, 5  ;;  %v2349_v6 = vrot.slane %v2347_v25, 4 }
 0x14b   : > { %6158 = vmatmul.mubr.msk.bf16.vlgmr.msra.gmra.mrb[0].mxu0 %vm720_vm4, %v5691_v37  ;;  %v6576_v37 = vld [vmem:[%s6842_s12 + $0x9c] sm:$0xff]   ;;  %v2384_v20 = vrot.slane %v2382_v19, 4 }
 0x14c   : > { %6004 = vmatmul.mubr.msk.bf16.gmra.mrb[16].mxu1 %vm720_vm4, %v6573_v3  ;;  %6161 = vmatprep.mubr.msk.bf16.mxu0 %vm720_vm4, %v5692_v15  ;;  %v6623_v3 = vld [vmem:[%s6842_s12 + $0x74] sm:$0x1]  ;;  %v2298_v22 = vsel %vm6886_vm3, %v2293_v53, %v2297_v28  ;;  %v2350_v33 = vor.u32 %v2349_v6, %v8431_v51 }
 0x14d   : > { %6007 = vmatprep.mubr.msk.bf16.mxu1 %vm720_vm4, %v6574_v39  ;;  %v2305_v15 = vshll.u32 %v6623_v3, 16  ;;  %v2337_v39 = vshll.u32 %v5395_v57, 16  ;;  %v6626_v57 = vld [vmem:[%s6842_s12 + $0xa0] sm:$0xf] }
 0x14e   : > { %v2391_v3 = vshll.u32 %v6626_v57, 16 }
 0x14f   : > { %v2307_v11 = vrot.slane %v2305_v15, 5  ;;  %v2395_v15 = vshrl.u32 %v6626_v57, 16 }
 0x150   : > { %v8453_v28 = vrot.slane %v2391_v3, 5 }
 0x151   : > { %v2308_v34 = vsel %vm6886_vm3, %v2303_v41, %v2307_v11  ;;  %v2397_v25 = vrot.slane %v2395_v15, 4  ;;  %v2351_v41 = vrot.slane %v2350_v33, 4 }
 0x153   : > { %6162 = vmatmul.mubr.msk.bf16.gmra.mrb[4].mxu0 %vm720_vm4, %v5693_v2  ;;  %v2361_v2 = vshll.u32 %v5398_v59, 16  ;;  %v6579_v59 = vld [vmem:[%s6842_s12 + $0xc0] sm:$0xff]  }
 0x154   : > { %6008 = vmatmul.mubr.msk.bf16.gmra.mrb[20].mxu1 %vm720_vm4, %v6575_v38  ;;  %6165 = vmatprep.mubr.msk.bf16.mxu0 %vm720_vm4, %v5694_v8  ;;  %v2339_v8 = vrot.slane %v2337_v39, 5  ;;  %v2367_v38 = vshll.u32 %v6625_v1, 16  ;;  %v2360_v39 = vrot.slane %v2358_v10, 4  ;;  %v6629_v1 = vld [vmem:[%s6842_s12 + $0xa4] sm:$0x1] }
 0x155   : > { %6011 = vmatprep.mubr.msk.bf16.mxu1 %vm720_vm4, %v6576_v37  ;;  %v2385_v37 = vshll.u32 %v5401_v44, 16  ;;  %v2363_v26 = vrot.slane %v2361_v2, 5  ;;  %v2398_v2 = vor.u32 %v2397_v25, %v8453_v28 }
 0x156   : > { %v2340_v35 = vor.u32 %v2339_v8, %v2336_v12  ;;  %v8451_v18 = vrot.slane %v2367_v38, 5  ;;  %v6628_v8 = vld [vmem:[%s6842_s12 + $0x98] sm:$0x1]  ;;  %v2401_v38 = vshll.u32 %v6629_v1, 16 }
 0x157   : > { %v2387_v30 = vrot.slane %v2385_v37, 5  ;;  %v2364_v12 = vor.u32 %v2363_v26, %v2360_v39  ;;  %v2377_v44 = vshll.u32 %v6628_v8, 16  ;;  %v2419_v37 = vshrl.u32 %v6630_v36, 16 }
 0x158   : > { %v2341_v53 = vrot.slane %v2340_v35, 4  ;;  %v2399_v33 = vrot.slane %v2398_v2, 4  ;;  %v2403_v39 = vrot.slane %v2401_v38, 5  ;;  %v6634_v38 = vld [vmem:[%s6842_s12 + $0xbc] sm:$0x1] }
 0x159   : > { %v2388_v10 = vor.u32 %v2387_v30, %v2384_v20  ;;  %v2365_v15 = vrot.slane %v2364_v12, 4  ;;  %v2421_v30 = vrot.slane %v2419_v37, 4  ;;  %v2449_v13 = vshll.u32 %v6634_v38, 16 }
 0x15a   : > { %v2346_v57 = vsel %vm6886_vm3, %v2341_v53, %v8431_v51  ;;  %v5410_v53 = vld [vmem:[%s6842_s12 + $0xc0] sm:$0xf]  ;;  %v2404_v9 = vsel %vm6886_vm3, %v2399_v33, %v2403_v39 }
 0x15b   : > { %6166 = vmatmul.mubr.msk.bf16.gmra.mrb[8].mxu0 %vm720_vm4, %v5695_v50  ;;  %v2353_v50 = vshll.u32 %v6627_v58, 16  ;;  %v2443_v58 = vshrl.u32 %v6631_v45, 16  ;;  %v2389_v35 = vrot.slane %v2388_v10, 4 }
 0x15c   : > { %6012 = vmatmul.mubr.msk.bf16.gmra.mrb[24].mxu1 %vm720_vm4, %v6577_v21  ;;  %6169 = vmatprep.mubr.msk.bf16.mxu0 %vm720_vm4, %v5696_v24  ;;  %v2373_v24 = vrot.slane %v2371_v62, 4  ;;  %v5422_v21 = vcombine.low %v2298_v22, %v2308_v34  ;;  %v5407_v62 = vld [vmem:[%s6842_s12 + $0xb4] sm:$0xf]  ;;  %v2379_v22 = vrot.slane %v2377_v44, 5 }
 0x15d   : > { %6015 = vmatprep.mubr.msk.bf16.mxu1 %vm720_vm4, %v6578_v4  ;;  %v2355_v11 = vrot.slane %v2353_v50, 5  ;;  %v5404_v4 = vld [vmem:[%s6842_s12 + $0xa8] sm:$0xf]  ;;  %v2430_v34 = vshrl.u32 %v5407_v62, 16  ;;  %v2433_v23 = vshll.u32 %v5407_v62, 16  ;;  %v2394_v8 = vsel %vm6886_vm3, %v2389_v35, %v8453_v28 }
 0x15e   : > { %v2374_v6 = vor.u32 %v2373_v24, %v8451_v18  ;;  %v2406_v19 = vshrl.u32 %v5404_v4, 16  ;;  %v2409_v42 = vshll.u32 %v5404_v4, 16  ;;  %v2454_v4 = vshrl.u32 %v5410_v53, 16 }
 0x15f   : > { %v2356_v3 = vsel %vm6886_vm3, %v2351_v41, %v2355_v11  ;;  %v2432_v25 = vrot.slane %v2430_v34, 4  ;;  %v2445_v11 = vrot.slane %v2443_v58, 4  ;;  %v2370_v41 = vsel %vm6886_vm3, %v2365_v15, %v8451_v18  ;;  %v6632_v18 = vld [vmem:[%s6842_s12 + $0xb0] sm:$0x1] }
 0x160   : > { %v2375_v50 = vrot.slane %v2374_v6, 4  ;;  %v2408_v26 = vrot.slane %v2406_v19, 4  ;;  %v2411_v24 = vrot.slane %v2409_v42, 5  ;;  %v5424_v51 = vcombine.low %v2346_v57, %v2356_v3  ;;  %v6633_v6 = vld [vmem:[%s6842_s12 + $0xc4] sm:$0xf] }
 0x161   : > { %v2425_v44 = vshll.u32 %v6632_v18, 16  ;;  %v2457_v28 = vshll.u32 %v5410_v53, 16  ;;  %v2463_v10 = vshll.u32 %v6633_v6, 16  ;;  %v2467_v2 = vshrl.u32 %v6633_v6, 16 }
 0x162   : > { %v2380_v12 = vsel %vm6886_vm3, %v2375_v50, %v2379_v22  ;;  %v2412_v54 = vor.u32 %v2411_v24, %v2408_v26  ;;  %v2451_v22 = vrot.slane %v2449_v13, 5  ;;  %v2475_v35 = vrot.slane %v2473_v56, 5 }
 0x163   : > { %6170 = vmatmul.mubr.msk.bf16.gmra.mrb[12].mxu0 %vm720_vm4, %v5697_v32  ;;  %v2415_v32 = vshll.u32 %v6630_v36, 16  ;;  %v5425_v16 = vcombine.low %v2370_v41, %v2380_v12  ;;  %v2427_v42 = vrot.slane %v2425_v44, 5  ;;  %v2456_v36 = vrot.slane %v2454_v4, 4 }
 0x164   : > { %6016 = vmatmul.mubr.msk.bf16.gmra.mrb[28].mxu1 %vm720_vm4, %v6579_v59  ;;  %6173 = vmatprep.mubr.msk.bf16.mxu0 %vm720_vm4, %v5698_v0  ;;  %v2439_v0 = vshll.u32 %v6631_v45, 16  ;;  %v2435_v59 = vrot.slane %v2433_v23, 5  ;;  %v2413_v62 = vrot.slane %v2412_v54, 4  ;;  %v2465_v37 = vrot.slane %v2463_v10, 5 }
 0x165   : > { %6037 = vmatprep.mubr.msk.bf16.mxu1 %vm720_vm4, %v5422_v21  ;;  %v2417_v20 = vrot.slane %v2415_v32, 5  ;;  %v2459_v32 = vrot.slane %v2457_v28, 5  ;;  %v2469_v57 = vrot.slane %v2467_v2, 4 }
 0x166   : > { %v2441_v21 = vrot.slane %v2439_v0, 5 }
 0x167   : > { %v2418_v34 = vsel %vm6886_vm3, %v2413_v62, %v2417_v20  ;;  %v2460_v45 = vor.u32 %v2459_v32, %v2456_v36  ;;  %v2470_v0 = vor.u32 %v2469_v57, %v2465_v37 }
 0x168   : > { %v2446_v1 = vor.u32 %v2445_v11, %v2441_v21 }
 0x169   : > { %v2461_v58 = vrot.slane %v2460_v45, 4  ;;  %v2471_v50 = vrot.slane %v2470_v0, 4 }
 0x16a   : > { %v2447_v15 = vrot.slane %v2446_v1, 4 }
 0x16b   : > { %6174 = vmatmul.mubr.msk.bf16.gmra.mrb[16].mxu0 %vm720_vm4, %v5699_v63  ;;  %v2422_v63 = vor.u32 %v2421_v30, %v2417_v20  ;;  %v2466_v33 = vsel %vm6886_vm3, %v2461_v58, %v2465_v37  ;;  %v2476_v39 = vsel %vm6886_vm3, %v2471_v50, %v2475_v35 }
 0x16c   : > { %6038 = vmatmul.mubr.msk.bf16.vlgmr.msra.gmra.mrb[16].mxu1 %vm720_vm4, %v8260_v61  ;;  %6177 = vmatprep.mubr.msk.bf16.mxu0 %vm720_vm4, %v5700_v14  ;;  %v2436_v61 = vor.u32 %v2435_v59, %v2432_v25  ;;  %v5426_v14 = vcombine.low %v2394_v8, %v2404_v9  ;;  %v2452_v5 = vsel %vm6886_vm3, %v2447_v15, %v2451_v22 }
 0x16d   : > { %6041 = vmatprep.mubr.msk.bf16.mxu1 %vm720_vm4, %v5424_v51  ;;  %v2423_v19 = vrot.slane %v2422_v63, 4  ;;  %v5429_v26 = vcombine.low %v2466_v33, %v2476_v39 }
 0x16e   : > { %v2437_v3 = vrot.slane %v2436_v61, 4 }
 0x16f   : > { %v2428_v23 = vsel %vm6886_vm3, %v2423_v19, %v2427_v42 }
 0x170   : > { %v5427_v48 = vcombine.low %v2418_v34, %v2428_v23 }
 0x173   : > { %6178 = vmatmul.mubr.msk.bf16.gmra.mrb[20].mxu0 %vm720_vm4, %v5701_v43  ;;  %v2442_v43 = vsel %vm6886_vm3, %v2437_v3, %v2441_v21 }
 0x174   : > { %6042 = vmatmul.mubr.msk.bf16.gmra.mrb[20].mxu1 %vm720_vm4, %v5425_v16  ;;  %6181 = vmatprep.mubr.msk.bf16.mxu0 %vm720_vm4, %v5702_v55  ;;  %v5428_v55 = vcombine.low %v2442_v43, %v2452_v5 }
 0x175   : > { %6045 = vmatprep.mubr.msk.bf16.mxu1 %vm720_vm4, %v5426_v14 }
 0x17b   : > { %6182 = vmatmul.mubr.msk.bf16.gmra.mrb[24].mxu0 %vm720_vm4, %v5703_v29 }
 0x17c   : > { %6046 = vmatmul.mubr.msk.bf16.gmra.mrb[24].mxu1 %vm720_vm4, %v5427_v48  ;;  %6185 = vmatprep.mubr.msk.bf16.mxu0 %vm720_vm4, %v5704_v60 }
 0x17d   : > { %6049 = vmatprep.mubr.msk.bf16.mxu1 %vm720_vm4, %v5428_v55 }
 0x183   : > { %6186 = vmatmul.mubr.msk.bf16.gmra.mrb[28].mxu0 %vm720_vm4, %v5705_v52 }
 0x184   : > { %6050 = vmatmul.mubr.msk.bf16.gmra.mrb[28].mxu1 %vm720_vm4, %v5429_v26 }
 0x1ff   : > { %v5989_v17 = vpop.f32.mrb[0].mxu1 }
 0x200   : > { %v1886_v40 = vpop.f32.mrb[1].mxu1 }
 0x201   : > { %v5990_v29 = vpop.f32.mrb[2].mxu1 }
 0x202   : > { %v1889_v49 = vpop.f32.mrb[3].mxu1 }
 0x207   : > { %v5993_v7 = vpop.f32.mrb[4].mxu1 }
 0x208   : > { %v1902_v60 = vpop.f32.mrb[5].mxu1 }
 0x209   : > { %v5994_v24 = vpop.f32.mrb[6].mxu1 }
 0x20a   : > { %v1905_v20 = vpop.f32.mrb[7].mxu1 }
 0x20f   : > { %v5997_v30 = vpop.f32.mrb[8].mxu1 }
 0x210   : > { %v1918_v51 = vpop.f32.mrb[9].mxu1 }
 0x211   : > { %v5998_v31 = vpop.f32.mrb[10].mxu1 }
 0x212   : > { %v1921_v25 = vpop.f32.mrb[11].mxu1 }
 0x217   : > { %v6001_v59 = vpop.f32.mrb[12].mxu1 }
 0x218   : > { %v1934_v21 = vpop.f32.mrb[13].mxu1 }
 0x219   : > { %v6002_v11 = vpop.f32.mrb[14].mxu1 }
 0x21a   : > { %v1937_v27 = vpop.f32.mrb[15].mxu1 }
 0x21e   : > { %v6159_v47 = vpop.f32.mrb[0].mxu0 }
 0x21f   : > { %v8542_v52 = vadd.f32 %v6159_v47, %v5989_v17  ;;  %v4640_v53 = vpop.f32.mrb[1].mxu0 }
 0x220   : > { %v8544_v41 = vadd.f32 %v4640_v53, %v1886_v40  ;;  %v6160_v12 = vpop.f32.mrb[2].mxu0 }
 0x221   : > { %v8546_v8 = vadd.f32 %v6160_v12, %v5990_v29  ;;  %v4643_v9 = vpop.f32.mrb[3].mxu0 }
 0x222   : > { %v8548_v54 = vadd.f32 %v4643_v9, %v1889_v49 }
 0x226   : > { %v6163_v63 = vpop.f32.mrb[4].mxu0 }
 0x227   : > { %v8550_v18 = vadd.f32 %v6163_v63, %v5993_v7  ;;  %v4656_v44 = vpop.f32.mrb[5].mxu0 }
 0x228   : > { %v8552_v4 = vadd.f32 %v4656_v44, %v1902_v60  ;;  %v6164_v28 = vpop.f32.mrb[6].mxu0 }
 0x229   : > { %v8554_v6 = vadd.f32 %v6164_v28, %v5994_v24  ;;  %v4659_v10 = vpop.f32.mrb[7].mxu0 }
 0x22a   : > { %v8556_v2 = vadd.f32 %v4659_v10, %v1905_v20 }
 0x22e   : > { %v6167_v61 = vpop.f32.mrb[8].mxu0 }
 0x22f   : > { %v8558_v1 = vadd.f32 %v6167_v61, %v5997_v30  ;;  %v4672_v38 = vpop.f32.mrb[9].mxu0 }
 0x230   : > { %v8560_v13 = vadd.f32 %v4672_v38, %v1918_v51  ;;  %v6168_v16 = vpop.f32.mrb[10].mxu0 }
 0x231   : > { %v8562_v14 = vadd.f32 %v6168_v16, %v5998_v31  ;;  %v4675_v62 = vpop.f32.mrb[11].mxu0 }
 0x232   : > { %v8564_v19 = vadd.f32 %v4675_v62, %v1921_v25 }
 0x236   : > { %v6171_v42 = vpop.f32.mrb[12].mxu0 }
 0x237   : > { %v8566_v36 = vadd.f32 %v6171_v42, %v6001_v59  ;;  %v4688_v32 = vpop.f32.mrb[13].mxu0 }
 0x238   : > { %v8568_v37 = vadd.f32 %v4688_v32, %v1934_v21  ;;  %v6172_v57 = vpop.f32.mrb[14].mxu0 }
 0x239   : > { %v8570_v3 = vadd.f32 %v6172_v57, %v6002_v11  ;;  %v4691_v15 = vpop.f32.mrb[15].mxu0 }
 0x23a   : > { %v8572_v22 = vadd.f32 %v4691_v15, %v1937_v27 }
 0x23e   : > { %v6175_v34 = vpop.f32.mrb[16].mxu0 }
 0x23f   : > { %v6039_v23 = vpop.f32.mrb[16].mxu1  ;;  %v4704_v45 = vpop.f32.mrb[17].mxu0 }
 0x240   : > { %v8574_v0 = vadd.f32 %v6175_v34, %v6039_v23  ;;  %v2676_v46 = vpop.f32.mrb[17].mxu1  ;;  %v6176_v56 = vpop.f32.mrb[18].mxu0  ;;  %v4803_v34 = vadd.f32 (!%p5722_p2), %v8548_v54, %v8544_v41 }
 0x241   : > { %v8576_v43 = vadd.f32 %v4704_v45, %v2676_v46  ;;  %v6040_v5 = vpop.f32.mrb[18].mxu1  ;;  %v4707_v48 = vpop.f32.mrb[19].mxu0  ;;  %v4843_v46 = vmul.f32 (!%p5722_p2), %v8544_v41, %v8544_v41 }
 0x242   : > { %v8578_v55 = vadd.f32 %v6176_v56, %v6040_v5  ;;  %v2679_v58 = vpop.f32.mrb[19].mxu1  ;;  %v4804_v23 = vadd.f32 (!%p5722_p2), %v8542_v52, %v4803_v34  ;;  %v4844_v56 = vmul.f32 (!%p5722_p2), %v8548_v54, %v8548_v54  ;;  %v4854_v34 = vmul.f32 (!%p5722_p2), %v8562_v14, %v8562_v14 }
 0x243   : > { %v8580_v50 = vadd.f32 %v4707_v48, %v2679_v58  ;;  %v4845_v48 = vmul.f32 (!%p5722_p2), %v8542_v52, %v8542_v52 }
 0x244   : > { %v4805_v45 = vadd.f32 (!%p5722_p2), %v8546_v8, %v4804_v23 }
 0x246   : > { %v6179_v35 = vpop.f32.mrb[20].mxu0  ;;  %v4806_v5 = vadd.f32 (!%p5722_p2), %v8552_v4, %v4805_v45 }
 0x247   : > { %v6043_v33 = vpop.f32.mrb[20].mxu1  ;;  %v4720_v39 = vpop.f32.mrb[21].mxu0 }
 0x248   : > { %v8582_v26 = vadd.f32 %v6179_v35, %v6043_v33  ;;  %v2692_v17 = vpop.f32.mrb[21].mxu1  ;;  %v6180_v40 = vpop.f32.mrb[22].mxu0  ;;  %v4807_v58 = vadd.f32 (!%p5722_p2), %v8556_v2, %v4806_v5  ;;  %v4846_v35 = vmul.f32 (!%p5722_p2), %v8546_v8, %v8546_v8  ;;  %v4875_v33 = vadd.f32 (!%p5722_p2), %v4844_v56, %v4843_v46 }
 0x249   : > { %v8584_v29 = vadd.f32 %v4720_v39, %v2692_v17  ;;  %v6044_v49 = vpop.f32.mrb[22].mxu1  ;;  %v4723_v7 = vpop.f32.mrb[23].mxu0  ;;  %v4847_v17 = vmul.f32 (!%p5722_p2), %v8552_v4, %v8552_v4  ;;  %v4855_v46 = vmul.f32 (!%p5722_p2), %v8568_v37, %v8568_v37 }
 0x24a   : > { %v8586_v60 = vadd.f32 %v6180_v40, %v6044_v49  ;;  %v2695_v24 = vpop.f32.mrb[23].mxu1  ;;  %v4808_v39 = vadd.f32 (!%p5722_p2), %v8550_v18, %v4807_v58  ;;  %v4876_v40 = vadd.f32 (!%p5722_p2), %v4875_v33, %v4845_v48  ;;  %v4856_v48 = vmul.f32 (!%p5722_p2), %v8572_v22, %v8572_v22 }
 0x24b   : > { %v8588_v20 = vadd.f32 %v4723_v7, %v2695_v24  ;;  %v4848_v7 = vmul.f32 (!%p5722_p2), %v8556_v2, %v8556_v2  ;;  %v4857_v33 = vmul.f32 (!%p5722_p2), %v8566_v36, %v8566_v36 }
 0x24c   : > { %v4809_v49 = vadd.f32 (!%p5722_p2), %v8554_v6, %v4808_v39  ;;  %v4877_v24 = vadd.f32 (!%p5722_p2), %v4876_v40, %v4846_v35  ;;  %v4858_v40 = vmul.f32 (!%p5722_p2), %v8570_v3, %v8570_v3 }
 0x24e   : > { %v6183_v30 = vpop.f32.mrb[24].mxu0 }
 0x24f   : > { %v6047_v51 = vpop.f32.mrb[24].mxu1  ;;  %v4736_v31 = vpop.f32.mrb[25].mxu0 }
 0x250   : > { %v8590_v25 = vadd.f32 %v6183_v30, %v6047_v51  ;;  %v2708_v59 = vpop.f32.mrb[25].mxu1  ;;  %v6184_v21 = vpop.f32.mrb[26].mxu0  ;;  %v4810_v30 = vadd.f32 (!%p5722_p2), %v8560_v13, %v4809_v49  ;;  %v4849_v51 = vmul.f32 (!%p5722_p2), %v8550_v18, %v8550_v18 }
 0x251   : > { %v8592_v11 = vadd.f32 %v4736_v31, %v2708_v59  ;;  %v6048_v27 = vpop.f32.mrb[26].mxu1  ;;  %v4739_v47 = vpop.f32.mrb[27].mxu0  ;;  %v4878_v31 = vadd.f32 (!%p5722_p2), %v4877_v24, %v4847_v17  ;;  %v4859_v24 = vmul.f32 (!%p5722_p2), %v8576_v43, %v8576_v43 }
 0x252   : > { %v8594_v53 = vadd.f32 %v6184_v21, %v6048_v27  ;;  %v2711_v12 = vpop.f32.mrb[27].mxu1  ;;  %v4811_v59 = vadd.f32 (!%p5722_p2), %v8564_v19, %v4810_v30  ;;  %v4850_v21 = vmul.f32 (!%p5722_p2), %v8554_v6, %v8554_v6 }
 0x253   : > { %v8596_v9 = vadd.f32 %v4739_v47, %v2711_v12  ;;  %v4879_v27 = vadd.f32 (!%p5722_p2), %v4878_v31, %v4848_v7  ;;  %v4851_v12 = vmul.f32 (!%p5722_p2), %v8560_v13, %v8560_v13  ;;  %v4860_v31 = vmul.f32 (!%p5722_p2), %v8580_v50, %v8580_v50 }
 0x254   : > { %v4812_v47 = vadd.f32 (!%p5722_p2), %v8558_v1, %v4811_v59 }
 0x255   : > { %4801 = sbr.rel (%p5722_p2) target bundleno = 667 (0x29b), region = 44 }
 0x256   : > { %v6187_v63 = vpop.f32.mrb[28].mxu0 }
 0x257   : > { %v6051_v44 = vpop.f32.mrb[28].mxu1  ;;  %v4752_v28 = vpop.f32.mrb[29].mxu0 }
 0x258   : > { %v8598_v10 = vadd.f32 %v6187_v63, %v6051_v44  ;;  %v2724_v61 = vpop.f32.mrb[29].mxu1  ;;  %v6188_v38 = vpop.f32.mrb[30].mxu0  ;;  %v4880_v63 = vadd.f32 (!%p5722_p2), %v4879_v27, %v4849_v51  ;;  %v4813_v44 = vadd.f32 (!%p5722_p2), %v8562_v14, %v4812_v47  ;;  %v4861_v27 = vmul.f32 (!%p5722_p2), %v8574_v0, %v8574_v0 }
 0x259   : > { %v8600_v16 = vadd.f32 %v4752_v28, %v2724_v61  ;;  %v6052_v62 = vpop.f32.mrb[30].mxu1  ;;  %v4755_v42 = vpop.f32.mrb[31].mxu0  ;;  %v4852_v28 = vmul.f32 (!%p5722_p2), %v8564_v19, %v8564_v19 }
 0x25a   : > { %v8602_v32 = vadd.f32 %v6188_v38, %v6052_v62  ;;  %v2727_v57 = vpop.f32.mrb[31].mxu1  ;;  %v4881_v61 = vadd.f32 (!%p5722_p2), %v4880_v63, %v4850_v21  ;;  %v4814_v38 = vadd.f32 (!%p5722_p2), %v8568_v37, %v4813_v44  ;;  %v4853_v62 = vmul.f32 (!%p5722_p2), %v8558_v1, %v8558_v1 }
 0x25b   : > { %v8604_v15 = vadd.f32 %v4755_v42, %v2727_v57  ;;  %v4862_v63 = vmul.f32 (!%p5722_p2), %v8578_v55, %v8578_v55 }
 0x25c   : > { %v4882_v42 = vadd.f32 %v4881_v61, %v4851_v12  ;;  %v4815_v57 = vadd.f32 %v8572_v22, %v4814_v38  ;;  %v4863_v61 = vmul.f32 %v8584_v29, %v8584_v29 }
 0x25e   : > { %v4883_v23 = vadd.f32 %v4882_v42, %v4852_v28  ;;  %v4816_v45 = vadd.f32 %v8566_v36, %v4815_v57  ;;  %v4864_v42 = vmul.f32 %v8588_v20, %v8588_v20 }
 0x260   : > { %v4884_v56 = vadd.f32 %v4883_v23, %v4853_v62  ;;  %v4817_v5 = vadd.f32 %v8570_v3, %v4816_v45  ;;  %v4865_v23 = vmul.f32 %v8582_v26, %v8582_v26 }
 0x262   : > { %v4885_v58 = vadd.f32 %v4884_v56, %v4854_v34  ;;  %v4818_v35 = vadd.f32 %v8576_v43, %v4817_v5  ;;  %v4866_v56 = vmul.f32 %v8586_v60, %v8586_v60 }
 0x264   : > { %v4886_v39 = vadd.f32 %v4885_v58, %v4855_v46  ;;  %v4819_v17 = vadd.f32 %v8580_v50, %v4818_v35  ;;  %v4867_v58 = vmul.f32 %v8592_v11, %v8592_v11 }
 0x266   : > { %v4887_v49 = vadd.f32 %v4886_v39, %v4856_v48  ;;  %v4820_v7 = vadd.f32 %v8574_v0, %v4819_v17  ;;  %v4868_v39 = vmul.f32 %v8596_v9, %v8596_v9 }
 0x268   : > { %v4888_v30 = vadd.f32 %v4887_v49, %v4857_v33  ;;  %v4821_v51 = vadd.f32 %v8578_v55, %v4820_v7  ;;  %v4869_v49 = vmul.f32 %v8590_v25, %v8590_v25 }
 0x26a   : > { %v4889_v59 = vadd.f32 %v4888_v30, %v4858_v40  ;;  %v4822_v21 = vadd.f32 %v8584_v29, %v4821_v51  ;;  %v4870_v30 = vmul.f32 %v8594_v53, %v8594_v53 }
 0x26c   : > { %v4890_v47 = vadd.f32 %v4889_v59, %v4859_v24  ;;  %v4823_v12 = vadd.f32 %v8588_v20, %v4822_v21  ;;  %v4871_v59 = vmul.f32 %v8600_v16, %v8600_v16 }
 0x26e   : > { %v4891_v44 = vadd.f32 %v4890_v47, %v4860_v31  ;;  %v4824_v28 = vadd.f32 %v8582_v26, %v4823_v12  ;;  %v4872_v47 = vmul.f32 %v8604_v15, %v8604_v15 }
 0x270   : > { %v4892_v38 = vadd.f32 %v4891_v44, %v4861_v27  ;;  %v4825_v62 = vadd.f32 %v8586_v60, %v4824_v28  ;;  %v4873_v44 = vmul.f32 %v8598_v10, %v8598_v10 }
 0x272   : > { %v4893_v57 = vadd.f32 %v4892_v38, %v4862_v63  ;;  %v4826_v34 = vadd.f32 %v8592_v11, %v4825_v62  ;;  %v4874_v38 = vmul.f32 %v8602_v32, %v8602_v32 }
 0x274   : > { %v4894_v45 = vadd.f32 %v4893_v57, %v4863_v61  ;;  %v4827_v46 = vadd.f32 %v8596_v9, %v4826_v34 }
 0x276   : > { %v4895_v5 = vadd.f32 %v4894_v45, %v4864_v42  ;;  %v4828_v48 = vadd.f32 %v8590_v25, %v4827_v46  ;;  %v4802_v46 = vld [vmem:[#allocation2] sm:$0x1] }
 0x278   : > { %v4896_v35 = vadd.f32 %v4895_v5, %v4865_v23  ;;  %v4829_v33 = vadd.f32 %v8594_v53, %v4828_v48 }
 0x27a   : > { %v4897_v17 = vadd.f32 %v4896_v35, %v4866_v56  ;;  %v4830_v40 = vadd.f32 %v8600_v16, %v4829_v33 }
 0x27c   : > { %v4898_v7 = vadd.f32 %v4897_v17, %v4867_v58  ;;  %v4831_v24 = vadd.f32 %v8604_v15, %v4830_v40  ;;  %v4842_v17 = vld [vmem:[#allocation3] sm:$0x1] }
 0x27e   : > { %v4899_v51 = vadd.f32 %v4898_v7, %v4868_v39  ;;  %v4832_v31 = vadd.f32 %v8598_v10, %v4831_v24 }
 0x280   : > { %v4900_v21 = vadd.f32 %v4899_v51, %v4869_v49  ;;  %v4833_v27 = vadd.f32 %v8602_v32, %v4832_v31 }
 0x282   : > { %v4901_v12 = vadd.f32 %v4900_v21, %v4870_v30  ;;  %v4834_v63 = vrot.slane %v4833_v27, 4 }
 0x284   : > { %v4902_v28 = vadd.f32 %v4901_v12, %v4871_v59  ;;  %v4835_v61 = vadd.f32 %v4834_v63, %v4833_v27 }
 0x286   : > { %v4903_v62 = vadd.f32 %v4902_v28, %v4872_v47  ;;  %v4836_v42 = vrot.slane %v4835_v61, 2 }
 0x288   : > { %v4904_v57 = vadd.f32 %v4903_v62, %v4873_v44  ;;  %v4837_v34 = vadd.f32 %v4836_v42, %v4835_v61 }
 0x28a   : > { %v4905_v23 = vadd.f32 %v4904_v57, %v4874_v38  ;;  %v4838_v45 = vrot.slane %v4837_v34, 1 }
 0x28c   : > { %v4906_v56 = vrot.slane %v4905_v23, 4  ;;  %v4839_v5 = vadd.f32 %v4838_v45, %v4837_v34 }
 0x28e   : > { %v4907_v48 = vadd.f32 %v4906_v56, %v4905_v23  ;;  %v4840_v58 = vadd.f32 %v4839_v5, %v4802_v46 }
 0x290   : > { %v4908_v35 = vrot.slane %v4907_v48, 2  ;;  %4841 = vst [vmem:[#allocation2] sm:$0x1] %v4840_v58 }
 0x292   : > { %v4909_v33 = vadd.f32 %v4908_v35, %v4907_v48 }
 0x294   : > { %v4910_v39 = vrot.slane %v4909_v33, 1 }
 0x296   : > { %v4911_v40 = vadd.f32 %v4910_v39, %v4909_v33 }
 0x298   : > { %v4912_v49 = vadd.f32 %v4911_v40, %v4842_v17 }
 0x29a   : > { %4913 = vst [vmem:[#allocation3] sm:$0x1] %v4912_v49 }
 0x29b PF: > { %p5723_p4 = scmp.ne.s32.totalorder %s6720_s19, 1 }
 0x29c   : > { %v4918_v7 = vld [vmem:[#allocation2] sm:$0x1] (!%p5723_p4)  ;;  %v4933_v47 = vlaneseq (!%p5723_p4)  ;;  %v4927_v63 = vld [vmem:[%s8907_s2] sm:$0x1] (!%p5723_p4) }
 0x29d   : > { %4917 = sbr.rel (%p5723_p4) target bundleno = 727 (0x2d7), region = 48  ;;  %v4919_v30 = vmul.f32 (!%p5723_p4), 0.001953125, %v4918_v7  ;;  %v4929_v38 = vld [vmem:[%s8908_s3] sm:$0x1] (!%p5723_p4) }
 0x29e   : > { %v4934_v12 = vshrl.u32 (!%p5723_p4), %v4933_v47, 7 }
 0x29f   : > { %v4922_v31 = vmul.f32 (!%p5723_p4), %v4919_v30, %v4919_v30 }
 0x2a0   : > { %v4935_v44 = vsub.s32 (!%p5723_p4), 0, %v4934_v12 }
 0x2a1   : > { %v4920_v24 = vld [vmem:[#allocation3] sm:$0x1] (!%p5723_p4) }
 0x2a2   : > { %v4921_v51 = vmul.f32 (!%p5723_p4), 0.001953125, %v4920_v24 }
 0x2a4   : > { %v4923_v59 = vsub.f32 %v4921_v51, %v4922_v31 }
 0x2a6   : > { %v4924_v21 = vmax.f32 %v4923_v59, 0.0 }
 0x2a8   : > { %v4925_v27 = vadd.f32 1e-05, %v4924_v21 }
 0x2aa   : > { %6636 = vrsqrt.f32 %v4925_v27 }
 0x2b4   : > { %v6637_v28 = vpop.eup %6636 }
 0x2b5   : > { %v4928_v61 = vmul.f32 %v6637_v28, %v4927_v63 }
 0x2b7   : > { %v4930_v62 = vmul.f32 %v4928_v61, %v4919_v30  ;;  %v8710_v42 = vrot.slane %v4928_v61, %v4935_v44 }
 0x2b9   : > { %v4931_v57 = vsub.f32 %v4929_v38, %v4930_v62  ;;  %v4938_v34 = vmul.f32 %v8544_v41, %v8710_v42  ;;  %v4939_v23 = vmul.f32 %v8548_v54, %v8710_v42  ;;  %v4940_v45 = vmul.f32 %v8542_v52, %v8710_v42 }
 0x2ba   : > { %v4941_v46 = vmul.f32 %v8546_v8, %v8710_v42  ;;  %v4942_v56 = vmul.f32 %v8552_v4, %v8710_v42  ;;  %v4943_v5 = vmul.f32 %v8556_v2, %v8710_v42  ;;  %v4944_v48 = vmul.f32 %v8550_v18, %v8710_v42 }
 0x2bb   : > { %v8726_v58 = vrot.slane %v4931_v57, %v4935_v44  ;;  %v4945_v41 = vmul.f32 %v8554_v6, %v8710_v42  ;;  %v4946_v52 = vmul.f32 %v8560_v13, %v8710_v42  ;;  %v4947_v8 = vmul.f32 %v8564_v19, %v8710_v42 }
 0x2bc   : > { %v4948_v54 = vmul.f32 %v8558_v1, %v8710_v42  ;;  %v4949_v4 = vmul.f32 %v8562_v14, %v8710_v42  ;;  %v4950_v18 = vmul.f32 %v8568_v37, %v8710_v42  ;;  %v4951_v2 = vmul.f32 %v8572_v22, %v8710_v42 }
 0x2bd   : > { %v4976_v6 = vadd.f32 %v8726_v58, %v4938_v34  ;;  %v4977_v13 = vadd.f32 %v8726_v58, %v4939_v23  ;;  %v4978_v19 = vadd.f32 %v8726_v58, %v4940_v45  ;;  %v4979_v1 = vadd.f32 %v8726_v58, %v4941_v46 }
 0x2be   : > { %v4980_v14 = vadd.f32 %v8726_v58, %v4942_v56  ;;  %v4981_v35 = vadd.f32 %v8726_v58, %v4943_v5  ;;  %v4982_v37 = vadd.f32 %v8726_v58, %v4944_v48  ;;  %v4983_v22 = vadd.f32 %v8726_v58, %v4945_v41 }
 0x2bf   : > { %v5008_v33 = vmax.f32 %v4976_v6, 0.0  ;;  %v5009_v39 = vmax.f32 %v4977_v13, 0.0  ;;  %v5010_v17 = vmax.f32 %v4978_v19, 0.0  ;;  %v5011_v40 = vmax.f32 %v4979_v1, 0.0 }
 0x2c0   : > { %v5012_v49 = vmax.f32 %v4980_v14, 0.0  ;;  %v5013_v7 = vmax.f32 %v4981_v35, 0.0  ;;  %v5014_v24 = vmax.f32 %v4982_v37, 0.0  ;;  %v5015_v30 = vmax.f32 %v4983_v22, 0.0 }
 0x2c1   : > { %5040 = vst [vmem:[%s6844_s13] sm:$0xff] %v5008_v33  ;;  %5041 = vst [vmem:[%s6844_s13 + $0x8] sm:$0xff] %v5009_v39  ;;  %v4984_v51 = vadd.f32 %v8726_v58, %v4946_v52  ;;  %v4985_v31 = vadd.f32 %v8726_v58, %v4947_v8  ;;  %v4986_v59 = vadd.f32 %v8726_v58, %v4948_v54 }
 0x2c2   : > { %5042 = vst [vmem:[%s6844_s13 + $0x10] sm:$0xff] %v5010_v17  ;;  %5043 = vst [vmem:[%s6844_s13 + $0x18] sm:$0xff] %v5011_v40  ;;  %v4987_v21 = vadd.f32 %v8726_v58, %v4949_v4  ;;  %v4988_v27 = vadd.f32 %v8726_v58, %v4950_v18  ;;  %v4989_v47 = vadd.f32 %v8726_v58, %v4951_v2 }
 0x2c3   : > { %5044 = vst [vmem:[%s6844_s13 + $0x20] sm:$0xff] %v5012_v49  ;;  %5045 = vst [vmem:[%s6844_s13 + $0x28] sm:$0xff] %v5013_v7  ;;  %v4952_v12 = vmul.f32 %v8566_v36, %v8710_v42  ;;  %v4953_v63 = vmul.f32 %v8570_v3, %v8710_v42  ;;  %v5016_v44 = vmax.f32 %v4984_v51, 0.0  ;;  %v5017_v28 = vmax.f32 %v4985_v31, 0.0 }
 0x2c4   : > { %5046 = vst [vmem:[%s6844_s13 + $0x30] sm:$0xff] %v5014_v24  ;;  %5047 = vst [vmem:[%s6844_s13 + $0x38] sm:$0xff] %v5015_v30  ;;  %v5018_v61 = vmax.f32 %v4986_v59, 0.0  ;;  %v5019_v38 = vmax.f32 %v4987_v21, 0.0  ;;  %v5020_v62 = vmax.f32 %v4988_v27, 0.0  ;;  %v5021_v57 = vmax.f32 %v4989_v47, 0.0 }
 0x2c5   : > { %v4990_v34 = vadd.f32 %v8726_v58, %v4952_v12  ;;  %v4991_v23 = vadd.f32 %v8726_v58, %v4953_v63  ;;  %5048 = vst [vmem:[%s6844_s13 + $0x40] sm:$0xff] %v5016_v44  ;;  %5049 = vst [vmem:[%s6844_s13 + $0x48] sm:$0xff] %v5017_v28  ;;  %v4954_v36 = vmul.f32 %v8576_v43, %v8710_v42 }
 0x2c6   : > { %5050 = vst [vmem:[%s6844_s13 + $0x50] sm:$0xff] %v5018_v61  ;;  %5051 = vst [vmem:[%s6844_s13 + $0x58] sm:$0xff] %v5019_v38  ;;  %v4955_v3 = vmul.f32 %v8580_v50, %v8710_v42  ;;  %v4956_v45 = vmul.f32 %v8574_v0, %v8710_v42  ;;  %v4957_v46 = vmul.f32 %v8578_v55, %v8710_v42 }
 0x2c7   : > { %5052 = vst [vmem:[%s6844_s13 + $0x60] sm:$0xff] %v5020_v62  ;;  %5053 = vst [vmem:[%s6844_s13 + $0x68] sm:$0xff] %v5021_v57  ;;  %v5022_v56 = vmax.f32 %v4990_v34, 0.0  ;;  %v5023_v5 = vmax.f32 %v4991_v23, 0.0  ;;  %v4958_v48 = vmul.f32 %v8584_v29, %v8710_v42  ;;  %v4959_v41 = vmul.f32 %v8588_v20, %v8710_v42 }
 0x2c8   : > { %v4992_v43 = vadd.f32 %v8726_v58, %v4954_v36  ;;  %v4993_v50 = vadd.f32 %v8726_v58, %v4955_v3  ;;  %v4994_v52 = vadd.f32 %v8726_v58, %v4956_v45  ;;  %v4995_v0 = vadd.f32 %v8726_v58, %v4957_v46 }
 0x2c9   : > { %5054 = vst [vmem:[%s6844_s13 + $0x70] sm:$0xff] %v5022_v56  ;;  %5055 = vst [vmem:[%s6844_s13 + $0x78] sm:$0xff] %v5023_v5  ;;  %v4996_v55 = vadd.f32 %v8726_v58, %v4958_v48  ;;  %v4997_v29 = vadd.f32 %v8726_v58, %v4959_v41  ;;  %v4960_v20 = vmul.f32 %v8582_v26, %v8710_v42 }
 0x2ca   : > { %v4961_v8 = vmul.f32 %v8586_v60, %v8710_v42  ;;  %v5024_v54 = vmax.f32 %v4992_v43, 0.0  ;;  %v5025_v4 = vmax.f32 %v4993_v50, 0.0  ;;  %v5026_v18 = vmax.f32 %v4994_v52, 0.0 }
 0x2cb   : > { %v5027_v2 = vmax.f32 %v4995_v0, 0.0  ;;  %v5028_v6 = vmax.f32 %v4996_v55, 0.0  ;;  %v5029_v13 = vmax.f32 %v4997_v29, 0.0  ;;  %v4998_v19 = vadd.f32 %v8726_v58, %v4960_v20 }
 0x2cc   : > { %v4999_v1 = vadd.f32 %v8726_v58, %v4961_v8  ;;  %5056 = vst [vmem:[%s6844_s13 + $0x80] sm:$0xff] %v5024_v54  ;;  %5057 = vst [vmem:[%s6844_s13 + $0x88] sm:$0xff] %v5025_v4  ;;  %v4962_v26 = vmul.f32 %v8592_v11, %v8710_v42  ;;  %v4963_v60 = vmul.f32 %v8596_v9, %v8710_v42 }
 0x2cd   : > { %5058 = vst [vmem:[%s6844_s13 + $0x90] sm:$0xff] %v5026_v18  ;;  %5059 = vst [vmem:[%s6844_s13 + $0x98] sm:$0xff] %v5027_v2  ;;  %v4964_v14 = vmul.f32 %v8590_v25, %v8710_v42  ;;  %v4965_v35 = vmul.f32 %v8594_v53, %v8710_v42  ;;  %v5030_v37 = vmax.f32 %v4998_v19, 0.0  ;;  %v4966_v33 = vmul.f32 %v8600_v16, %v8710_v42 }
 0x2ce   : > { %5060 = vst [vmem:[%s6844_s13 + $0xa0] sm:$0xff] %v5028_v6  ;;  %5061 = vst [vmem:[%s6844_s13 + $0xa8] sm:$0xff] %v5029_v13  ;;  %v5031_v22 = vmax.f32 %v4999_v1, 0.0  ;;  %v4967_v39 = vmul.f32 %v8604_v15, %v8710_v42  ;;  %v5000_v11 = vadd.f32 %v8726_v58, %v4962_v26  ;;  %v5001_v9 = vadd.f32 %v8726_v58, %v4963_v60 }
 0x2cf   : > { %v5002_v17 = vadd.f32 %v8726_v58, %v4964_v14  ;;  %v5003_v25 = vadd.f32 %v8726_v58, %v4965_v35  ;;  %5062 = vst [vmem:[%s6844_s13 + $0xb0] sm:$0xff] %v5030_v37  ;;  %v5004_v53 = vadd.f32 %v8726_v58, %v4966_v33  ;;  %v4968_v15 = vmul.f32 %v8598_v10, %v8710_v42 }
 0x2d0   : > { %5063 = vst [vmem:[%s6844_s13 + $0xb8] sm:$0xff] %v5031_v22  ;;  %v5005_v16 = vadd.f32 %v8726_v58, %v4967_v39  ;;  %v4969_v40 = vmul.f32 %v8602_v32, %v8710_v42  ;;  %v5032_v49 = vmax.f32 %v5000_v11, 0.0  ;;  %v5033_v7 = vmax.f32 %v5001_v9, 0.0 }
 0x2d1   : > { %v5034_v24 = vmax.f32 %v5002_v17, 0.0  ;;  %v5035_v30 = vmax.f32 %v5003_v25, 0.0  ;;  %v5036_v51 = vmax.f32 %v5004_v53, 0.0  ;;  %v5006_v59 = vadd.f32 %v8726_v58, %v4968_v15 }
 0x2d2   : > { %v5037_v31 = vmax.f32 %v5005_v16, 0.0  ;;  %v5007_v21 = vadd.f32 %v8726_v58, %v4969_v40  ;;  %5064 = vst [vmem:[%s6844_s13 + $0xc0] sm:$0xff] %v5032_v49  ;;  %5065 = vst [vmem:[%s6844_s13 + $0xc8] sm:$0xff] %v5033_v7 }
 0x2d3   : > { %5066 = vst [vmem:[%s6844_s13 + $0xd0] sm:$0xff] %v5034_v24  ;;  %5067 = vst [vmem:[%s6844_s13 + $0xd8] sm:$0xff] %v5035_v30  ;;  %v5038_v10 = vmax.f32 %v5006_v59, 0.0 }
 0x2d4   : > { %5068 = vst [vmem:[%s6844_s13 + $0xe0] sm:$0xff] %v5036_v51  ;;  %5069 = vst [vmem:[%s6844_s13 + $0xe8] sm:$0xff] %v5037_v31  ;;  %v5039_v32 = vmax.f32 %v5007_v21, 0.0 }
 0x2d5   : > { %5070 = vst [vmem:[%s6844_s13 + $0xf0] sm:$0xff] %v5038_v10 }
 0x2d6   : > { %5071 = vst [vmem:[%s6844_s13 + $0xf8] sm:$0xff] %v5039_v32 }
 0x2d7 PF: > { %s5729_s24 = sshll.u32 %s6716_s18, 12  ;;  %s5089_s8 = sshll.u32 %s6844_s13, 4  ;;  %s8849_s8 = int_to_ptr.vmem [resolvable:$true] %s5089_s8 }
 0x2d8   : > { %s8846_s7 = scalar_lea.hbm %s8909_s4, %s5729_s24  ;;  %s8853_s9 = scalar_lea.sflag [#allocation5], %s209_s6 }
 0x2d9   : > { %s6638_s10 = scalar_lea.vmem %s8849_s8, 4096  ;;  %s6735_s18 = smov [#allocation4]  }
 0x2da   : > { %p6639_p5 = scmp.ne.s32.totalorder %s8849_s8, %s6638_s10  ;;  %s6642_s11 = sshll.u32 %s6735_s18, 4  ;;  %s6643_s11 = int_to_ptr.vmem [resolvable:$false] %s6642_s11 }
 0x2db   : > { %s6644_s12 = scalar_lea.vmem %s6643_s11, 8192  ;;  %p6645_p9 = scmp.lt.s32.totalorder %s8849_s8, %s6643_s11 }
 0x2dc   : > { %p6640_p6 = pnand %p6639_p5, %p6815_p3  ;;  %p6646_p10 = scmp.lt.s32.totalorder %s6644_s12, %s6638_s10 }
 0x2de   : > { %p6641_p7 = pneg %p6640_p6  ;;  %p6647_p11 = por %p6646_p10, %p6645_p9 }
 0x2e0   : > { %p6648_p12 = pnand %p6647_p11, %p6641_p7 }
 0x2e2   : > { %6651 = shalt.err (!%p6648_p12)
}
 0x2e3   : > { %s6652_s6 = scalar_lea.hbm %s8846_s7, 4096  ;;  %s6656_s19 = scalar_lea.hbm %s8909_s4, 8192 }
 0x2e4   : > { %p6653_p13 = scmp.ne.s32.totalorder %s8846_s7, %s6652_s6  ;;  %p6657_p2 = scmp.lt.u32.totalorder %s8846_s7, %s8909_s4 }
 0x2e5   : > { %p6658_p4 = scmp.lt.u32.totalorder %s6656_s19, %s6652_s6  ;;  %p6660_p6 = scmp.lt.u32.totalorder %s6652_s6, %s8846_s7 }
 0x2e6   : > { %p6654_p0 = pnand %p6653_p13, %p6815_p3 }
 0x2e7   : > { %p6659_p5 = por %p6658_p4, %p6657_p2 }
 0x2e8   : > { %p6655_p1 = pneg %p6654_p0 }
 0x2e9   : > { %p6661_p7 = por %p6660_p6, %p6659_p5 }
 0x2eb   : > { %p6662_p9 = pnand %p6661_p7, %p6655_p1 }
 0x2ed   : > { %6665 = shalt.err (!%p6662_p9)
}
 0x2ee   : > { %s6736_s27 = smov 128   ;;  %s6737_s28 = smov 8  }
 0x2ef   : > { %6458 = dma.vmem_to_hbm [thread:$0]  (%p6815_p3), %s8849_s8, 4096, %s8846_s7, %s8853_s9, %s6736_s27, %s6736_s27, %s6737_s28  }
 0x2f0 PF: > { %p6464_p10 = scmp.ge.s32.totalorder %s6732_s22, 2  ;;  %s5104_s10 = sand.u32 1, %s6704_s15  }
 0x2f1   : > { %s5105_s18 = scalar_lea.sflag [#allocation5], %s5104_s10 }
 0x2f2   : > { %p6461_p11 = pnand %p6464_p10, %p6826_p8 }
 0x2f4   : > { %6699 = dma.done.wait (!%p6461_p11), %s5105_s18, 4096  }
 0x2f5   : > { %6701 = vsyncadd (!%p6461_p11), %s5105_s18, 4294963200  ;;  %s17_s22 = sadd.s32 1, %s6732_s22   ;;  %s8975_s15 = smov %s6708_s16 }
 0x2f6   : > { %p14_p12 = scmp.ge.s32.totalorder %s17_s22, 6   ;;  %s8976_s16 = smov %s6712_s17 }
 0x2f7   : > { %s8977_s17 = smov %s6824_s30  ;;  %s8978_s18 = smov %s6724_s20 }
 0x2f8   : > { %s8979_s19 = smov %s6728_s21  ;;  %s8980_s20 = smov %s8983_s25 }
 0x2f9   : > { %s8981_s21 = smov %s8987_s26  ;;  %16 = sbr.rel (!%p14_p12) target bundleno = 5 (0x5), region = 94 }
 0x300   :  { %5110 = vsyncpa [#allocation5], 1 }
 0x301   :  { %5112 = vsyncpa [#allocation5 + $0x1], 1 }

</bundles_post_ra>
